<compile_context>
chip_gen: v7x
topology: tpu7x:2x2x1
jax: 0.10.0
libtpu: 0.0.40
codegen_flags: <defaults>
</compile_context>

<pallas_src>
import functools

import jax
import jax.numpy as jnp
from jax import lax
from jax.experimental import pallas as pl
from jax.experimental.pallas import tpu as pltpu


PARAM_ORDER = ("g1", "b1", "wqkv", "bqkv", "wsl", "bsl",
               "g2", "b2", "wkv", "bkv", "wq", "bq", "wcl", "bcl",
               "g3", "b3", "wf1", "bf1", "wf2", "bf2")


# ----------------------------------------------------------------------------
# Pallas kernel: one DecoderLayer forward for a block of `bb` sequences.
# Activations arrive flattened as (bb*T, C); weights are (in, out) bf16.
# ----------------------------------------------------------------------------
def decoder_layer_kernel(n_heads, bb, T, x_ref, enc_ref,
                         g1_ref, b1_ref, wqkv_ref, bqkv_ref, wsl_ref, bsl_ref,
                         g2_ref, b2_ref, wkv_ref, bkv_ref, wq_ref, bq_ref,
                         wcl_ref, bcl_ref,
                         g3_ref, b3_ref, wf1_ref, bf1_ref, wf2_ref, bf2_ref,
                         out_ref):
    C = x_ref.shape[-1]
    H = n_heads
    hs = C // H
    bf16 = jnp.bfloat16

    x = x_ref[...].astype(jnp.float32)       # (bb*T, C)
    enc = enc_ref[...].astype(jnp.float32)   # (bb*T, C)

    def layernorm(h, g_ref, b_ref):
        mu = jnp.mean(h, axis=-1, keepdims=True)
        var = jnp.mean((h - mu) ** 2, axis=-1, keepdims=True)
        return (h - mu) * lax.rsqrt(var + 1e-5) * g_ref[...] + b_ref[...]

    def softmax_rows(s):                     # f32 softmax, EUP reciprocal
        s = s - jnp.max(s, axis=-1, keepdims=True)
        e = jnp.exp(s)
        denom = jnp.sum(e, axis=-1, keepdims=True)
        return e * pl.reciprocal(denom, approx=True)

    # causal mask (T, T): keep row >= col
    rows_i = lax.broadcasted_iota(jnp.int32, (T, T), 0)
    cols_i = lax.broadcasted_iota(jnp.int32, (T, T), 1)
    causal = rows_i >= cols_i

    def attention(q_all, k_all, v_all, w_out, masked):
        # q_all/k_all/v_all: (bb*T, C) f32; head h occupies cols [h*hs,(h+1)*hs).
        # The attention scale is already folded into the Q projection.
        # Head merge is folded into the output projection: no concatenate over
        # heads; per-head (T,hs) results hit rows [h*hs,(h+1)*hs) of w_out.
        out_rows = []
        for b in range(bb):
            r0 = b * T
            acc = jnp.zeros((T, C), jnp.float32)
            for h in range(H):
                c0 = h * hs
                q_h = q_all[r0:r0 + T, c0:c0 + hs].astype(bf16)
                k_h = k_all[r0:r0 + T, c0:c0 + hs].astype(bf16)
                v_h = v_all[r0:r0 + T, c0:c0 + hs].astype(bf16)
                s = jnp.dot(q_h, k_h.T, preferred_element_type=jnp.float32)
                if masked:
                    s = jnp.where(causal, s, -1e9)
                p = softmax_rows(s)
                o_h = jnp.dot(p.astype(bf16), v_h,
                              preferred_element_type=jnp.float32)       # (T, hs)
                acc = acc + jnp.dot(o_h.astype(bf16), w_out[c0:c0 + hs, :],
                                    preferred_element_type=jnp.float32)
            out_rows.append(acc)
        return out_rows[0] if bb == 1 else jnp.concatenate(out_rows, axis=0)

    # -------------------- masked multi-head self-attention --------------------
    h_n = layernorm(x, g1_ref, b1_ref)
    qkv = jnp.dot(h_n.astype(bf16), wqkv_ref[...],
                  preferred_element_type=jnp.float32) + bqkv_ref[...]   # (R, 3C)
    sa = attention(qkv[:, :C], qkv[:, C:2 * C], qkv[:, 2 * C:],
                   wsl_ref[...], masked=True)
    x = x + sa + bsl_ref[...]          # residual (dropout = identity)

    # ---------- multi-head cross-attention (norm2 on both enc and x) ----------
    enc_n = layernorm(enc, g2_ref, b2_ref)
    x_n = layernorm(x, g2_ref, b2_ref)
    kv = jnp.dot(enc_n.astype(bf16), wkv_ref[...],
                 preferred_element_type=jnp.float32) + bkv_ref[...]     # (R, 2C)
    qc = jnp.dot(x_n.astype(bf16), wq_ref[...],
                 preferred_element_type=jnp.float32) + bq_ref[...]      # (R, C)
    ca = attention(qc, kv[:, :C], kv[:, C:], wcl_ref[...], masked=False)
    x = x + ca + bcl_ref[...]          # residual

    # -------------------------------- feed-forward -----------------------------
    h_n = layernorm(x, g3_ref, b3_ref)
    f = jnp.dot(h_n.astype(bf16), wf1_ref[...],
                preferred_element_type=jnp.float32) + bf1_ref[...]      # (R, 4C)
    f = jnp.maximum(f, 0.0)                                             # ReLU
    ff = jnp.dot(f.astype(bf16), wf2_ref[...],
                 preferred_element_type=jnp.float32) + bf2_ref[...]     # (R, C)
    x = x + ff                          # residual

    out_ref[...] = x.astype(out_ref.dtype)


# ----------------------------------------------------------------------------
# Host-side parameter preparation (one-time, free at runtime).
# ----------------------------------------------------------------------------
def _head_group_perm(C, n_heads, n_split):
    """Row permutation: PyTorch per-head-interleaved fused projection
    -> [group0 | group1 | ...] with head-major layout inside each group."""
    hs = C // n_heads
    idx = []
    for s in range(n_split):
        for h in range(n_heads):
            base = h * n_split * hs + s * hs
            idx.extend(range(base, base + hs))
    return jnp.asarray(idx, dtype=jnp.int32)


def prep_layer_params(params, n_heads, weight_dtype=jnp.bfloat16):
    C = params["g1"].shape[-1]
    hs = C // n_heads
    scale = jnp.float32(1.0 / (hs ** 0.5))

    p3 = _head_group_perm(C, n_heads, 3)
    p2 = _head_group_perm(C, n_heads, 2)

    wqkv = params["wqkv"][p3, :]               # (3C, C) rows -> [Q | K | V]
    bqkv = params["bqkv"][:, p3]
    wqkv = wqkv.at[:C, :].multiply(scale)      # fold 1/sqrt(hs) into Q
    bqkv = bqkv.at[:, :C].multiply(scale)

    wkv = params["wkv"][p2, :]                 # (2C, C) rows -> [K | V]
    bkv = params["bkv"][:, p2]
    wq = params["wq"] * scale                  # fold 1/sqrt(hs) into cross-Q
    bq = params["bq"] * scale

    def wt(w):   # PyTorch (out, in) -> (in, out), MXU-friendly low precision
        return jnp.asarray(w).T.astype(weight_dtype)

    def f32(a):
        return jnp.asarray(a).astype(jnp.float32)

    return {
        "g1": f32(params["g1"]), "b1": f32(params["b1"]),
        "wqkv": wt(wqkv), "bqkv": f32(bqkv),
        "wsl": wt(params["wsl"]), "bsl": f32(params["bsl"]),
        "g2": f32(params["g2"]), "b2": f32(params["b2"]),
        "wkv": wt(wkv), "bkv": f32(bkv),
        "wq": wt(wq), "bq": f32(bq),
        "wcl": wt(params["wcl"]), "bcl": f32(params["bcl"]),
        "g3": f32(params["g3"]), "b3": f32(params["b3"]),
        "wf1": wt(params["wf1"]), "bf1": f32(params["bf1"]),
        "wf2": wt(params["wf2"]), "bf2": f32(params["bf2"]),
    }


# ----------------------------------------------------------------------------
# Wrapper: one pallas_call per decoder layer, grid over blocks of sequences.
# ----------------------------------------------------------------------------
def _pick_batch_block(B, T, target_rows=256):
    bb = max(1, min(B, target_rows // max(T, 1)))
    while bb > 1 and B % bb != 0:
        bb -= 1
    if (bb * T) % 8 != 0 and bb != B:
        bb = B                       # full-array block is always layout-legal
    return bb


def _vmem_limit_bytes(weights, rows, C):
    wbytes = sum(int(w.size) * w.dtype.itemsize for w in weights)
    abytes = 3 * rows * C * 4        # x, enc, out blocks (f32)
    est = 4 * (wbytes + abytes) + (4 << 20)
    return int(min(100 << 20, max(32 << 20, est)))


def decoder_layer_pallas(enc_flat, x_flat, prepped, n_heads, T, bb):
    R, C = x_flat.shape
    rows = bb * T
    weights = [prepped[name] for name in PARAM_ORDER]

    act_spec = pl.BlockSpec((rows, C), lambda i: (i, 0))
    in_specs = [act_spec, act_spec]
    in_specs += [pl.BlockSpec(w.shape, lambda i: (0, 0)) for w in weights]

    return pl.pallas_call(
        functools.partial(decoder_layer_kernel, n_heads, bb, T),
        out_shape=jax.ShapeDtypeStruct((R, C), jnp.float32),
        grid=(R // rows,),
        in_specs=in_specs,
        out_specs=act_spec,
        compiler_params=pltpu.CompilerParams(
            dimension_semantics=("parallel",),
            vmem_limit_bytes=_vmem_limit_bytes(weights, rows, C)),
    )(x_flat, enc_flat, *weights)


def decoder_block_forward(enc_output, x, layer_params_list, n_heads,
                          batch_block=None):
    B, T, C = x.shape
    assert C % n_heads == 0
    bb = batch_block if batch_block is not None else _pick_batch_block(B, T)
    enc_flat = enc_output.reshape(B * T, C).astype(jnp.float32)
    x_flat = x.reshape(B * T, C).astype(jnp.float32)
    prepped_layers = [prep_layer_params(p, n_heads) for p in layer_params_list]
    for prepped in prepped_layers:
        x_flat = decoder_layer_pallas(enc_flat, x_flat, prepped, n_heads, T, bb)
    return x_flat.reshape(B, T, C)


# ----------------------------------------------------------------------------
# Deterministic parameter init (PyTorch-style uniform(-1/sqrt(fan_in), ...)),
# in the ORIGINAL PyTorch layout: W (out, in), b (1, out).
# ----------------------------------------------------------------------------
def _linear(key, out_dim, in_dim):
    kw, kb = jax.random.split(key)
    bound = 1.0 / (in_dim ** 0.5)
    w = jax.random.uniform(kw, (out_dim, in_dim), jnp.float32, -bound, bound)
    b = jax.random.uniform(kb, (1, out_dim), jnp.float32, -bound, bound)
    return w, b


def init_layer_params(key, C):
    ks = jax.random.split(key, 6)
    wqkv, bqkv = _linear(ks[0], 3 * C, C)
    wsl, bsl = _linear(ks[1], C, C)
    wkv, bkv = _linear(ks[2], 2 * C, C)
    wq, bq = _linear(ks[3], C, C)
    wcl, bcl = _linear(ks[4], C, C)
    kf1, kf2 = jax.random.split(ks[5])
    wf1, bf1 = _linear(kf1, 4 * C, C)
    wf2, bf2 = _linear(kf2, C, 4 * C)
    ones = jnp.ones((1, C), jnp.float32)
    zeros = jnp.zeros((1, C), jnp.float32)
    return {
        "g1": ones, "b1": zeros, "wqkv": wqkv, "bqkv": bqkv,
        "wsl": wsl, "bsl": bsl,
        "g2": ones, "b2": zeros, "wkv": wkv, "bkv": bkv,
        "wq": wq, "bq": bq, "wcl": wcl, "bcl": bcl,
        "g3": ones, "b3": zeros, "wf1": wf1, "bf1": bf1,
        "wf2": wf2, "bf2": bf2,
    }


# ----------------------------------------------------------------------------
# Pure-JAX f32 reference mirroring the PyTorch module (for a loose sanity check).
# ----------------------------------------------------------------------------
def _reference_decoder_block(enc, x, layer_params_list, n_heads):
    def layernorm(h, g, b):
        mu = jnp.mean(h, axis=-1, keepdims=True)
        var = jnp.mean((h - mu) ** 2, axis=-1, keepdims=True)
        return (h - mu) * lax.rsqrt(var + 1e-5) * g + b

    H = n_heads

    def mha_self(x_n, p):
        B, T, C = x_n.shape
        hs = C // H
        qkv = x_n @ p["wqkv"].T + p["bqkv"]
        qkv = qkv.reshape(B, T, H, 3 * hs).transpose(0, 2, 1, 3)
        q, k, v = jnp.split(qkv, 3, axis=-1)
        y = q @ jnp.swapaxes(k, -1, -2) / (hs ** 0.5)
        mask = jnp.tril(jnp.ones((T, T), dtype=bool))
        y = jnp.where(mask, y, -1e9)
        y = jax.nn.softmax(y, axis=-1)
        vals = (y @ v).transpose(0, 2, 1, 3).reshape(B, T, C)
        return vals @ p["wsl"].T + p["bsl"]

    def mha_cross(enc_n, x_n, p):
        B, T, C = x_n.shape
        hs = C // H
        kv = enc_n @ p["wkv"].T + p["bkv"]
        q = x_n @ p["wq"].T + p["bq"]
        kv = kv.reshape(B, T, H, 2 * hs).transpose(0, 2, 1, 3)
        k, v = jnp.split(kv, 2, axis=-1)
        q = q.reshape(B, T, H, hs).transpose(0, 2, 1, 3)
        y = q @ jnp.swapaxes(k, -1, -2) / (hs ** 0.5)
        y = jax.nn.softmax(y, axis=-1)
        vals = (y @ v).transpose(0, 2, 1, 3).reshape(B, T, C)
        return vals @ p["wcl"].T + p["bcl"]

    for p in layer_params_list:
        x = x + mha_self(layernorm(x, p["g1"], p["b1"]), p)
        x = x + mha_cross(layernorm(enc, p["g2"], p["b2"]),
                          layernorm(x, p["g2"], p["b2"]), p)
        h = layernorm(x, p["g3"], p["b3"])
        h = jnp.maximum(h @ p["wf1"].T + p["bf1"], 0.0)
        x = x + (h @ p["wf2"].T + p["bf2"])
    return x


if __name__ == "__main__":
    # Small, module-consistent shapes.
    B, T, C = 2, 8, 32
    n_heads = 4
    n_layers = 2
    # dropout = 0.0 (inference-mode identity)
    # TODO(synk): training-mode dropout RNG not implemented.

    key = jax.random.PRNGKey(0)
    k_enc, k_x, k_par = jax.random.split(key, 3)
    enc_output = jax.random.normal(k_enc, (B, T, C), jnp.float32)
    x = jax.random.normal(k_x, (B, T, C), jnp.float32)

    layer_keys = jax.random.split(k_par, n_layers)
    layer_params = [init_layer_params(layer_keys[i], C) for i in range(n_layers)]

    out = decoder_block_forward(enc_output, x, layer_params, n_heads)
    out = jax.block_until_ready(out)
    assert out.shape == (B, T, C)
    assert bool(jnp.all(jnp.isfinite(out)))

    # Loose check vs pure-f32 reference (kernel matmuls run with bf16 inputs).
    ref = _reference_decoder_block(enc_output, x, layer_params, n_heads)
    max_err = float(jnp.max(jnp.abs(out - ref)))
    assert max_err < 5e-2, f"kernel/reference mismatch: max_err={max_err}"

    print("KERNEL_OK")
</pallas_src>

<mosaic_0001>
module attributes {stable_mosaic.version = 11 : i64} {
  func.func @decoder_layer_kernel(%arg0: i32, %arg1: memref<16x32xf32, #tpu.memory_space<vmem>>, %arg2: memref<16x32xf32, #tpu.memory_space<vmem>>, %arg3: memref<1x32xf32, #tpu.memory_space<vmem>>, %arg4: memref<1x32xf32, #tpu.memory_space<vmem>>, %arg5: memref<32x96xbf16, #tpu.memory_space<vmem>>, %arg6: memref<1x96xf32, #tpu.memory_space<vmem>>, %arg7: memref<32x32xbf16, #tpu.memory_space<vmem>>, %arg8: memref<1x32xf32, #tpu.memory_space<vmem>>, %arg9: memref<1x32xf32, #tpu.memory_space<vmem>>, %arg10: memref<1x32xf32, #tpu.memory_space<vmem>>, %arg11: memref<32x64xbf16, #tpu.memory_space<vmem>>, %arg12: memref<1x64xf32, #tpu.memory_space<vmem>>, %arg13: memref<32x32xbf16, #tpu.memory_space<vmem>>, %arg14: memref<1x32xf32, #tpu.memory_space<vmem>>, %arg15: memref<32x32xbf16, #tpu.memory_space<vmem>>, %arg16: memref<1x32xf32, #tpu.memory_space<vmem>>, %arg17: memref<1x32xf32, #tpu.memory_space<vmem>>, %arg18: memref<1x32xf32, #tpu.memory_space<vmem>>, %arg19: memref<32x128xbf16, #tpu.memory_space<vmem>>, %arg20: memref<1x128xf32, #tpu.memory_space<vmem>>, %arg21: memref<128x32xbf16, #tpu.memory_space<vmem>>, %arg22: memref<1x32xf32, #tpu.memory_space<vmem>>, %arg23: memref<16x32xf32, #tpu.memory_space<vmem>>) attributes {dimension_semantics = [#tpu.dimension_semantics<parallel>], iteration_bounds = array<i64: 1>, scalar_prefetch = 0 : i64, scratch_operands = 0 : i64, tpu.core_type = #tpu.core_type<tc>, window_params = [{transform_indices = @transform_0, window_bounds = array<i64: 16, 32>}, {transform_indices = @transform_1, window_bounds = array<i64: 16, 32>}, {pipeline_mode = #tpu.pipeline_mode<synchronous>, transform_indices = @transform_2, window_bounds = array<i64: 1, 32>}, {pipeline_mode = #tpu.pipeline_mode<synchronous>, transform_indices = @transform_3, window_bounds = array<i64: 1, 32>}, {pipeline_mode = #tpu.pipeline_mode<synchronous>, transform_indices = @transform_4, window_bounds = array<i64: 32, 96>}, {pipeline_mode = #tpu.pipeline_mode<synchronous>, transform_indices = @transform_5, window_bounds = array<i64: 1, 96>}, {pipeline_mode = #tpu.pipeline_mode<synchronous>, transform_indices = @transform_6, window_bounds = array<i64: 32, 32>}, {pipeline_mode = #tpu.pipeline_mode<synchronous>, transform_indices = @transform_7, window_bounds = array<i64: 1, 32>}, {pipeline_mode = #tpu.pipeline_mode<synchronous>, transform_indices = @transform_8, window_bounds = array<i64: 1, 32>}, {pipeline_mode = #tpu.pipeline_mode<synchronous>, transform_indices = @transform_9, window_bounds = array<i64: 1, 32>}, {pipeline_mode = #tpu.pipeline_mode<synchronous>, transform_indices = @transform_10, window_bounds = array<i64: 32, 64>}, {pipeline_mode = #tpu.pipeline_mode<synchronous>, transform_indices = @transform_11, window_bounds = array<i64: 1, 64>}, {pipeline_mode = #tpu.pipeline_mode<synchronous>, transform_indices = @transform_12, window_bounds = array<i64: 32, 32>}, {pipeline_mode = #tpu.pipeline_mode<synchronous>, transform_indices = @transform_13, window_bounds = array<i64: 1, 32>}, {pipeline_mode = #tpu.pipeline_mode<synchronous>, transform_indices = @transform_14, window_bounds = array<i64: 32, 32>}, {pipeline_mode = #tpu.pipeline_mode<synchronous>, transform_indices = @transform_15, window_bounds = array<i64: 1, 32>}, {pipeline_mode = #tpu.pipeline_mode<synchronous>, transform_indices = @transform_16, window_bounds = array<i64: 1, 32>}, {pipeline_mode = #tpu.pipeline_mode<synchronous>, transform_indices = @transform_17, window_bounds = array<i64: 1, 32>}, {pipeline_mode = #tpu.pipeline_mode<synchronous>, transform_indices = @transform_18, window_bounds = array<i64: 32, 128>}, {pipeline_mode = #tpu.pipeline_mode<synchronous>, transform_indices = @transform_19, window_bounds = array<i64: 1, 128>}, {pipeline_mode = #tpu.pipeline_mode<synchronous>, transform_indices = @transform_20, window_bounds = array<i64: 128, 32>}, {pipeline_mode = #tpu.pipeline_mode<synchronous>, transform_indices = @transform_21, window_bounds = array<i64: 1, 32>}, {transform_indices = @transform_22, window_bounds = array<i64: 16, 32>}]} {
    %c0 = arith.constant 0 : index
    %c0_0 = arith.constant 0 : index
    %0 = vector.load %arg1[%c0, %c0_0] : memref<16x32xf32, #tpu.memory_space<vmem>>, vector<16x32xf32>
    %c0_1 = arith.constant 0 : index
    %c0_2 = arith.constant 0 : index
    %1 = vector.load %arg2[%c0_1, %c0_2] : memref<16x32xf32, #tpu.memory_space<vmem>>, vector<16x32xf32>
    %2 = tpu.iota {dimensions = array<i32: 0>} : vector<8x8xi32>
    %3 = tpu.iota {dimensions = array<i32: 1>} : vector<8x8xi32>
    %4 = arith.cmpi sge, %2, %3 : vector<8x8xi32>
    %cst = arith.constant dense<0.000000e+00> : vector<16xf32>
    %5 = vector.multi_reduction <add>, %0, %cst [1] : vector<16x32xf32> to vector<16xf32>
    %6 = vector.shape_cast %5 : vector<16xf32> to vector<16x1xf32>
    %cst_3 = arith.constant 3.200000e+01 : f32
    %7 = vector.broadcast %cst_3 : f32 to vector<16x1xf32>
    %8 = arith.divf %6, %7 : vector<16x1xf32>
    %9 = vector.broadcast %8 : vector<16x1xf32> to vector<16x32xf32>
    %10 = arith.subf %0, %9 : vector<16x32xf32>
    %11 = arith.mulf %10, %10 : vector<16x32xf32>
    %cst_4 = arith.constant dense<0.000000e+00> : vector<16xf32>
    %12 = vector.multi_reduction <add>, %11, %cst_4 [1] : vector<16x32xf32> to vector<16xf32>
    %13 = vector.shape_cast %12 : vector<16xf32> to vector<16x1xf32>
    %cst_5 = arith.constant 3.200000e+01 : f32
    %14 = vector.broadcast %cst_5 : f32 to vector<16x1xf32>
    %15 = arith.divf %13, %14 : vector<16x1xf32>
    %16 = vector.broadcast %8 : vector<16x1xf32> to vector<16x32xf32>
    %17 = arith.subf %0, %16 : vector<16x32xf32>
    %cst_6 = arith.constant 9.99999974E-6 : f32
    %18 = vector.broadcast %cst_6 : f32 to vector<16x1xf32>
    %19 = arith.addf %15, %18 : vector<16x1xf32>
    %20 = math.rsqrt %19 : vector<16x1xf32>
    %21 = vector.broadcast %20 : vector<16x1xf32> to vector<16x32xf32>
    %22 = arith.mulf %17, %21 : vector<16x32xf32>
    %c0_7 = arith.constant 0 : index
    %c0_8 = arith.constant 0 : index
    %23 = vector.load %arg3[%c0_7, %c0_8] : memref<1x32xf32, #tpu.memory_space<vmem>>, vector<1x32xf32>
    %24 = vector.broadcast %23 : vector<1x32xf32> to vector<16x32xf32>
    %25 = arith.mulf %22, %24 : vector<16x32xf32>
    %c0_9 = arith.constant 0 : index
    %c0_10 = arith.constant 0 : index
    %26 = vector.load %arg4[%c0_9, %c0_10] : memref<1x32xf32, #tpu.memory_space<vmem>>, vector<1x32xf32>
    %27 = vector.broadcast %26 : vector<1x32xf32> to vector<16x32xf32>
    %28 = arith.addf %25, %27 : vector<16x32xf32>
    %29 = arith.truncf %28 : vector<16x32xf32> to vector<16x32xbf16>
    %c0_11 = arith.constant 0 : index
    %c0_12 = arith.constant 0 : index
    %30 = vector.load %arg5[%c0_11, %c0_12] : memref<32x96xbf16, #tpu.memory_space<vmem>>, vector<32x96xbf16>
    %cst_13 = arith.constant dense<0.000000e+00> : vector<16x96xf32>
    %31 = tpu.matmul %29, %30, %cst_13 {dimension_numbers = #tpu.dot_dimension_numbers<[1], [0], [0], [1], [0, 0, 1, 1], [], []>} : vector<16x32xbf16>, vector<32x96xbf16>, vector<16x96xf32> -> vector<16x96xf32>
    %c0_14 = arith.constant 0 : index
    %c0_15 = arith.constant 0 : index
    %32 = vector.load %arg6[%c0_14, %c0_15] : memref<1x96xf32, #tpu.memory_space<vmem>>, vector<1x96xf32>
    %33 = vector.broadcast %32 : vector<1x96xf32> to vector<16x96xf32>
    %34 = arith.addf %31, %33 : vector<16x96xf32>
    %35 = vector.extract_strided_slice %34 {offsets = [0, 0], sizes = [16, 32], strides = [1, 1]} : vector<16x96xf32> to vector<16x32xf32>
    %36 = vector.extract_strided_slice %34 {offsets = [0, 32], sizes = [16, 32], strides = [1, 1]} : vector<16x96xf32> to vector<16x32xf32>
    %37 = vector.extract_strided_slice %34 {offsets = [0, 64], sizes = [16, 32], strides = [1, 1]} : vector<16x96xf32> to vector<16x32xf32>
    %c0_16 = arith.constant 0 : index
    %c0_17 = arith.constant 0 : index
    %38 = vector.load %arg7[%c0_16, %c0_17] : memref<32x32xbf16, #tpu.memory_space<vmem>>, vector<32x32xbf16>
    %cst_18 = arith.constant 0.000000e+00 : f32
    %39 = vector.broadcast %cst_18 : f32 to vector<8x32xf32>
    %40 = vector.extract_strided_slice %35 {offsets = [0, 0], sizes = [8, 8], strides = [1, 1]} : vector<16x32xf32> to vector<8x8xf32>
    %41 = arith.truncf %40 : vector<8x8xf32> to vector<8x8xbf16>
    %42 = vector.extract_strided_slice %36 {offsets = [0, 0], sizes = [8, 8], strides = [1, 1]} : vector<16x32xf32> to vector<8x8xf32>
    %43 = arith.truncf %42 : vector<8x8xf32> to vector<8x8xbf16>
    %44 = vector.extract_strided_slice %37 {offsets = [0, 0], sizes = [8, 8], strides = [1, 1]} : vector<16x32xf32> to vector<8x8xf32>
    %45 = arith.truncf %44 : vector<8x8xf32> to vector<8x8xbf16>
    %46 = tpu.transpose %43, [1, 0] : vector<8x8xbf16> -> vector<8x8xbf16>
    %cst_19 = arith.constant dense<0.000000e+00> : vector<8x8xf32>
    %47 = tpu.matmul %41, %46, %cst_19 {dimension_numbers = #tpu.dot_dimension_numbers<[1], [0], [0], [1], [0, 0, 1, 1], [], []>} : vector<8x8xbf16>, vector<8x8xbf16>, vector<8x8xf32> -> vector<8x8xf32>
    %cst_20 = arith.constant -1.000000e+09 : f32
    %48 = vector.broadcast %cst_20 : f32 to vector<8x8xf32>
    %49 = arith.select %4, %47, %48 : vector<8x8xi1>, vector<8x8xf32>
    %cst_21 = arith.constant dense<0xFF800000> : vector<8xf32>
    %50 = vector.multi_reduction <maximumf>, %49, %cst_21 [1] : vector<8x8xf32> to vector<8xf32>
    %51 = vector.shape_cast %50 : vector<8xf32> to vector<8x1xf32>
    %52 = vector.broadcast %51 : vector<8x1xf32> to vector<8x8xf32>
    %53 = arith.subf %49, %52 : vector<8x8xf32>
    %54 = math.exp %53 : vector<8x8xf32>
    %cst_22 = arith.constant dense<0.000000e+00> : vector<8xf32>
    %55 = vector.multi_reduction <add>, %54, %cst_22 [1] : vector<8x8xf32> to vector<8xf32>
    %56 = vector.shape_cast %55 : vector<8xf32> to vector<8x1xf32>
    %57 = tpu.reciprocal %56 {approx = true} : vector<8x1xf32> -> vector<8x1xf32>
    %58 = vector.broadcast %57 : vector<8x1xf32> to vector<8x8xf32>
    %59 = arith.mulf %54, %58 : vector<8x8xf32>
    %60 = arith.truncf %59 : vector<8x8xf32> to vector<8x8xbf16>
    %cst_23 = arith.constant dense<0.000000e+00> : vector<8x8xf32>
    %61 = tpu.matmul %60, %45, %cst_23 {dimension_numbers = #tpu.dot_dimension_numbers<[1], [0], [0], [1], [0, 0, 1, 1], [], []>} : vector<8x8xbf16>, vector<8x8xbf16>, vector<8x8xf32> -> vector<8x8xf32>
    %62 = arith.truncf %61 : vector<8x8xf32> to vector<8x8xbf16>
    %63 = vector.extract_strided_slice %38 {offsets = [0, 0], sizes = [8, 32], strides = [1, 1]} : vector<32x32xbf16> to vector<8x32xbf16>
    %cst_24 = arith.constant dense<0.000000e+00> : vector<8x32xf32>
    %64 = tpu.matmul %62, %63, %cst_24 {dimension_numbers = #tpu.dot_dimension_numbers<[1], [0], [0], [1], [0, 0, 1, 1], [], []>} : vector<8x8xbf16>, vector<8x32xbf16>, vector<8x32xf32> -> vector<8x32xf32>
    %65 = arith.addf %39, %64 : vector<8x32xf32>
    %66 = vector.extract_strided_slice %35 {offsets = [0, 8], sizes = [8, 8], strides = [1, 1]} : vector<16x32xf32> to vector<8x8xf32>
    %67 = arith.truncf %66 : vector<8x8xf32> to vector<8x8xbf16>
    %68 = vector.extract_strided_slice %36 {offsets = [0, 8], sizes = [8, 8], strides = [1, 1]} : vector<16x32xf32> to vector<8x8xf32>
    %69 = arith.truncf %68 : vector<8x8xf32> to vector<8x8xbf16>
    %70 = vector.extract_strided_slice %37 {offsets = [0, 8], sizes = [8, 8], strides = [1, 1]} : vector<16x32xf32> to vector<8x8xf32>
    %71 = arith.truncf %70 : vector<8x8xf32> to vector<8x8xbf16>
    %72 = tpu.transpose %69, [1, 0] : vector<8x8xbf16> -> vector<8x8xbf16>
    %cst_25 = arith.constant dense<0.000000e+00> : vector<8x8xf32>
    %73 = tpu.matmul %67, %72, %cst_25 {dimension_numbers = #tpu.dot_dimension_numbers<[1], [0], [0], [1], [0, 0, 1, 1], [], []>} : vector<8x8xbf16>, vector<8x8xbf16>, vector<8x8xf32> -> vector<8x8xf32>
    %cst_26 = arith.constant -1.000000e+09 : f32
    %74 = vector.broadcast %cst_26 : f32 to vector<8x8xf32>
    %75 = arith.select %4, %73, %74 : vector<8x8xi1>, vector<8x8xf32>
    %cst_27 = arith.constant dense<0xFF800000> : vector<8xf32>
    %76 = vector.multi_reduction <maximumf>, %75, %cst_27 [1] : vector<8x8xf32> to vector<8xf32>
    %77 = vector.shape_cast %76 : vector<8xf32> to vector<8x1xf32>
    %78 = vector.broadcast %77 : vector<8x1xf32> to vector<8x8xf32>
    %79 = arith.subf %75, %78 : vector<8x8xf32>
    %80 = math.exp %79 : vector<8x8xf32>
    %cst_28 = arith.constant dense<0.000000e+00> : vector<8xf32>
    %81 = vector.multi_reduction <add>, %80, %cst_28 [1] : vector<8x8xf32> to vector<8xf32>
    %82 = vector.shape_cast %81 : vector<8xf32> to vector<8x1xf32>
    %83 = tpu.reciprocal %82 {approx = true} : vector<8x1xf32> -> vector<8x1xf32>
    %84 = vector.broadcast %83 : vector<8x1xf32> to vector<8x8xf32>
    %85 = arith.mulf %80, %84 : vector<8x8xf32>
    %86 = arith.truncf %85 : vector<8x8xf32> to vector<8x8xbf16>
    %cst_29 = arith.constant dense<0.000000e+00> : vector<8x8xf32>
    %87 = tpu.matmul %86, %71, %cst_29 {dimension_numbers = #tpu.dot_dimension_numbers<[1], [0], [0], [1], [0, 0, 1, 1], [], []>} : vector<8x8xbf16>, vector<8x8xbf16>, vector<8x8xf32> -> vector<8x8xf32>
    %88 = arith.truncf %87 : vector<8x8xf32> to vector<8x8xbf16>
    %89 = vector.extract_strided_slice %38 {offsets = [8, 0], sizes = [8, 32], strides = [1, 1]} : vector<32x32xbf16> to vector<8x32xbf16>
    %cst_30 = arith.constant dense<0.000000e+00> : vector<8x32xf32>
    %90 = tpu.matmul %88, %89, %cst_30 {dimension_numbers = #tpu.dot_dimension_numbers<[1], [0], [0], [1], [0, 0, 1, 1], [], []>} : vector<8x8xbf16>, vector<8x32xbf16>, vector<8x32xf32> -> vector<8x32xf32>
    %91 = arith.addf %65, %90 : vector<8x32xf32>
    %92 = vector.extract_strided_slice %35 {offsets = [0, 16], sizes = [8, 8], strides = [1, 1]} : vector<16x32xf32> to vector<8x8xf32>
    %93 = arith.truncf %92 : vector<8x8xf32> to vector<8x8xbf16>
    %94 = vector.extract_strided_slice %36 {offsets = [0, 16], sizes = [8, 8], strides = [1, 1]} : vector<16x32xf32> to vector<8x8xf32>
    %95 = arith.truncf %94 : vector<8x8xf32> to vector<8x8xbf16>
    %96 = vector.extract_strided_slice %37 {offsets = [0, 16], sizes = [8, 8], strides = [1, 1]} : vector<16x32xf32> to vector<8x8xf32>
    %97 = arith.truncf %96 : vector<8x8xf32> to vector<8x8xbf16>
    %98 = tpu.transpose %95, [1, 0] : vector<8x8xbf16> -> vector<8x8xbf16>
    %cst_31 = arith.constant dense<0.000000e+00> : vector<8x8xf32>
    %99 = tpu.matmul %93, %98, %cst_31 {dimension_numbers = #tpu.dot_dimension_numbers<[1], [0], [0], [1], [0, 0, 1, 1], [], []>} : vector<8x8xbf16>, vector<8x8xbf16>, vector<8x8xf32> -> vector<8x8xf32>
    %cst_32 = arith.constant -1.000000e+09 : f32
    %100 = vector.broadcast %cst_32 : f32 to vector<8x8xf32>
    %101 = arith.select %4, %99, %100 : vector<8x8xi1>, vector<8x8xf32>
    %cst_33 = arith.constant dense<0xFF800000> : vector<8xf32>
    %102 = vector.multi_reduction <maximumf>, %101, %cst_33 [1] : vector<8x8xf32> to vector<8xf32>
    %103 = vector.shape_cast %102 : vector<8xf32> to vector<8x1xf32>
    %104 = vector.broadcast %103 : vector<8x1xf32> to vector<8x8xf32>
    %105 = arith.subf %101, %104 : vector<8x8xf32>
    %106 = math.exp %105 : vector<8x8xf32>
    %cst_34 = arith.constant dense<0.000000e+00> : vector<8xf32>
    %107 = vector.multi_reduction <add>, %106, %cst_34 [1] : vector<8x8xf32> to vector<8xf32>
    %108 = vector.shape_cast %107 : vector<8xf32> to vector<8x1xf32>
    %109 = tpu.reciprocal %108 {approx = true} : vector<8x1xf32> -> vector<8x1xf32>
    %110 = vector.broadcast %109 : vector<8x1xf32> to vector<8x8xf32>
    %111 = arith.mulf %106, %110 : vector<8x8xf32>
    %112 = arith.truncf %111 : vector<8x8xf32> to vector<8x8xbf16>
    %cst_35 = arith.constant dense<0.000000e+00> : vector<8x8xf32>
    %113 = tpu.matmul %112, %97, %cst_35 {dimension_numbers = #tpu.dot_dimension_numbers<[1], [0], [0], [1], [0, 0, 1, 1], [], []>} : vector<8x8xbf16>, vector<8x8xbf16>, vector<8x8xf32> -> vector<8x8xf32>
    %114 = arith.truncf %113 : vector<8x8xf32> to vector<8x8xbf16>
    %115 = vector.extract_strided_slice %38 {offsets = [16, 0], sizes = [8, 32], strides = [1, 1]} : vector<32x32xbf16> to vector<8x32xbf16>
    %cst_36 = arith.constant dense<0.000000e+00> : vector<8x32xf32>
    %116 = tpu.matmul %114, %115, %cst_36 {dimension_numbers = #tpu.dot_dimension_numbers<[1], [0], [0], [1], [0, 0, 1, 1], [], []>} : vector<8x8xbf16>, vector<8x32xbf16>, vector<8x32xf32> -> vector<8x32xf32>
    %117 = arith.addf %91, %116 : vector<8x32xf32>
    %118 = vector.extract_strided_slice %35 {offsets = [0, 24], sizes = [8, 8], strides = [1, 1]} : vector<16x32xf32> to vector<8x8xf32>
    %119 = arith.truncf %118 : vector<8x8xf32> to vector<8x8xbf16>
    %120 = vector.extract_strided_slice %36 {offsets = [0, 24], sizes = [8, 8], strides = [1, 1]} : vector<16x32xf32> to vector<8x8xf32>
    %121 = arith.truncf %120 : vector<8x8xf32> to vector<8x8xbf16>
    %122 = vector.extract_strided_slice %37 {offsets = [0, 24], sizes = [8, 8], strides = [1, 1]} : vector<16x32xf32> to vector<8x8xf32>
    %123 = arith.truncf %122 : vector<8x8xf32> to vector<8x8xbf16>
    %124 = tpu.transpose %121, [1, 0] : vector<8x8xbf16> -> vector<8x8xbf16>
    %cst_37 = arith.constant dense<0.000000e+00> : vector<8x8xf32>
    %125 = tpu.matmul %119, %124, %cst_37 {dimension_numbers = #tpu.dot_dimension_numbers<[1], [0], [0], [1], [0, 0, 1, 1], [], []>} : vector<8x8xbf16>, vector<8x8xbf16>, vector<8x8xf32> -> vector<8x8xf32>
    %cst_38 = arith.constant -1.000000e+09 : f32
    %126 = vector.broadcast %cst_38 : f32 to vector<8x8xf32>
    %127 = arith.select %4, %125, %126 : vector<8x8xi1>, vector<8x8xf32>
    %cst_39 = arith.constant dense<0xFF800000> : vector<8xf32>
    %128 = vector.multi_reduction <maximumf>, %127, %cst_39 [1] : vector<8x8xf32> to vector<8xf32>
    %129 = vector.shape_cast %128 : vector<8xf32> to vector<8x1xf32>
    %130 = vector.broadcast %129 : vector<8x1xf32> to vector<8x8xf32>
    %131 = arith.subf %127, %130 : vector<8x8xf32>
    %132 = math.exp %131 : vector<8x8xf32>
    %cst_40 = arith.constant dense<0.000000e+00> : vector<8xf32>
    %133 = vector.multi_reduction <add>, %132, %cst_40 [1] : vector<8x8xf32> to vector<8xf32>
    %134 = vector.shape_cast %133 : vector<8xf32> to vector<8x1xf32>
    %135 = tpu.reciprocal %134 {approx = true} : vector<8x1xf32> -> vector<8x1xf32>
    %136 = vector.broadcast %135 : vector<8x1xf32> to vector<8x8xf32>
    %137 = arith.mulf %132, %136 : vector<8x8xf32>
    %138 = arith.truncf %137 : vector<8x8xf32> to vector<8x8xbf16>
    %cst_41 = arith.constant dense<0.000000e+00> : vector<8x8xf32>
    %139 = tpu.matmul %138, %123, %cst_41 {dimension_numbers = #tpu.dot_dimension_numbers<[1], [0], [0], [1], [0, 0, 1, 1], [], []>} : vector<8x8xbf16>, vector<8x8xbf16>, vector<8x8xf32> -> vector<8x8xf32>
    %140 = arith.truncf %139 : vector<8x8xf32> to vector<8x8xbf16>
    %141 = vector.extract_strided_slice %38 {offsets = [24, 0], sizes = [8, 32], strides = [1, 1]} : vector<32x32xbf16> to vector<8x32xbf16>
    %cst_42 = arith.constant dense<0.000000e+00> : vector<8x32xf32>
    %142 = tpu.matmul %140, %141, %cst_42 {dimension_numbers = #tpu.dot_dimension_numbers<[1], [0], [0], [1], [0, 0, 1, 1], [], []>} : vector<8x8xbf16>, vector<8x32xbf16>, vector<8x32xf32> -> vector<8x32xf32>
    %143 = arith.addf %117, %142 : vector<8x32xf32>
    %cst_43 = arith.constant 0.000000e+00 : f32
    %144 = vector.broadcast %cst_43 : f32 to vector<8x32xf32>
    %145 = vector.extract_strided_slice %35 {offsets = [8, 0], sizes = [8, 8], strides = [1, 1]} : vector<16x32xf32> to vector<8x8xf32>
    %146 = arith.truncf %145 : vector<8x8xf32> to vector<8x8xbf16>
    %147 = vector.extract_strided_slice %36 {offsets = [8, 0], sizes = [8, 8], strides = [1, 1]} : vector<16x32xf32> to vector<8x8xf32>
    %148 = arith.truncf %147 : vector<8x8xf32> to vector<8x8xbf16>
    %149 = vector.extract_strided_slice %37 {offsets = [8, 0], sizes = [8, 8], strides = [1, 1]} : vector<16x32xf32> to vector<8x8xf32>
    %150 = arith.truncf %149 : vector<8x8xf32> to vector<8x8xbf16>
    %151 = tpu.transpose %148, [1, 0] : vector<8x8xbf16> -> vector<8x8xbf16>
    %cst_44 = arith.constant dense<0.000000e+00> : vector<8x8xf32>
    %152 = tpu.matmul %146, %151, %cst_44 {dimension_numbers = #tpu.dot_dimension_numbers<[1], [0], [0], [1], [0, 0, 1, 1], [], []>} : vector<8x8xbf16>, vector<8x8xbf16>, vector<8x8xf32> -> vector<8x8xf32>
    %cst_45 = arith.constant -1.000000e+09 : f32
    %153 = vector.broadcast %cst_45 : f32 to vector<8x8xf32>
    %154 = arith.select %4, %152, %153 : vector<8x8xi1>, vector<8x8xf32>
    %cst_46 = arith.constant dense<0xFF800000> : vector<8xf32>
    %155 = vector.multi_reduction <maximumf>, %154, %cst_46 [1] : vector<8x8xf32> to vector<8xf32>
    %156 = vector.shape_cast %155 : vector<8xf32> to vector<8x1xf32>
    %157 = vector.broadcast %156 : vector<8x1xf32> to vector<8x8xf32>
    %158 = arith.subf %154, %157 : vector<8x8xf32>
    %159 = math.exp %158 : vector<8x8xf32>
    %cst_47 = arith.constant dense<0.000000e+00> : vector<8xf32>
    %160 = vector.multi_reduction <add>, %159, %cst_47 [1] : vector<8x8xf32> to vector<8xf32>
    %161 = vector.shape_cast %160 : vector<8xf32> to vector<8x1xf32>
    %162 = tpu.reciprocal %161 {approx = true} : vector<8x1xf32> -> vector<8x1xf32>
    %163 = vector.broadcast %162 : vector<8x1xf32> to vector<8x8xf32>
    %164 = arith.mulf %159, %163 : vector<8x8xf32>
    %165 = arith.truncf %164 : vector<8x8xf32> to vector<8x8xbf16>
    %cst_48 = arith.constant dense<0.000000e+00> : vector<8x8xf32>
    %166 = tpu.matmul %165, %150, %cst_48 {dimension_numbers = #tpu.dot_dimension_numbers<[1], [0], [0], [1], [0, 0, 1, 1], [], []>} : vector<8x8xbf16>, vector<8x8xbf16>, vector<8x8xf32> -> vector<8x8xf32>
    %167 = arith.truncf %166 : vector<8x8xf32> to vector<8x8xbf16>
    %168 = vector.extract_strided_slice %38 {offsets = [0, 0], sizes = [8, 32], strides = [1, 1]} : vector<32x32xbf16> to vector<8x32xbf16>
    %cst_49 = arith.constant dense<0.000000e+00> : vector<8x32xf32>
    %169 = tpu.matmul %167, %168, %cst_49 {dimension_numbers = #tpu.dot_dimension_numbers<[1], [0], [0], [1], [0, 0, 1, 1], [], []>} : vector<8x8xbf16>, vector<8x32xbf16>, vector<8x32xf32> -> vector<8x32xf32>
    %170 = arith.addf %144, %169 : vector<8x32xf32>
    %171 = vector.extract_strided_slice %35 {offsets = [8, 8], sizes = [8, 8], strides = [1, 1]} : vector<16x32xf32> to vector<8x8xf32>
    %172 = arith.truncf %171 : vector<8x8xf32> to vector<8x8xbf16>
    %173 = vector.extract_strided_slice %36 {offsets = [8, 8], sizes = [8, 8], strides = [1, 1]} : vector<16x32xf32> to vector<8x8xf32>
    %174 = arith.truncf %173 : vector<8x8xf32> to vector<8x8xbf16>
    %175 = vector.extract_strided_slice %37 {offsets = [8, 8], sizes = [8, 8], strides = [1, 1]} : vector<16x32xf32> to vector<8x8xf32>
    %176 = arith.truncf %175 : vector<8x8xf32> to vector<8x8xbf16>
    %177 = tpu.transpose %174, [1, 0] : vector<8x8xbf16> -> vector<8x8xbf16>
    %cst_50 = arith.constant dense<0.000000e+00> : vector<8x8xf32>
    %178 = tpu.matmul %172, %177, %cst_50 {dimension_numbers = #tpu.dot_dimension_numbers<[1], [0], [0], [1], [0, 0, 1, 1], [], []>} : vector<8x8xbf16>, vector<8x8xbf16>, vector<8x8xf32> -> vector<8x8xf32>
    %cst_51 = arith.constant -1.000000e+09 : f32
    %179 = vector.broadcast %cst_51 : f32 to vector<8x8xf32>
    %180 = arith.select %4, %178, %179 : vector<8x8xi1>, vector<8x8xf32>
    %cst_52 = arith.constant dense<0xFF800000> : vector<8xf32>
    %181 = vector.multi_reduction <maximumf>, %180, %cst_52 [1] : vector<8x8xf32> to vector<8xf32>
    %182 = vector.shape_cast %181 : vector<8xf32> to vector<8x1xf32>
    %183 = vector.broadcast %182 : vector<8x1xf32> to vector<8x8xf32>
    %184 = arith.subf %180, %183 : vector<8x8xf32>
    %185 = math.exp %184 : vector<8x8xf32>
    %cst_53 = arith.constant dense<0.000000e+00> : vector<8xf32>
    %186 = vector.multi_reduction <add>, %185, %cst_53 [1] : vector<8x8xf32> to vector<8xf32>
    %187 = vector.shape_cast %186 : vector<8xf32> to vector<8x1xf32>
    %188 = tpu.reciprocal %187 {approx = true} : vector<8x1xf32> -> vector<8x1xf32>
    %189 = vector.broadcast %188 : vector<8x1xf32> to vector<8x8xf32>
    %190 = arith.mulf %185, %189 : vector<8x8xf32>
    %191 = arith.truncf %190 : vector<8x8xf32> to vector<8x8xbf16>
    %cst_54 = arith.constant dense<0.000000e+00> : vector<8x8xf32>
    %192 = tpu.matmul %191, %176, %cst_54 {dimension_numbers = #tpu.dot_dimension_numbers<[1], [0], [0], [1], [0, 0, 1, 1], [], []>} : vector<8x8xbf16>, vector<8x8xbf16>, vector<8x8xf32> -> vector<8x8xf32>
    %193 = arith.truncf %192 : vector<8x8xf32> to vector<8x8xbf16>
    %194 = vector.extract_strided_slice %38 {offsets = [8, 0], sizes = [8, 32], strides = [1, 1]} : vector<32x32xbf16> to vector<8x32xbf16>
    %cst_55 = arith.constant dense<0.000000e+00> : vector<8x32xf32>
    %195 = tpu.matmul %193, %194, %cst_55 {dimension_numbers = #tpu.dot_dimension_numbers<[1], [0], [0], [1], [0, 0, 1, 1], [], []>} : vector<8x8xbf16>, vector<8x32xbf16>, vector<8x32xf32> -> vector<8x32xf32>
    %196 = arith.addf %170, %195 : vector<8x32xf32>
    %197 = vector.extract_strided_slice %35 {offsets = [8, 16], sizes = [8, 8], strides = [1, 1]} : vector<16x32xf32> to vector<8x8xf32>
    %198 = arith.truncf %197 : vector<8x8xf32> to vector<8x8xbf16>
    %199 = vector.extract_strided_slice %36 {offsets = [8, 16], sizes = [8, 8], strides = [1, 1]} : vector<16x32xf32> to vector<8x8xf32>
    %200 = arith.truncf %199 : vector<8x8xf32> to vector<8x8xbf16>
    %201 = vector.extract_strided_slice %37 {offsets = [8, 16], sizes = [8, 8], strides = [1, 1]} : vector<16x32xf32> to vector<8x8xf32>
    %202 = arith.truncf %201 : vector<8x8xf32> to vector<8x8xbf16>
    %203 = tpu.transpose %200, [1, 0] : vector<8x8xbf16> -> vector<8x8xbf16>
    %cst_56 = arith.constant dense<0.000000e+00> : vector<8x8xf32>
    %204 = tpu.matmul %198, %203, %cst_56 {dimension_numbers = #tpu.dot_dimension_numbers<[1], [0], [0], [1], [0, 0, 1, 1], [], []>} : vector<8x8xbf16>, vector<8x8xbf16>, vector<8x8xf32> -> vector<8x8xf32>
    %cst_57 = arith.constant -1.000000e+09 : f32
    %205 = vector.broadcast %cst_57 : f32 to vector<8x8xf32>
    %206 = arith.select %4, %204, %205 : vector<8x8xi1>, vector<8x8xf32>
    %cst_58 = arith.constant dense<0xFF800000> : vector<8xf32>
    %207 = vector.multi_reduction <maximumf>, %206, %cst_58 [1] : vector<8x8xf32> to vector<8xf32>
    %208 = vector.shape_cast %207 : vector<8xf32> to vector<8x1xf32>
    %209 = vector.broadcast %208 : vector<8x1xf32> to vector<8x8xf32>
    %210 = arith.subf %206, %209 : vector<8x8xf32>
    %211 = math.exp %210 : vector<8x8xf32>
    %cst_59 = arith.constant dense<0.000000e+00> : vector<8xf32>
    %212 = vector.multi_reduction <add>, %211, %cst_59 [1] : vector<8x8xf32> to vector<8xf32>
    %213 = vector.shape_cast %212 : vector<8xf32> to vector<8x1xf32>
    %214 = tpu.reciprocal %213 {approx = true} : vector<8x1xf32> -> vector<8x1xf32>
    %215 = vector.broadcast %214 : vector<8x1xf32> to vector<8x8xf32>
    %216 = arith.mulf %211, %215 : vector<8x8xf32>
    %217 = arith.truncf %216 : vector<8x8xf32> to vector<8x8xbf16>
    %cst_60 = arith.constant dense<0.000000e+00> : vector<8x8xf32>
    %218 = tpu.matmul %217, %202, %cst_60 {dimension_numbers = #tpu.dot_dimension_numbers<[1], [0], [0], [1], [0, 0, 1, 1], [], []>} : vector<8x8xbf16>, vector<8x8xbf16>, vector<8x8xf32> -> vector<8x8xf32>
    %219 = arith.truncf %218 : vector<8x8xf32> to vector<8x8xbf16>
    %220 = vector.extract_strided_slice %38 {offsets = [16, 0], sizes = [8, 32], strides = [1, 1]} : vector<32x32xbf16> to vector<8x32xbf16>
    %cst_61 = arith.constant dense<0.000000e+00> : vector<8x32xf32>
    %221 = tpu.matmul %219, %220, %cst_61 {dimension_numbers = #tpu.dot_dimension_numbers<[1], [0], [0], [1], [0, 0, 1, 1], [], []>} : vector<8x8xbf16>, vector<8x32xbf16>, vector<8x32xf32> -> vector<8x32xf32>
    %222 = arith.addf %196, %221 : vector<8x32xf32>
    %223 = vector.extract_strided_slice %35 {offsets = [8, 24], sizes = [8, 8], strides = [1, 1]} : vector<16x32xf32> to vector<8x8xf32>
    %224 = arith.truncf %223 : vector<8x8xf32> to vector<8x8xbf16>
    %225 = vector.extract_strided_slice %36 {offsets = [8, 24], sizes = [8, 8], strides = [1, 1]} : vector<16x32xf32> to vector<8x8xf32>
    %226 = arith.truncf %225 : vector<8x8xf32> to vector<8x8xbf16>
    %227 = vector.extract_strided_slice %37 {offsets = [8, 24], sizes = [8, 8], strides = [1, 1]} : vector<16x32xf32> to vector<8x8xf32>
    %228 = arith.truncf %227 : vector<8x8xf32> to vector<8x8xbf16>
    %229 = tpu.transpose %226, [1, 0] : vector<8x8xbf16> -> vector<8x8xbf16>
    %cst_62 = arith.constant dense<0.000000e+00> : vector<8x8xf32>
    %230 = tpu.matmul %224, %229, %cst_62 {dimension_numbers = #tpu.dot_dimension_numbers<[1], [0], [0], [1], [0, 0, 1, 1], [], []>} : vector<8x8xbf16>, vector<8x8xbf16>, vector<8x8xf32> -> vector<8x8xf32>
    %cst_63 = arith.constant -1.000000e+09 : f32
    %231 = vector.broadcast %cst_63 : f32 to vector<8x8xf32>
    %232 = arith.select %4, %230, %231 : vector<8x8xi1>, vector<8x8xf32>
    %cst_64 = arith.constant dense<0xFF800000> : vector<8xf32>
    %233 = vector.multi_reduction <maximumf>, %232, %cst_64 [1] : vector<8x8xf32> to vector<8xf32>
    %234 = vector.shape_cast %233 : vector<8xf32> to vector<8x1xf32>
    %235 = vector.broadcast %234 : vector<8x1xf32> to vector<8x8xf32>
    %236 = arith.subf %232, %235 : vector<8x8xf32>
    %237 = math.exp %236 : vector<8x8xf32>
    %cst_65 = arith.constant dense<0.000000e+00> : vector<8xf32>
    %238 = vector.multi_reduction <add>, %237, %cst_65 [1] : vector<8x8xf32> to vector<8xf32>
    %239 = vector.shape_cast %238 : vector<8xf32> to vector<8x1xf32>
    %240 = tpu.reciprocal %239 {approx = true} : vector<8x1xf32> -> vector<8x1xf32>
    %241 = vector.broadcast %240 : vector<8x1xf32> to vector<8x8xf32>
    %242 = arith.mulf %237, %241 : vector<8x8xf32>
    %243 = arith.truncf %242 : vector<8x8xf32> to vector<8x8xbf16>
    %cst_66 = arith.constant dense<0.000000e+00> : vector<8x8xf32>
    %244 = tpu.matmul %243, %228, %cst_66 {dimension_numbers = #tpu.dot_dimension_numbers<[1], [0], [0], [1], [0, 0, 1, 1], [], []>} : vector<8x8xbf16>, vector<8x8xbf16>, vector<8x8xf32> -> vector<8x8xf32>
    %245 = arith.truncf %244 : vector<8x8xf32> to vector<8x8xbf16>
    %246 = vector.extract_strided_slice %38 {offsets = [24, 0], sizes = [8, 32], strides = [1, 1]} : vector<32x32xbf16> to vector<8x32xbf16>
    %cst_67 = arith.constant dense<0.000000e+00> : vector<8x32xf32>
    %247 = tpu.matmul %245, %246, %cst_67 {dimension_numbers = #tpu.dot_dimension_numbers<[1], [0], [0], [1], [0, 0, 1, 1], [], []>} : vector<8x8xbf16>, vector<8x32xbf16>, vector<8x32xf32> -> vector<8x32xf32>
    %248 = arith.addf %222, %247 : vector<8x32xf32>
    %249 = tpu.concatenate %143, %248 in 0 : vector<8x32xf32>, vector<8x32xf32> -> vector<16x32xf32>
    %250 = arith.addf %0, %249 : vector<16x32xf32>
    %c0_68 = arith.constant 0 : index
    %c0_69 = arith.constant 0 : index
    %251 = vector.load %arg8[%c0_68, %c0_69] : memref<1x32xf32, #tpu.memory_space<vmem>>, vector<1x32xf32>
    %252 = vector.broadcast %251 : vector<1x32xf32> to vector<16x32xf32>
    %253 = arith.addf %250, %252 : vector<16x32xf32>
    %cst_70 = arith.constant dense<0.000000e+00> : vector<16xf32>
    %254 = vector.multi_reduction <add>, %1, %cst_70 [1] : vector<16x32xf32> to vector<16xf32>
    %255 = vector.shape_cast %254 : vector<16xf32> to vector<16x1xf32>
    %cst_71 = arith.constant 3.200000e+01 : f32
    %256 = vector.broadcast %cst_71 : f32 to vector<16x1xf32>
    %257 = arith.divf %255, %256 : vector<16x1xf32>
    %258 = vector.broadcast %257 : vector<16x1xf32> to vector<16x32xf32>
    %259 = arith.subf %1, %258 : vector<16x32xf32>
    %260 = arith.mulf %259, %259 : vector<16x32xf32>
    %cst_72 = arith.constant dense<0.000000e+00> : vector<16xf32>
    %261 = vector.multi_reduction <add>, %260, %cst_72 [1] : vector<16x32xf32> to vector<16xf32>
    %262 = vector.shape_cast %261 : vector<16xf32> to vector<16x1xf32>
    %cst_73 = arith.constant 3.200000e+01 : f32
    %263 = vector.broadcast %cst_73 : f32 to vector<16x1xf32>
    %264 = arith.divf %262, %263 : vector<16x1xf32>
    %265 = vector.broadcast %257 : vector<16x1xf32> to vector<16x32xf32>
    %266 = arith.subf %1, %265 : vector<16x32xf32>
    %cst_74 = arith.constant 9.99999974E-6 : f32
    %267 = vector.broadcast %cst_74 : f32 to vector<16x1xf32>
    %268 = arith.addf %264, %267 : vector<16x1xf32>
    %269 = math.rsqrt %268 : vector<16x1xf32>
    %270 = vector.broadcast %269 : vector<16x1xf32> to vector<16x32xf32>
    %271 = arith.mulf %266, %270 : vector<16x32xf32>
    %c0_75 = arith.constant 0 : index
    %c0_76 = arith.constant 0 : index
    %272 = vector.load %arg9[%c0_75, %c0_76] : memref<1x32xf32, #tpu.memory_space<vmem>>, vector<1x32xf32>
    %273 = vector.broadcast %272 : vector<1x32xf32> to vector<16x32xf32>
    %274 = arith.mulf %271, %273 : vector<16x32xf32>
    %c0_77 = arith.constant 0 : index
    %c0_78 = arith.constant 0 : index
    %275 = vector.load %arg10[%c0_77, %c0_78] : memref<1x32xf32, #tpu.memory_space<vmem>>, vector<1x32xf32>
    %276 = vector.broadcast %275 : vector<1x32xf32> to vector<16x32xf32>
    %277 = arith.addf %274, %276 : vector<16x32xf32>
    %cst_79 = arith.constant dense<0.000000e+00> : vector<16xf32>
    %278 = vector.multi_reduction <add>, %253, %cst_79 [1] : vector<16x32xf32> to vector<16xf32>
    %279 = vector.shape_cast %278 : vector<16xf32> to vector<16x1xf32>
    %cst_80 = arith.constant 3.200000e+01 : f32
    %280 = vector.broadcast %cst_80 : f32 to vector<16x1xf32>
    %281 = arith.divf %279, %280 : vector<16x1xf32>
    %282 = vector.broadcast %281 : vector<16x1xf32> to vector<16x32xf32>
    %283 = arith.subf %253, %282 : vector<16x32xf32>
    %284 = arith.mulf %283, %283 : vector<16x32xf32>
    %cst_81 = arith.constant dense<0.000000e+00> : vector<16xf32>
    %285 = vector.multi_reduction <add>, %284, %cst_81 [1] : vector<16x32xf32> to vector<16xf32>
    %286 = vector.shape_cast %285 : vector<16xf32> to vector<16x1xf32>
    %cst_82 = arith.constant 3.200000e+01 : f32
    %287 = vector.broadcast %cst_82 : f32 to vector<16x1xf32>
    %288 = arith.divf %286, %287 : vector<16x1xf32>
    %289 = vector.broadcast %281 : vector<16x1xf32> to vector<16x32xf32>
    %290 = arith.subf %253, %289 : vector<16x32xf32>
    %cst_83 = arith.constant 9.99999974E-6 : f32
    %291 = vector.broadcast %cst_83 : f32 to vector<16x1xf32>
    %292 = arith.addf %288, %291 : vector<16x1xf32>
    %293 = math.rsqrt %292 : vector<16x1xf32>
    %294 = vector.broadcast %293 : vector<16x1xf32> to vector<16x32xf32>
    %295 = arith.mulf %290, %294 : vector<16x32xf32>
    %c0_84 = arith.constant 0 : index
    %c0_85 = arith.constant 0 : index
    %296 = vector.load %arg9[%c0_84, %c0_85] : memref<1x32xf32, #tpu.memory_space<vmem>>, vector<1x32xf32>
    %297 = vector.broadcast %296 : vector<1x32xf32> to vector<16x32xf32>
    %298 = arith.mulf %295, %297 : vector<16x32xf32>
    %c0_86 = arith.constant 0 : index
    %c0_87 = arith.constant 0 : index
    %299 = vector.load %arg10[%c0_86, %c0_87] : memref<1x32xf32, #tpu.memory_space<vmem>>, vector<1x32xf32>
    %300 = vector.broadcast %299 : vector<1x32xf32> to vector<16x32xf32>
    %301 = arith.addf %298, %300 : vector<16x32xf32>
    %302 = arith.truncf %277 : vector<16x32xf32> to vector<16x32xbf16>
    %c0_88 = arith.constant 0 : index
    %c0_89 = arith.constant 0 : index
    %303 = vector.load %arg11[%c0_88, %c0_89] : memref<32x64xbf16, #tpu.memory_space<vmem>>, vector<32x64xbf16>
    %cst_90 = arith.constant dense<0.000000e+00> : vector<16x64xf32>
    %304 = tpu.matmul %302, %303, %cst_90 {dimension_numbers = #tpu.dot_dimension_numbers<[1], [0], [0], [1], [0, 0, 1, 1], [], []>} : vector<16x32xbf16>, vector<32x64xbf16>, vector<16x64xf32> -> vector<16x64xf32>
    %c0_91 = arith.constant 0 : index
    %c0_92 = arith.constant 0 : index
    %305 = vector.load %arg12[%c0_91, %c0_92] : memref<1x64xf32, #tpu.memory_space<vmem>>, vector<1x64xf32>
    %306 = vector.broadcast %305 : vector<1x64xf32> to vector<16x64xf32>
    %307 = arith.addf %304, %306 : vector<16x64xf32>
    %308 = arith.truncf %301 : vector<16x32xf32> to vector<16x32xbf16>
    %c0_93 = arith.constant 0 : index
    %c0_94 = arith.constant 0 : index
    %309 = vector.load %arg13[%c0_93, %c0_94] : memref<32x32xbf16, #tpu.memory_space<vmem>>, vector<32x32xbf16>
    %cst_95 = arith.constant dense<0.000000e+00> : vector<16x32xf32>
    %310 = tpu.matmul %308, %309, %cst_95 {dimension_numbers = #tpu.dot_dimension_numbers<[1], [0], [0], [1], [0, 0, 1, 1], [], []>} : vector<16x32xbf16>, vector<32x32xbf16>, vector<16x32xf32> -> vector<16x32xf32>
    %c0_96 = arith.constant 0 : index
    %c0_97 = arith.constant 0 : index
    %311 = vector.load %arg14[%c0_96, %c0_97] : memref<1x32xf32, #tpu.memory_space<vmem>>, vector<1x32xf32>
    %312 = vector.broadcast %311 : vector<1x32xf32> to vector<16x32xf32>
    %313 = arith.addf %310, %312 : vector<16x32xf32>
    %314 = vector.extract_strided_slice %307 {offsets = [0, 0], sizes = [16, 32], strides = [1, 1]} : vector<16x64xf32> to vector<16x32xf32>
    %315 = vector.extract_strided_slice %307 {offsets = [0, 32], sizes = [16, 32], strides = [1, 1]} : vector<16x64xf32> to vector<16x32xf32>
    %c0_98 = arith.constant 0 : index
    %c0_99 = arith.constant 0 : index
    %316 = vector.load %arg15[%c0_98, %c0_99] : memref<32x32xbf16, #tpu.memory_space<vmem>>, vector<32x32xbf16>
    %cst_100 = arith.constant 0.000000e+00 : f32
    %317 = vector.broadcast %cst_100 : f32 to vector<8x32xf32>
    %318 = vector.extract_strided_slice %313 {offsets = [0, 0], sizes = [8, 8], strides = [1, 1]} : vector<16x32xf32> to vector<8x8xf32>
    %319 = arith.truncf %318 : vector<8x8xf32> to vector<8x8xbf16>
    %320 = vector.extract_strided_slice %314 {offsets = [0, 0], sizes = [8, 8], strides = [1, 1]} : vector<16x32xf32> to vector<8x8xf32>
    %321 = arith.truncf %320 : vector<8x8xf32> to vector<8x8xbf16>
    %322 = vector.extract_strided_slice %315 {offsets = [0, 0], sizes = [8, 8], strides = [1, 1]} : vector<16x32xf32> to vector<8x8xf32>
    %323 = arith.truncf %322 : vector<8x8xf32> to vector<8x8xbf16>
    %324 = tpu.transpose %321, [1, 0] : vector<8x8xbf16> -> vector<8x8xbf16>
    %cst_101 = arith.constant dense<0.000000e+00> : vector<8x8xf32>
    %325 = tpu.matmul %319, %324, %cst_101 {dimension_numbers = #tpu.dot_dimension_numbers<[1], [0], [0], [1], [0, 0, 1, 1], [], []>} : vector<8x8xbf16>, vector<8x8xbf16>, vector<8x8xf32> -> vector<8x8xf32>
    %cst_102 = arith.constant dense<0xFF800000> : vector<8xf32>
    %326 = vector.multi_reduction <maximumf>, %325, %cst_102 [1] : vector<8x8xf32> to vector<8xf32>
    %327 = vector.shape_cast %326 : vector<8xf32> to vector<8x1xf32>
    %328 = vector.broadcast %327 : vector<8x1xf32> to vector<8x8xf32>
    %329 = arith.subf %325, %328 : vector<8x8xf32>
    %330 = math.exp %329 : vector<8x8xf32>
    %cst_103 = arith.constant dense<0.000000e+00> : vector<8xf32>
    %331 = vector.multi_reduction <add>, %330, %cst_103 [1] : vector<8x8xf32> to vector<8xf32>
    %332 = vector.shape_cast %331 : vector<8xf32> to vector<8x1xf32>
    %333 = tpu.reciprocal %332 {approx = true} : vector<8x1xf32> -> vector<8x1xf32>
    %334 = vector.broadcast %333 : vector<8x1xf32> to vector<8x8xf32>
    %335 = arith.mulf %330, %334 : vector<8x8xf32>
    %336 = arith.truncf %335 : vector<8x8xf32> to vector<8x8xbf16>
    %cst_104 = arith.constant dense<0.000000e+00> : vector<8x8xf32>
    %337 = tpu.matmul %336, %323, %cst_104 {dimension_numbers = #tpu.dot_dimension_numbers<[1], [0], [0], [1], [0, 0, 1, 1], [], []>} : vector<8x8xbf16>, vector<8x8xbf16>, vector<8x8xf32> -> vector<8x8xf32>
    %338 = arith.truncf %337 : vector<8x8xf32> to vector<8x8xbf16>
    %339 = vector.extract_strided_slice %316 {offsets = [0, 0], sizes = [8, 32], strides = [1, 1]} : vector<32x32xbf16> to vector<8x32xbf16>
    %cst_105 = arith.constant dense<0.000000e+00> : vector<8x32xf32>
    %340 = tpu.matmul %338, %339, %cst_105 {dimension_numbers = #tpu.dot_dimension_numbers<[1], [0], [0], [1], [0, 0, 1, 1], [], []>} : vector<8x8xbf16>, vector<8x32xbf16>, vector<8x32xf32> -> vector<8x32xf32>
    %341 = arith.addf %317, %340 : vector<8x32xf32>
    %342 = vector.extract_strided_slice %313 {offsets = [0, 8], sizes = [8, 8], strides = [1, 1]} : vector<16x32xf32> to vector<8x8xf32>
    %343 = arith.truncf %342 : vector<8x8xf32> to vector<8x8xbf16>
    %344 = vector.extract_strided_slice %314 {offsets = [0, 8], sizes = [8, 8], strides = [1, 1]} : vector<16x32xf32> to vector<8x8xf32>
    %345 = arith.truncf %344 : vector<8x8xf32> to vector<8x8xbf16>
    %346 = vector.extract_strided_slice %315 {offsets = [0, 8], sizes = [8, 8], strides = [1, 1]} : vector<16x32xf32> to vector<8x8xf32>
    %347 = arith.truncf %346 : vector<8x8xf32> to vector<8x8xbf16>
    %348 = tpu.transpose %345, [1, 0] : vector<8x8xbf16> -> vector<8x8xbf16>
    %cst_106 = arith.constant dense<0.000000e+00> : vector<8x8xf32>
    %349 = tpu.matmul %343, %348, %cst_106 {dimension_numbers = #tpu.dot_dimension_numbers<[1], [0], [0], [1], [0, 0, 1, 1], [], []>} : vector<8x8xbf16>, vector<8x8xbf16>, vector<8x8xf32> -> vector<8x8xf32>
    %cst_107 = arith.constant dense<0xFF800000> : vector<8xf32>
    %350 = vector.multi_reduction <maximumf>, %349, %cst_107 [1] : vector<8x8xf32> to vector<8xf32>
    %351 = vector.shape_cast %350 : vector<8xf32> to vector<8x1xf32>
    %352 = vector.broadcast %351 : vector<8x1xf32> to vector<8x8xf32>
    %353 = arith.subf %349, %352 : vector<8x8xf32>
    %354 = math.exp %353 : vector<8x8xf32>
    %cst_108 = arith.constant dense<0.000000e+00> : vector<8xf32>
    %355 = vector.multi_reduction <add>, %354, %cst_108 [1] : vector<8x8xf32> to vector<8xf32>
    %356 = vector.shape_cast %355 : vector<8xf32> to vector<8x1xf32>
    %357 = tpu.reciprocal %356 {approx = true} : vector<8x1xf32> -> vector<8x1xf32>
    %358 = vector.broadcast %357 : vector<8x1xf32> to vector<8x8xf32>
    %359 = arith.mulf %354, %358 : vector<8x8xf32>
    %360 = arith.truncf %359 : vector<8x8xf32> to vector<8x8xbf16>
    %cst_109 = arith.constant dense<0.000000e+00> : vector<8x8xf32>
    %361 = tpu.matmul %360, %347, %cst_109 {dimension_numbers = #tpu.dot_dimension_numbers<[1], [0], [0], [1], [0, 0, 1, 1], [], []>} : vector<8x8xbf16>, vector<8x8xbf16>, vector<8x8xf32> -> vector<8x8xf32>
    %362 = arith.truncf %361 : vector<8x8xf32> to vector<8x8xbf16>
    %363 = vector.extract_strided_slice %316 {offsets = [8, 0], sizes = [8, 32], strides = [1, 1]} : vector<32x32xbf16> to vector<8x32xbf16>
    %cst_110 = arith.constant dense<0.000000e+00> : vector<8x32xf32>
    %364 = tpu.matmul %362, %363, %cst_110 {dimension_numbers = #tpu.dot_dimension_numbers<[1], [0], [0], [1], [0, 0, 1, 1], [], []>} : vector<8x8xbf16>, vector<8x32xbf16>, vector<8x32xf32> -> vector<8x32xf32>
    %365 = arith.addf %341, %364 : vector<8x32xf32>
    %366 = vector.extract_strided_slice %313 {offsets = [0, 16], sizes = [8, 8], strides = [1, 1]} : vector<16x32xf32> to vector<8x8xf32>
    %367 = arith.truncf %366 : vector<8x8xf32> to vector<8x8xbf16>
    %368 = vector.extract_strided_slice %314 {offsets = [0, 16], sizes = [8, 8], strides = [1, 1]} : vector<16x32xf32> to vector<8x8xf32>
    %369 = arith.truncf %368 : vector<8x8xf32> to vector<8x8xbf16>
    %370 = vector.extract_strided_slice %315 {offsets = [0, 16], sizes = [8, 8], strides = [1, 1]} : vector<16x32xf32> to vector<8x8xf32>
    %371 = arith.truncf %370 : vector<8x8xf32> to vector<8x8xbf16>
    %372 = tpu.transpose %369, [1, 0] : vector<8x8xbf16> -> vector<8x8xbf16>
    %cst_111 = arith.constant dense<0.000000e+00> : vector<8x8xf32>
    %373 = tpu.matmul %367, %372, %cst_111 {dimension_numbers = #tpu.dot_dimension_numbers<[1], [0], [0], [1], [0, 0, 1, 1], [], []>} : vector<8x8xbf16>, vector<8x8xbf16>, vector<8x8xf32> -> vector<8x8xf32>
    %cst_112 = arith.constant dense<0xFF800000> : vector<8xf32>
    %374 = vector.multi_reduction <maximumf>, %373, %cst_112 [1] : vector<8x8xf32> to vector<8xf32>
    %375 = vector.shape_cast %374 : vector<8xf32> to vector<8x1xf32>
    %376 = vector.broadcast %375 : vector<8x1xf32> to vector<8x8xf32>
    %377 = arith.subf %373, %376 : vector<8x8xf32>
    %378 = math.exp %377 : vector<8x8xf32>
    %cst_113 = arith.constant dense<0.000000e+00> : vector<8xf32>
    %379 = vector.multi_reduction <add>, %378, %cst_113 [1] : vector<8x8xf32> to vector<8xf32>
    %380 = vector.shape_cast %379 : vector<8xf32> to vector<8x1xf32>
    %381 = tpu.reciprocal %380 {approx = true} : vector<8x1xf32> -> vector<8x1xf32>
    %382 = vector.broadcast %381 : vector<8x1xf32> to vector<8x8xf32>
    %383 = arith.mulf %378, %382 : vector<8x8xf32>
    %384 = arith.truncf %383 : vector<8x8xf32> to vector<8x8xbf16>
    %cst_114 = arith.constant dense<0.000000e+00> : vector<8x8xf32>
    %385 = tpu.matmul %384, %371, %cst_114 {dimension_numbers = #tpu.dot_dimension_numbers<[1], [0], [0], [1], [0, 0, 1, 1], [], []>} : vector<8x8xbf16>, vector<8x8xbf16>, vector<8x8xf32> -> vector<8x8xf32>
    %386 = arith.truncf %385 : vector<8x8xf32> to vector<8x8xbf16>
    %387 = vector.extract_strided_slice %316 {offsets = [16, 0], sizes = [8, 32], strides = [1, 1]} : vector<32x32xbf16> to vector<8x32xbf16>
    %cst_115 = arith.constant dense<0.000000e+00> : vector<8x32xf32>
    %388 = tpu.matmul %386, %387, %cst_115 {dimension_numbers = #tpu.dot_dimension_numbers<[1], [0], [0], [1], [0, 0, 1, 1], [], []>} : vector<8x8xbf16>, vector<8x32xbf16>, vector<8x32xf32> -> vector<8x32xf32>
    %389 = arith.addf %365, %388 : vector<8x32xf32>
    %390 = vector.extract_strided_slice %313 {offsets = [0, 24], sizes = [8, 8], strides = [1, 1]} : vector<16x32xf32> to vector<8x8xf32>
    %391 = arith.truncf %390 : vector<8x8xf32> to vector<8x8xbf16>
    %392 = vector.extract_strided_slice %314 {offsets = [0, 24], sizes = [8, 8], strides = [1, 1]} : vector<16x32xf32> to vector<8x8xf32>
    %393 = arith.truncf %392 : vector<8x8xf32> to vector<8x8xbf16>
    %394 = vector.extract_strided_slice %315 {offsets = [0, 24], sizes = [8, 8], strides = [1, 1]} : vector<16x32xf32> to vector<8x8xf32>
    %395 = arith.truncf %394 : vector<8x8xf32> to vector<8x8xbf16>
    %396 = tpu.transpose %393, [1, 0] : vector<8x8xbf16> -> vector<8x8xbf16>
    %cst_116 = arith.constant dense<0.000000e+00> : vector<8x8xf32>
    %397 = tpu.matmul %391, %396, %cst_116 {dimension_numbers = #tpu.dot_dimension_numbers<[1], [0], [0], [1], [0, 0, 1, 1], [], []>} : vector<8x8xbf16>, vector<8x8xbf16>, vector<8x8xf32> -> vector<8x8xf32>
    %cst_117 = arith.constant dense<0xFF800000> : vector<8xf32>
    %398 = vector.multi_reduction <maximumf>, %397, %cst_117 [1] : vector<8x8xf32> to vector<8xf32>
    %399 = vector.shape_cast %398 : vector<8xf32> to vector<8x1xf32>
    %400 = vector.broadcast %399 : vector<8x1xf32> to vector<8x8xf32>
    %401 = arith.subf %397, %400 : vector<8x8xf32>
    %402 = math.exp %401 : vector<8x8xf32>
    %cst_118 = arith.constant dense<0.000000e+00> : vector<8xf32>
    %403 = vector.multi_reduction <add>, %402, %cst_118 [1] : vector<8x8xf32> to vector<8xf32>
    %404 = vector.shape_cast %403 : vector<8xf32> to vector<8x1xf32>
    %405 = tpu.reciprocal %404 {approx = true} : vector<8x1xf32> -> vector<8x1xf32>
    %406 = vector.broadcast %405 : vector<8x1xf32> to vector<8x8xf32>
    %407 = arith.mulf %402, %406 : vector<8x8xf32>
    %408 = arith.truncf %407 : vector<8x8xf32> to vector<8x8xbf16>
    %cst_119 = arith.constant dense<0.000000e+00> : vector<8x8xf32>
    %409 = tpu.matmul %408, %395, %cst_119 {dimension_numbers = #tpu.dot_dimension_numbers<[1], [0], [0], [1], [0, 0, 1, 1], [], []>} : vector<8x8xbf16>, vector<8x8xbf16>, vector<8x8xf32> -> vector<8x8xf32>
    %410 = arith.truncf %409 : vector<8x8xf32> to vector<8x8xbf16>
    %411 = vector.extract_strided_slice %316 {offsets = [24, 0], sizes = [8, 32], strides = [1, 1]} : vector<32x32xbf16> to vector<8x32xbf16>
    %cst_120 = arith.constant dense<0.000000e+00> : vector<8x32xf32>
    %412 = tpu.matmul %410, %411, %cst_120 {dimension_numbers = #tpu.dot_dimension_numbers<[1], [0], [0], [1], [0, 0, 1, 1], [], []>} : vector<8x8xbf16>, vector<8x32xbf16>, vector<8x32xf32> -> vector<8x32xf32>
    %413 = arith.addf %389, %412 : vector<8x32xf32>
    %cst_121 = arith.constant 0.000000e+00 : f32
    %414 = vector.broadcast %cst_121 : f32 to vector<8x32xf32>
    %415 = vector.extract_strided_slice %313 {offsets = [8, 0], sizes = [8, 8], strides = [1, 1]} : vector<16x32xf32> to vector<8x8xf32>
    %416 = arith.truncf %415 : vector<8x8xf32> to vector<8x8xbf16>
    %417 = vector.extract_strided_slice %314 {offsets = [8, 0], sizes = [8, 8], strides = [1, 1]} : vector<16x32xf32> to vector<8x8xf32>
    %418 = arith.truncf %417 : vector<8x8xf32> to vector<8x8xbf16>
    %419 = vector.extract_strided_slice %315 {offsets = [8, 0], sizes = [8, 8], strides = [1, 1]} : vector<16x32xf32> to vector<8x8xf32>
    %420 = arith.truncf %419 : vector<8x8xf32> to vector<8x8xbf16>
    %421 = tpu.transpose %418, [1, 0] : vector<8x8xbf16> -> vector<8x8xbf16>
    %cst_122 = arith.constant dense<0.000000e+00> : vector<8x8xf32>
    %422 = tpu.matmul %416, %421, %cst_122 {dimension_numbers = #tpu.dot_dimension_numbers<[1], [0], [0], [1], [0, 0, 1, 1], [], []>} : vector<8x8xbf16>, vector<8x8xbf16>, vector<8x8xf32> -> vector<8x8xf32>
    %cst_123 = arith.constant dense<0xFF800000> : vector<8xf32>
    %423 = vector.multi_reduction <maximumf>, %422, %cst_123 [1] : vector<8x8xf32> to vector<8xf32>
    %424 = vector.shape_cast %423 : vector<8xf32> to vector<8x1xf32>
    %425 = vector.broadcast %424 : vector<8x1xf32> to vector<8x8xf32>
    %426 = arith.subf %422, %425 : vector<8x8xf32>
    %427 = math.exp %426 : vector<8x8xf32>
    %cst_124 = arith.constant dense<0.000000e+00> : vector<8xf32>
    %428 = vector.multi_reduction <add>, %427, %cst_124 [1] : vector<8x8xf32> to vector<8xf32>
    %429 = vector.shape_cast %428 : vector<8xf32> to vector<8x1xf32>
    %430 = tpu.reciprocal %429 {approx = true} : vector<8x1xf32> -> vector<8x1xf32>
    %431 = vector.broadcast %430 : vector<8x1xf32> to vector<8x8xf32>
    %432 = arith.mulf %427, %431 : vector<8x8xf32>
    %433 = arith.truncf %432 : vector<8x8xf32> to vector<8x8xbf16>
    %cst_125 = arith.constant dense<0.000000e+00> : vector<8x8xf32>
    %434 = tpu.matmul %433, %420, %cst_125 {dimension_numbers = #tpu.dot_dimension_numbers<[1], [0], [0], [1], [0, 0, 1, 1], [], []>} : vector<8x8xbf16>, vector<8x8xbf16>, vector<8x8xf32> -> vector<8x8xf32>
    %435 = arith.truncf %434 : vector<8x8xf32> to vector<8x8xbf16>
    %436 = vector.extract_strided_slice %316 {offsets = [0, 0], sizes = [8, 32], strides = [1, 1]} : vector<32x32xbf16> to vector<8x32xbf16>
    %cst_126 = arith.constant dense<0.000000e+00> : vector<8x32xf32>
    %437 = tpu.matmul %435, %436, %cst_126 {dimension_numbers = #tpu.dot_dimension_numbers<[1], [0], [0], [1], [0, 0, 1, 1], [], []>} : vector<8x8xbf16>, vector<8x32xbf16>, vector<8x32xf32> -> vector<8x32xf32>
    %438 = arith.addf %414, %437 : vector<8x32xf32>
    %439 = vector.extract_strided_slice %313 {offsets = [8, 8], sizes = [8, 8], strides = [1, 1]} : vector<16x32xf32> to vector<8x8xf32>
    %440 = arith.truncf %439 : vector<8x8xf32> to vector<8x8xbf16>
    %441 = vector.extract_strided_slice %314 {offsets = [8, 8], sizes = [8, 8], strides = [1, 1]} : vector<16x32xf32> to vector<8x8xf32>
    %442 = arith.truncf %441 : vector<8x8xf32> to vector<8x8xbf16>
    %443 = vector.extract_strided_slice %315 {offsets = [8, 8], sizes = [8, 8], strides = [1, 1]} : vector<16x32xf32> to vector<8x8xf32>
    %444 = arith.truncf %443 : vector<8x8xf32> to vector<8x8xbf16>
    %445 = tpu.transpose %442, [1, 0] : vector<8x8xbf16> -> vector<8x8xbf16>
    %cst_127 = arith.constant dense<0.000000e+00> : vector<8x8xf32>
    %446 = tpu.matmul %440, %445, %cst_127 {dimension_numbers = #tpu.dot_dimension_numbers<[1], [0], [0], [1], [0, 0, 1, 1], [], []>} : vector<8x8xbf16>, vector<8x8xbf16>, vector<8x8xf32> -> vector<8x8xf32>
    %cst_128 = arith.constant dense<0xFF800000> : vector<8xf32>
    %447 = vector.multi_reduction <maximumf>, %446, %cst_128 [1] : vector<8x8xf32> to vector<8xf32>
    %448 = vector.shape_cast %447 : vector<8xf32> to vector<8x1xf32>
    %449 = vector.broadcast %448 : vector<8x1xf32> to vector<8x8xf32>
    %450 = arith.subf %446, %449 : vector<8x8xf32>
    %451 = math.exp %450 : vector<8x8xf32>
    %cst_129 = arith.constant dense<0.000000e+00> : vector<8xf32>
    %452 = vector.multi_reduction <add>, %451, %cst_129 [1] : vector<8x8xf32> to vector<8xf32>
    %453 = vector.shape_cast %452 : vector<8xf32> to vector<8x1xf32>
    %454 = tpu.reciprocal %453 {approx = true} : vector<8x1xf32> -> vector<8x1xf32>
    %455 = vector.broadcast %454 : vector<8x1xf32> to vector<8x8xf32>
    %456 = arith.mulf %451, %455 : vector<8x8xf32>
    %457 = arith.truncf %456 : vector<8x8xf32> to vector<8x8xbf16>
    %cst_130 = arith.constant dense<0.000000e+00> : vector<8x8xf32>
    %458 = tpu.matmul %457, %444, %cst_130 {dimension_numbers = #tpu.dot_dimension_numbers<[1], [0], [0], [1], [0, 0, 1, 1], [], []>} : vector<8x8xbf16>, vector<8x8xbf16>, vector<8x8xf32> -> vector<8x8xf32>
    %459 = arith.truncf %458 : vector<8x8xf32> to vector<8x8xbf16>
    %460 = vector.extract_strided_slice %316 {offsets = [8, 0], sizes = [8, 32], strides = [1, 1]} : vector<32x32xbf16> to vector<8x32xbf16>
    %cst_131 = arith.constant dense<0.000000e+00> : vector<8x32xf32>
    %461 = tpu.matmul %459, %460, %cst_131 {dimension_numbers = #tpu.dot_dimension_numbers<[1], [0], [0], [1], [0, 0, 1, 1], [], []>} : vector<8x8xbf16>, vector<8x32xbf16>, vector<8x32xf32> -> vector<8x32xf32>
    %462 = arith.addf %438, %461 : vector<8x32xf32>
    %463 = vector.extract_strided_slice %313 {offsets = [8, 16], sizes = [8, 8], strides = [1, 1]} : vector<16x32xf32> to vector<8x8xf32>
    %464 = arith.truncf %463 : vector<8x8xf32> to vector<8x8xbf16>
    %465 = vector.extract_strided_slice %314 {offsets = [8, 16], sizes = [8, 8], strides = [1, 1]} : vector<16x32xf32> to vector<8x8xf32>
    %466 = arith.truncf %465 : vector<8x8xf32> to vector<8x8xbf16>
    %467 = vector.extract_strided_slice %315 {offsets = [8, 16], sizes = [8, 8], strides = [1, 1]} : vector<16x32xf32> to vector<8x8xf32>
    %468 = arith.truncf %467 : vector<8x8xf32> to vector<8x8xbf16>
    %469 = tpu.transpose %466, [1, 0] : vector<8x8xbf16> -> vector<8x8xbf16>
    %cst_132 = arith.constant dense<0.000000e+00> : vector<8x8xf32>
    %470 = tpu.matmul %464, %469, %cst_132 {dimension_numbers = #tpu.dot_dimension_numbers<[1], [0], [0], [1], [0, 0, 1, 1], [], []>} : vector<8x8xbf16>, vector<8x8xbf16>, vector<8x8xf32> -> vector<8x8xf32>
    %cst_133 = arith.constant dense<0xFF800000> : vector<8xf32>
    %471 = vector.multi_reduction <maximumf>, %470, %cst_133 [1] : vector<8x8xf32> to vector<8xf32>
    %472 = vector.shape_cast %471 : vector<8xf32> to vector<8x1xf32>
    %473 = vector.broadcast %472 : vector<8x1xf32> to vector<8x8xf32>
    %474 = arith.subf %470, %473 : vector<8x8xf32>
    %475 = math.exp %474 : vector<8x8xf32>
    %cst_134 = arith.constant dense<0.000000e+00> : vector<8xf32>
    %476 = vector.multi_reduction <add>, %475, %cst_134 [1] : vector<8x8xf32> to vector<8xf32>
    %477 = vector.shape_cast %476 : vector<8xf32> to vector<8x1xf32>
    %478 = tpu.reciprocal %477 {approx = true} : vector<8x1xf32> -> vector<8x1xf32>
    %479 = vector.broadcast %478 : vector<8x1xf32> to vector<8x8xf32>
    %480 = arith.mulf %475, %479 : vector<8x8xf32>
    %481 = arith.truncf %480 : vector<8x8xf32> to vector<8x8xbf16>
    %cst_135 = arith.constant dense<0.000000e+00> : vector<8x8xf32>
    %482 = tpu.matmul %481, %468, %cst_135 {dimension_numbers = #tpu.dot_dimension_numbers<[1], [0], [0], [1], [0, 0, 1, 1], [], []>} : vector<8x8xbf16>, vector<8x8xbf16>, vector<8x8xf32> -> vector<8x8xf32>
    %483 = arith.truncf %482 : vector<8x8xf32> to vector<8x8xbf16>
    %484 = vector.extract_strided_slice %316 {offsets = [16, 0], sizes = [8, 32], strides = [1, 1]} : vector<32x32xbf16> to vector<8x32xbf16>
    %cst_136 = arith.constant dense<0.000000e+00> : vector<8x32xf32>
    %485 = tpu.matmul %483, %484, %cst_136 {dimension_numbers = #tpu.dot_dimension_numbers<[1], [0], [0], [1], [0, 0, 1, 1], [], []>} : vector<8x8xbf16>, vector<8x32xbf16>, vector<8x32xf32> -> vector<8x32xf32>
    %486 = arith.addf %462, %485 : vector<8x32xf32>
    %487 = vector.extract_strided_slice %313 {offsets = [8, 24], sizes = [8, 8], strides = [1, 1]} : vector<16x32xf32> to vector<8x8xf32>
    %488 = arith.truncf %487 : vector<8x8xf32> to vector<8x8xbf16>
    %489 = vector.extract_strided_slice %314 {offsets = [8, 24], sizes = [8, 8], strides = [1, 1]} : vector<16x32xf32> to vector<8x8xf32>
    %490 = arith.truncf %489 : vector<8x8xf32> to vector<8x8xbf16>
    %491 = vector.extract_strided_slice %315 {offsets = [8, 24], sizes = [8, 8], strides = [1, 1]} : vector<16x32xf32> to vector<8x8xf32>
    %492 = arith.truncf %491 : vector<8x8xf32> to vector<8x8xbf16>
    %493 = tpu.transpose %490, [1, 0] : vector<8x8xbf16> -> vector<8x8xbf16>
    %cst_137 = arith.constant dense<0.000000e+00> : vector<8x8xf32>
    %494 = tpu.matmul %488, %493, %cst_137 {dimension_numbers = #tpu.dot_dimension_numbers<[1], [0], [0], [1], [0, 0, 1, 1], [], []>} : vector<8x8xbf16>, vector<8x8xbf16>, vector<8x8xf32> -> vector<8x8xf32>
    %cst_138 = arith.constant dense<0xFF800000> : vector<8xf32>
    %495 = vector.multi_reduction <maximumf>, %494, %cst_138 [1] : vector<8x8xf32> to vector<8xf32>
    %496 = vector.shape_cast %495 : vector<8xf32> to vector<8x1xf32>
    %497 = vector.broadcast %496 : vector<8x1xf32> to vector<8x8xf32>
    %498 = arith.subf %494, %497 : vector<8x8xf32>
    %499 = math.exp %498 : vector<8x8xf32>
    %cst_139 = arith.constant dense<0.000000e+00> : vector<8xf32>
    %500 = vector.multi_reduction <add>, %499, %cst_139 [1] : vector<8x8xf32> to vector<8xf32>
    %501 = vector.shape_cast %500 : vector<8xf32> to vector<8x1xf32>
    %502 = tpu.reciprocal %501 {approx = true} : vector<8x1xf32> -> vector<8x1xf32>
    %503 = vector.broadcast %502 : vector<8x1xf32> to vector<8x8xf32>
    %504 = arith.mulf %499, %503 : vector<8x8xf32>
    %505 = arith.truncf %504 : vector<8x8xf32> to vector<8x8xbf16>
    %cst_140 = arith.constant dense<0.000000e+00> : vector<8x8xf32>
    %506 = tpu.matmul %505, %492, %cst_140 {dimension_numbers = #tpu.dot_dimension_numbers<[1], [0], [0], [1], [0, 0, 1, 1], [], []>} : vector<8x8xbf16>, vector<8x8xbf16>, vector<8x8xf32> -> vector<8x8xf32>
    %507 = arith.truncf %506 : vector<8x8xf32> to vector<8x8xbf16>
    %508 = vector.extract_strided_slice %316 {offsets = [24, 0], sizes = [8, 32], strides = [1, 1]} : vector<32x32xbf16> to vector<8x32xbf16>
    %cst_141 = arith.constant dense<0.000000e+00> : vector<8x32xf32>
    %509 = tpu.matmul %507, %508, %cst_141 {dimension_numbers = #tpu.dot_dimension_numbers<[1], [0], [0], [1], [0, 0, 1, 1], [], []>} : vector<8x8xbf16>, vector<8x32xbf16>, vector<8x32xf32> -> vector<8x32xf32>
    %510 = arith.addf %486, %509 : vector<8x32xf32>
    %511 = tpu.concatenate %413, %510 in 0 : vector<8x32xf32>, vector<8x32xf32> -> vector<16x32xf32>
    %512 = arith.addf %253, %511 : vector<16x32xf32>
    %c0_142 = arith.constant 0 : index
    %c0_143 = arith.constant 0 : index
    %513 = vector.load %arg16[%c0_142, %c0_143] : memref<1x32xf32, #tpu.memory_space<vmem>>, vector<1x32xf32>
    %514 = vector.broadcast %513 : vector<1x32xf32> to vector<16x32xf32>
    %515 = arith.addf %512, %514 : vector<16x32xf32>
    %cst_144 = arith.constant dense<0.000000e+00> : vector<16xf32>
    %516 = vector.multi_reduction <add>, %515, %cst_144 [1] : vector<16x32xf32> to vector<16xf32>
    %517 = vector.shape_cast %516 : vector<16xf32> to vector<16x1xf32>
    %cst_145 = arith.constant 3.200000e+01 : f32
    %518 = vector.broadcast %cst_145 : f32 to vector<16x1xf32>
    %519 = arith.divf %517, %518 : vector<16x1xf32>
    %520 = vector.broadcast %519 : vector<16x1xf32> to vector<16x32xf32>
    %521 = arith.subf %515, %520 : vector<16x32xf32>
    %522 = arith.mulf %521, %521 : vector<16x32xf32>
    %cst_146 = arith.constant dense<0.000000e+00> : vector<16xf32>
    %523 = vector.multi_reduction <add>, %522, %cst_146 [1] : vector<16x32xf32> to vector<16xf32>
    %524 = vector.shape_cast %523 : vector<16xf32> to vector<16x1xf32>
    %cst_147 = arith.constant 3.200000e+01 : f32
    %525 = vector.broadcast %cst_147 : f32 to vector<16x1xf32>
    %526 = arith.divf %524, %525 : vector<16x1xf32>
    %527 = vector.broadcast %519 : vector<16x1xf32> to vector<16x32xf32>
    %528 = arith.subf %515, %527 : vector<16x32xf32>
    %cst_148 = arith.constant 9.99999974E-6 : f32
    %529 = vector.broadcast %cst_148 : f32 to vector<16x1xf32>
    %530 = arith.addf %526, %529 : vector<16x1xf32>
    %531 = math.rsqrt %530 : vector<16x1xf32>
    %532 = vector.broadcast %531 : vector<16x1xf32> to vector<16x32xf32>
    %533 = arith.mulf %528, %532 : vector<16x32xf32>
    %c0_149 = arith.constant 0 : index
    %c0_150 = arith.constant 0 : index
    %534 = vector.load %arg17[%c0_149, %c0_150] : memref<1x32xf32, #tpu.memory_space<vmem>>, vector<1x32xf32>
    %535 = vector.broadcast %534 : vector<1x32xf32> to vector<16x32xf32>
    %536 = arith.mulf %533, %535 : vector<16x32xf32>
    %c0_151 = arith.constant 0 : index
    %c0_152 = arith.constant 0 : index
    %537 = vector.load %arg18[%c0_151, %c0_152] : memref<1x32xf32, #tpu.memory_space<vmem>>, vector<1x32xf32>
    %538 = vector.broadcast %537 : vector<1x32xf32> to vector<16x32xf32>
    %539 = arith.addf %536, %538 : vector<16x32xf32>
    %540 = arith.truncf %539 : vector<16x32xf32> to vector<16x32xbf16>
    %c0_153 = arith.constant 0 : index
    %c0_154 = arith.constant 0 : index
    %541 = vector.load %arg19[%c0_153, %c0_154] : memref<32x128xbf16, #tpu.memory_space<vmem>>, vector<32x128xbf16>
    %cst_155 = arith.constant dense<0.000000e+00> : vector<16x128xf32>
    %542 = tpu.matmul %540, %541, %cst_155 {dimension_numbers = #tpu.dot_dimension_numbers<[1], [0], [0], [1], [0, 0, 1, 1], [], []>} : vector<16x32xbf16>, vector<32x128xbf16>, vector<16x128xf32> -> vector<16x128xf32>
    %c0_156 = arith.constant 0 : index
    %c0_157 = arith.constant 0 : index
    %543 = vector.load %arg20[%c0_156, %c0_157] : memref<1x128xf32, #tpu.memory_space<vmem>>, vector<1x128xf32>
    %544 = vector.broadcast %543 : vector<1x128xf32> to vector<16x128xf32>
    %545 = arith.addf %542, %544 : vector<16x128xf32>
    %cst_158 = arith.constant 0.000000e+00 : f32
    %546 = vector.broadcast %cst_158 : f32 to vector<16x128xf32>
    %547 = arith.maximumf %545, %546 : vector<16x128xf32>
    %548 = arith.truncf %547 : vector<16x128xf32> to vector<16x128xbf16>
    %c0_159 = arith.constant 0 : index
    %c0_160 = arith.constant 0 : index
    %549 = vector.load %arg21[%c0_159, %c0_160] : memref<128x32xbf16, #tpu.memory_space<vmem>>, vector<128x32xbf16>
    %cst_161 = arith.constant dense<0.000000e+00> : vector<16x32xf32>
    %550 = tpu.matmul %548, %549, %cst_161 {dimension_numbers = #tpu.dot_dimension_numbers<[1], [0], [0], [1], [0, 0, 1, 1], [], []>} : vector<16x128xbf16>, vector<128x32xbf16>, vector<16x32xf32> -> vector<16x32xf32>
    %c0_162 = arith.constant 0 : index
    %c0_163 = arith.constant 0 : index
    %551 = vector.load %arg22[%c0_162, %c0_163] : memref<1x32xf32, #tpu.memory_space<vmem>>, vector<1x32xf32>
    %552 = vector.broadcast %551 : vector<1x32xf32> to vector<16x32xf32>
    %553 = arith.addf %550, %552 : vector<16x32xf32>
    %554 = arith.addf %515, %553 : vector<16x32xf32>
    %c0_164 = arith.constant 0 : index
    %c0_165 = arith.constant 0 : index
    %555 = vector.load %arg23[%c0_164, %c0_165] : memref<16x32xf32, #tpu.memory_space<vmem>>, vector<16x32xf32>
    tpu.vector_store %arg23[%c0_164, %c0_165], %554 {strides = array<i32>} : memref<16x32xf32, #tpu.memory_space<vmem>>, vector<16x32xf32>,
    return
  }
  func.func @transform_0(%arg0: i32) -> (i32, i32) {
    %c0_i32 = arith.constant 0 : i32
    %c0_i32_0 = arith.constant 0 : i32
    return %arg0, %c0_i32 : i32, i32
  }
  func.func @transform_1(%arg0: i32) -> (i32, i32) {
    %c0_i32 = arith.constant 0 : i32
    %c0_i32_0 = arith.constant 0 : i32
    return %arg0, %c0_i32 : i32, i32
  }
  func.func @transform_2(%arg0: i32) -> (i32, i32) {
    %c0_i32 = arith.constant 0 : i32
    %c0_i32_0 = arith.constant 0 : i32
    %c0_i32_1 = arith.constant 0 : i32
    return %c0_i32, %c0_i32_0 : i32, i32
  }
  func.func @transform_3(%arg0: i32) -> (i32, i32) {
    %c0_i32 = arith.constant 0 : i32
    %c0_i32_0 = arith.constant 0 : i32
    %c0_i32_1 = arith.constant 0 : i32
    return %c0_i32, %c0_i32_0 : i32, i32
  }
  func.func @transform_4(%arg0: i32) -> (i32, i32) {
    %c0_i32 = arith.constant 0 : i32
    %c0_i32_0 = arith.constant 0 : i32
    %c0_i32_1 = arith.constant 0 : i32
    return %c0_i32, %c0_i32_0 : i32, i32
  }
  func.func @transform_5(%arg0: i32) -> (i32, i32) {
    %c0_i32 = arith.constant 0 : i32
    %c0_i32_0 = arith.constant 0 : i32
    %c0_i32_1 = arith.constant 0 : i32
    return %c0_i32, %c0_i32_0 : i32, i32
  }
  func.func @transform_6(%arg0: i32) -> (i32, i32) {
    %c0_i32 = arith.constant 0 : i32
    %c0_i32_0 = arith.constant 0 : i32
    %c0_i32_1 = arith.constant 0 : i32
    return %c0_i32, %c0_i32_0 : i32, i32
  }
  func.func @transform_7(%arg0: i32) -> (i32, i32) {
    %c0_i32 = arith.constant 0 : i32
    %c0_i32_0 = arith.constant 0 : i32
    %c0_i32_1 = arith.constant 0 : i32
    return %c0_i32, %c0_i32_0 : i32, i32
  }
  func.func @transform_8(%arg0: i32) -> (i32, i32) {
    %c0_i32 = arith.constant 0 : i32
    %c0_i32_0 = arith.constant 0 : i32
    %c0_i32_1 = arith.constant 0 : i32
    return %c0_i32, %c0_i32_0 : i32, i32
  }
  func.func @transform_9(%arg0: i32) -> (i32, i32) {
    %c0_i32 = arith.constant 0 : i32
    %c0_i32_0 = arith.constant 0 : i32
    %c0_i32_1 = arith.constant 0 : i32
    return %c0_i32, %c0_i32_0 : i32, i32
  }
  func.func @transform_10(%arg0: i32) -> (i32, i32) {
    %c0_i32 = arith.constant 0 : i32
    %c0_i32_0 = arith.constant 0 : i32
    %c0_i32_1 = arith.constant 0 : i32
    return %c0_i32, %c0_i32_0 : i32, i32
  }
  func.func @transform_11(%arg0: i32) -> (i32, i32) {
    %c0_i32 = arith.constant 0 : i32
    %c0_i32_0 = arith.constant 0 : i32
    %c0_i32_1 = arith.constant 0 : i32
    return %c0_i32, %c0_i32_0 : i32, i32
  }
  func.func @transform_12(%arg0: i32) -> (i32, i32) {
    %c0_i32 = arith.constant 0 : i32
    %c0_i32_0 = arith.constant 0 : i32
    %c0_i32_1 = arith.constant 0 : i32
    return %c0_i32, %c0_i32_0 : i32, i32
  }
  func.func @transform_13(%arg0: i32) -> (i32, i32) {
    %c0_i32 = arith.constant 0 : i32
    %c0_i32_0 = arith.constant 0 : i32
    %c0_i32_1 = arith.constant 0 : i32
    return %c0_i32, %c0_i32_0 : i32, i32
  }
  func.func @transform_14(%arg0: i32) -> (i32, i32) {
    %c0_i32 = arith.constant 0 : i32
    %c0_i32_0 = arith.constant 0 : i32
    %c0_i32_1 = arith.constant 0 : i32
    return %c0_i32, %c0_i32_0 : i32, i32
  }
  func.func @transform_15(%arg0: i32) -> (i32, i32) {
    %c0_i32 = arith.constant 0 : i32
    %c0_i32_0 = arith.constant 0 : i32
    %c0_i32_1 = arith.constant 0 : i32
    return %c0_i32, %c0_i32_0 : i32, i32
  }
  func.func @transform_16(%arg0: i32) -> (i32, i32) {
    %c0_i32 = arith.constant 0 : i32
    %c0_i32_0 = arith.constant 0 : i32
    %c0_i32_1 = arith.constant 0 : i32
    return %c0_i32, %c0_i32_0 : i32, i32
  }
  func.func @transform_17(%arg0: i32) -> (i32, i32) {
    %c0_i32 = arith.constant 0 : i32
    %c0_i32_0 = arith.constant 0 : i32
    %c0_i32_1 = arith.constant 0 : i32
    return %c0_i32, %c0_i32_0 : i32, i32
  }
  func.func @transform_18(%arg0: i32) -> (i32, i32) {
    %c0_i32 = arith.constant 0 : i32
    %c0_i32_0 = arith.constant 0 : i32
    %c0_i32_1 = arith.constant 0 : i32
    return %c0_i32, %c0_i32_0 : i32, i32
  }
  func.func @transform_19(%arg0: i32) -> (i32, i32) {
    %c0_i32 = arith.constant 0 : i32
    %c0_i32_0 = arith.constant 0 : i32
    %c0_i32_1 = arith.constant 0 : i32
    return %c0_i32, %c0_i32_0 : i32, i32
  }
  func.func @transform_20(%arg0: i32) -> (i32, i32) {
    %c0_i32 = arith.constant 0 : i32
    %c0_i32_0 = arith.constant 0 : i32
    %c0_i32_1 = arith.constant 0 : i32
    return %c0_i32, %c0_i32_0 : i32, i32
  }
  func.func @transform_21(%arg0: i32) -> (i32, i32) {
    %c0_i32 = arith.constant 0 : i32
    %c0_i32_0 = arith.constant 0 : i32
    %c0_i32_1 = arith.constant 0 : i32
    return %c0_i32, %c0_i32_0 : i32, i32
  }
  func.func @transform_22(%arg0: i32) -> (i32, i32) {
    %c0_i32 = arith.constant 0 : i32
    %c0_i32_0 = arith.constant 0 : i32
    return %arg0, %c0_i32 : i32, i32
  }
}

</mosaic_0001>

<bundles_post_ra>
// kernel: tpu_custom_call.1
= control target key start
LH: loop header
LB: loop body
LE: loop exit
PB: predicated region body
PF: predicated region fallthrough
CT: control target
= control target key end

     0   :  { %s5168_s0 = inlined_call_operand.vmem [shape: f32[16,32], index: 0, kind: input, shape index: {}]   ;;  %s5169_s1 = inlined_call_operand.vmem [shape: f32[16,32], index: 1, kind: input, shape index: {}]   ;;  %s5170_s2 = inlined_call_operand.hbm [shape: f32[1,32], index: 2, kind: input, shape index: {}]   ;;  %s5171_s3 = inlined_call_operand.hbm [shape: f32[1,32], index: 3, kind: input, shape index: {}]   ;;  %s5172_s4 = inlined_call_operand.vmem [shape: bf16[32,96], index: 4, kind: input, shape index: {}]   ;;  %s5173_s5 = inlined_call_operand.hbm [shape: f32[1,96], index: 5, kind: input, shape index: {}]   ;;  %s5174_s6 = inlined_call_operand.vmem [shape: bf16[32,32], index: 6, kind: input, shape index: {}]   ;;  %s5175_s7 = inlined_call_operand.hbm [shape: f32[1,32], index: 7, kind: input, shape index: {}]   ;;  %s5176_s8 = inlined_call_operand.hbm [shape: f32[1,32], index: 8, kind: input, shape index: {}]   ;;  %s5177_s9 = inlined_call_operand.hbm [shape: f32[1,32], index: 9, kind: input, shape index: {}]   ;;  %s5178_s10 = inlined_call_operand.vmem [shape: bf16[32,64], index: 10, kind: input, shape index: {}]   ;;  %s5179_s11 = inlined_call_operand.hbm [shape: f32[1,64], index: 11, kind: input, shape index: {}]   ;;  %s5180_s12 = inlined_call_operand.vmem [shape: bf16[32,32], index: 12, kind: input, shape index: {}]   ;;  %s5181_s13 = inlined_call_operand.hbm [shape: f32[1,32], index: 13, kind: input, shape index: {}]   ;;  %s5182_s14 = inlined_call_operand.vmem [shape: bf16[32,32], index: 14, kind: input, shape index: {}]   ;;  %s5183_s15 = inlined_call_operand.hbm [shape: f32[1,32], index: 15, kind: input, shape index: {}]   ;;  %s5184_s16 = inlined_call_operand.hbm [shape: f32[1,32], index: 16, kind: input, shape index: {}]   ;;  %s5185_s17 = inlined_call_operand.hbm [shape: f32[1,32], index: 17, kind: input, shape index: {}]   ;;  %s5186_s18 = inlined_call_operand.vmem [shape: bf16[32,128], index: 18, kind: input, shape index: {}]   ;;  %s5187_s19 = inlined_call_operand.vmem [shape: f32[1,128], index: 19, kind: input, shape index: {}]   ;;  %s5188_s20 = inlined_call_operand.vmem [shape: bf16[128,32], index: 20, kind: input, shape index: {}]   ;;  %s5189_s21 = inlined_call_operand.vmem [shape: f32[1,32], index: 21, kind: input, shape index: {}]   ;;  %s5190_s22 = inlined_call_operand.hbm [shape: f32[16,32], index: 22, kind: output, shape index: {}]  }
   0x1   :  { %5198 = sst [smem:[#allocation28_spill]] %s5168_s0 }
   0x2   :  { %5199 = sst [smem:[#allocation29_spill]] %s5169_s1 }
   0x3   :  { %5200 = sst [smem:[#allocation30_spill]] %s5170_s2 }
   0x4   :  { %5201 = sst [smem:[#allocation31_spill]] %s5171_s3 }
   0x5   :  { %5202 = sst [smem:[#allocation32_spill]] %s5172_s4 }
   0x6   :  { %5203 = sst [smem:[#allocation33_spill]] %s5173_s5 }
   0x7   :  { %5204 = sst [smem:[#allocation34_spill]] %s5174_s6 }
   0x8   :  { %27 = vsyncpa [#allocation3], 0 }
   0x9   :  { %28 = vsyncpa [#allocation6], 0 }
   0xa   :  { %29 = vsyncpa [#allocation9], 0 }
   0xb   :  { %30 = vsyncpa [#allocation12], 0 }
   0xc   :  { %31 = vsyncpa [#allocation15], 0 }
   0xd   :  { %32 = vsyncpa [#allocation18], 0 }
   0xe   :  { %33 = vsyncpa [#allocation4], 0  ;;  %s4262_s3 = smov [#allocation5]   ;;  %s4263_s29 = smov [#allocation8]  }
   0xf   :  { %s54_s28 = sshll.u32 %s4262_s3, 4  ;;  %s78_s30 = sshll.u32 %s4263_s29, 4  ;;  %s55_s28 = int_to_ptr.vmem [resolvable:$true] %s54_s28  ;;  %s79_s30 = int_to_ptr.vmem [resolvable:$true] %s78_s30 }
  0x10   :  { %s5205_s23 = sld [smem:[#allocation31_spill]] }
  0x16   :  { %s3984_s1 = scalar_lea.hbm %s5205_s23, 16 }
  0x17   :  { %p3985_p0 = scmp.ne.s32.totalorder %s5205_s23, %s3984_s1  ;;  %p3988_p1 = scmp.lt.u32.totalorder %s3984_s1, %s5205_s23 }
  0x19   :  { %p3990_p2 = pnand %p3988_p1, %p3985_p0 }
  0x1b   :  { %3993 = shalt.err (!%p3990_p2)
}
  0x1c   :  { %s3994_s26 = scalar_lea.vmem %s55_s28, 16  ;;  %s3998_s2 = scalar_lea.vmem %s55_s28, 32 }
  0x1d   :  { %p3995_p3 = scmp.ne.s32.totalorder %s55_s28, %s3994_s26  ;;  %p3999_p4 = scmp.lt.s32.totalorder %s55_s28, %s55_s28 }
  0x1e   :  { %p4000_p5 = scmp.lt.s32.totalorder %s3998_s2, %s3994_s26 }
  0x20   :  { %p4001_p6 = por %p4000_p5, %p3999_p4 }
  0x22   :  { %p4002_p7 = pnand %p4001_p6, %p3995_p3 }
  0x24   :  { %4005 = shalt.err (!%p4002_p7)
}
  0x25   :  { %57 = dma.hbm_to_vmem [thread:$0]  %s5205_s23, 16, %s55_s28, [#allocation6]  }
  0x26   :  { %s4006_s0 = scalar_lea.hbm %s5175_s7, 16 }
  0x27   :  { %p4007_p8 = scmp.ne.s32.totalorder %s5175_s7, %s4006_s0  ;;  %p4010_p9 = scmp.lt.u32.totalorder %s4006_s0, %s5175_s7 }
  0x29   :  { %p4012_p10 = pnand %p4010_p9, %p4007_p8 }
  0x2b   :  { %4015 = shalt.err (!%p4012_p10)
}
  0x2c   :  { %s4016_s25 = scalar_lea.vmem %s79_s30, 16  ;;  %s4020_s26 = scalar_lea.vmem %s79_s30, 32 }
  0x2d   :  { %p4017_p11 = scmp.ne.s32.totalorder %s79_s30, %s4016_s25  ;;  %p4021_p12 = scmp.lt.s32.totalorder %s79_s30, %s79_s30 }
  0x2e   :  { %p4022_p13 = scmp.lt.s32.totalorder %s4020_s26, %s4016_s25 }
  0x30   :  { %p4023_p0 = por %p4022_p13, %p4021_p12 }
  0x32   :  { %p4024_p1 = pnand %p4023_p0, %p4017_p11 }
  0x34   :  { %4027 = shalt.err (!%p4024_p1)
}
  0x35   :  { %81 = dma.hbm_to_vmem [thread:$0]  %s5175_s7, 16, %s79_s30, [#allocation9]  }
  0x36   :  { %s4264_s2 = smov [#allocation11]   ;;  %s4265_s3 = smov [#allocation14]  }
  0x37   :  { %s98_s27 = sshll.u32 %s4264_s2, 4  ;;  %s122_s29 = sshll.u32 %s4265_s3, 4  ;;  %s99_s27 = int_to_ptr.vmem [resolvable:$true] %s98_s27  ;;  %s123_s29 = int_to_ptr.vmem [resolvable:$true] %s122_s29 }
  0x38   :  { %s4028_s5 = scalar_lea.hbm %s5177_s9, 16 }
  0x39   :  { %p4029_p2 = scmp.ne.s32.totalorder %s5177_s9, %s4028_s5  ;;  %p4032_p3 = scmp.lt.u32.totalorder %s4028_s5, %s5177_s9 }
  0x3b   :  { %p4034_p4 = pnand %p4032_p3, %p4029_p2 }
  0x3d   :  { %4037 = shalt.err (!%p4034_p4)
}
  0x3e   :  { %s4038_s7 = scalar_lea.vmem %s99_s27, 16  ;;  %s4042_s30 = scalar_lea.vmem %s99_s27, 32 }
  0x3f   :  { %p4039_p5 = scmp.ne.s32.totalorder %s99_s27, %s4038_s7  ;;  %p4043_p6 = scmp.lt.s32.totalorder %s99_s27, %s99_s27 }
  0x40   :  { %p4044_p7 = scmp.lt.s32.totalorder %s4042_s30, %s4038_s7 }
  0x42   :  { %p4045_p8 = por %p4044_p7, %p4043_p6 }
  0x44   :  { %p4046_p9 = pnand %p4045_p8, %p4039_p5 }
  0x46   :  { %4049 = shalt.err (!%p4046_p9)
}
  0x47   :  { %101 = dma.hbm_to_vmem [thread:$0]  %s5177_s9, 16, %s99_s27, [#allocation12]  }
  0x48   :  { %s4050_s3 = scalar_lea.hbm %s5181_s13, 16 }
  0x49   :  { %p4051_p10 = scmp.ne.s32.totalorder %s5181_s13, %s4050_s3  ;;  %p4054_p11 = scmp.lt.u32.totalorder %s4050_s3, %s5181_s13 }
  0x4b   :  { %p4056_p12 = pnand %p4054_p11, %p4051_p10 }
  0x4d   :  { %4059 = shalt.err (!%p4056_p12)
}
  0x4e   :  { %s4060_s24 = scalar_lea.vmem %s123_s29, 16  ;;  %s4064_s6 = scalar_lea.vmem %s123_s29, 32 }
  0x4f   :  { %p4061_p13 = scmp.ne.s32.totalorder %s123_s29, %s4060_s24  ;;  %p4065_p0 = scmp.lt.s32.totalorder %s123_s29, %s123_s29 }
  0x50   :  { %p4066_p1 = scmp.lt.s32.totalorder %s4064_s6, %s4060_s24 }
  0x52   :  { %p4067_p2 = por %p4066_p1, %p4065_p0 }
  0x54   :  { %p4068_p3 = pnand %p4067_p2, %p4061_p13 }
  0x56   :  { %4071 = shalt.err (!%p4068_p3)
}
  0x57   :  { %125 = dma.hbm_to_vmem [thread:$0]  %s5181_s13, 16, %s123_s29, [#allocation15]  }
  0x58   :  { %s4266_s25 = smov [#allocation17]   ;;  %s4267_s30 = smov [#allocation2]  }
  0x59   :  { %s144_s7 = sshll.u32 %s4266_s25, 4  ;;  %s44_s26 = sshll.u32 %s4267_s30, 4  ;;  %s145_s7 = int_to_ptr.vmem [resolvable:$true] %s144_s7  ;;  %s45_s26 = int_to_ptr.vmem [resolvable:$true] %s44_s26 }
  0x5a   :  { %s4072_s2 = scalar_lea.hbm %s5184_s16, 16 }
  0x5b   :  { %p4073_p4 = scmp.ne.s32.totalorder %s5184_s16, %s4072_s2  ;;  %p4076_p5 = scmp.lt.u32.totalorder %s4072_s2, %s5184_s16 }
  0x5d   :  { %p4078_p6 = pnand %p4076_p5, %p4073_p4 }
  0x5f   :  { %4081 = shalt.err (!%p4078_p6)
}
  0x60   :  { %s4082_s13 = scalar_lea.vmem %s145_s7, 16  ;;  %s4086_s29 = scalar_lea.vmem %s145_s7, 32 }
  0x61   :  { %p4083_p7 = scmp.ne.s32.totalorder %s145_s7, %s4082_s13  ;;  %p4087_p8 = scmp.lt.s32.totalorder %s145_s7, %s145_s7 }
  0x62   :  { %p4088_p9 = scmp.lt.s32.totalorder %s4086_s29, %s4082_s13 }
  0x64   :  { %p4089_p10 = por %p4088_p9, %p4087_p8 }
  0x66   :  { %p4090_p11 = pnand %p4089_p10, %p4083_p7 }
  0x68   :  { %4093 = shalt.err (!%p4090_p11)
}
  0x69   :  { %147 = dma.hbm_to_vmem [thread:$0]  %s5184_s16, 16, %s145_s7, [#allocation18]  }
  0x6a   :  { %s5206_s27 = sld [smem:[#allocation30_spill]] }
  0x70   :  { %s4094_s25 = scalar_lea.hbm %s5206_s27, 16 }
  0x71   :  { %p4095_p12 = scmp.ne.s32.totalorder %s5206_s27, %s4094_s25  ;;  %p4098_p13 = scmp.lt.u32.totalorder %s4094_s25, %s5206_s27 }
  0x73   :  { %p4100_p0 = pnand %p4098_p13, %p4095_p12 }
  0x75   :  { %4103 = shalt.err (!%p4100_p0)
}
  0x76   :  { %s4104_s3 = scalar_lea.vmem %s45_s26, 16  ;;  %s4108_s4 = scalar_lea.vmem %s45_s26, 32 }
  0x77   :  { %p4105_p1 = scmp.ne.s32.totalorder %s45_s26, %s4104_s3  ;;  %p4109_p2 = scmp.lt.s32.totalorder %s45_s26, %s45_s26 }
  0x78   :  { %p4110_p3 = scmp.lt.s32.totalorder %s4108_s4, %s4104_s3 }
  0x7a   :  { %p4111_p4 = por %p4110_p3, %p4109_p2 }
  0x7c   :  { %p4112_p5 = pnand %p4111_p4, %p4105_p1 }
  0x7e   :  { %4115 = shalt.err (!%p4112_p5)
}
  0x7f   :  { %47 = dma.hbm_to_vmem [thread:$0]  %s5206_s27, 16, %s45_s26, [#allocation3]  }
  0x80   :  { %s4268_s0 = smov [#allocation7]   ;;  %s4269_s13 = smov [#allocation10]  }
  0x81   :  { %s66_s5 = sshll.u32 %s4268_s0, 4  ;;  %s88_s29 = sshll.u32 %s4269_s13, 4  ;;  %s67_s5 = int_to_ptr.vmem [resolvable:$true] %s66_s5  ;;  %s89_s29 = int_to_ptr.vmem [resolvable:$true] %s88_s29 }
  0x82   :  { %s5207_s6 = sld [smem:[#allocation33_spill]] }
  0x88   :  { %s4116_s9 = scalar_lea.hbm %s5207_s6, 16 }
  0x89   :  { %p4117_p6 = scmp.ne.s32.totalorder %s5207_s6, %s4116_s9  ;;  %p4120_p7 = scmp.lt.u32.totalorder %s4116_s9, %s5207_s6 }
  0x8b   :  { %p4122_p8 = pnand %p4120_p7, %p4117_p6 }
  0x8d   :  { %4125 = shalt.err (!%p4122_p8)
}
  0x8e   :  { %s4126_s26 = scalar_lea.vmem %s67_s5, 16  ;;  %s4130_s27 = scalar_lea.vmem %s67_s5, 32 }
  0x8f   :  { %p4127_p9 = scmp.ne.s32.totalorder %s67_s5, %s4126_s26  ;;  %p4131_p10 = scmp.lt.s32.totalorder %s67_s5, %s67_s5 }
  0x90   :  { %p4132_p11 = scmp.lt.s32.totalorder %s4130_s27, %s4126_s26 }
  0x92   :  { %p4133_p12 = por %p4132_p11, %p4131_p10 }
  0x94   :  { %p4134_p13 = pnand %p4133_p12, %p4127_p9 }
  0x96   :  { %4137 = shalt.err (!%p4134_p13)
}
  0x97   :  { %69 = dma.hbm_to_vmem [thread:$0]  %s5207_s6, 16, %s67_s5, [#allocation6]  }
  0x98   :  { %s4138_s7 = scalar_lea.hbm %s5176_s8, 16 }
  0x99   :  { %p4139_p0 = scmp.ne.s32.totalorder %s5176_s8, %s4138_s7  ;;  %p4142_p1 = scmp.lt.u32.totalorder %s4138_s7, %s5176_s8 }
  0x9b   :  { %p4144_p2 = pnand %p4142_p1, %p4139_p0 }
  0x9d   :  { %4147 = shalt.err (!%p4144_p2)
}
  0x9e   :  { %s4148_s9 = scalar_lea.vmem %s89_s29, 16  ;;  %s4152_s25 = scalar_lea.vmem %s89_s29, 32 }
  0x9f   :  { %p4149_p3 = scmp.ne.s32.totalorder %s89_s29, %s4148_s9  ;;  %p4153_p4 = scmp.lt.s32.totalorder %s89_s29, %s89_s29 }
  0xa0   :  { %p4154_p5 = scmp.lt.s32.totalorder %s4152_s25, %s4148_s9 }
  0xa2   :  { %p4155_p6 = por %p4154_p5, %p4153_p4 }
  0xa4   :  { %p4156_p7 = pnand %p4155_p6, %p4149_p3 }
  0xa6   :  { %4159 = shalt.err (!%p4156_p7)
}
  0xa7   :  { %91 = dma.hbm_to_vmem [thread:$0]  %s5176_s8, 16, %s89_s29, [#allocation9]  }
  0xa8   :  { %s4270_s30 = smov [#allocation13]   ;;  %s4271_s23 = smov [#allocation16]  }
  0xa9   :  { %s110_s28 = sshll.u32 %s4270_s30, 4  ;;  %s134_s26 = sshll.u32 %s4271_s23, 4  ;;  %s111_s28 = int_to_ptr.vmem [resolvable:$true] %s110_s28  ;;  %s135_s26 = int_to_ptr.vmem [resolvable:$true] %s134_s26 }
  0xaa   :  { %s4160_s3 = scalar_lea.hbm %s5179_s11, 16 }
  0xab   :  { %p4161_p8 = scmp.ne.s32.totalorder %s5179_s11, %s4160_s3  ;;  %p4164_p9 = scmp.lt.u32.totalorder %s4160_s3, %s5179_s11 }
  0xad   :  { %p4166_p10 = pnand %p4164_p9, %p4161_p8 }
  0xaf   :  { %4169 = shalt.err (!%p4166_p10)
}
  0xb0   :  { %s4170_s8 = scalar_lea.vmem %s111_s28, 16  ;;  %s4174_s29 = scalar_lea.vmem %s111_s28, 32 }
  0xb1   :  { %p4171_p11 = scmp.ne.s32.totalorder %s111_s28, %s4170_s8  ;;  %p4175_p12 = scmp.lt.s32.totalorder %s111_s28, %s111_s28 }
  0xb2   :  { %p4176_p13 = scmp.lt.s32.totalorder %s4174_s29, %s4170_s8 }
  0xb4   :  { %p4177_p0 = por %p4176_p13, %p4175_p12 }
  0xb6   :  { %p4178_p1 = pnand %p4177_p0, %p4171_p11 }
  0xb8   :  { %4181 = shalt.err (!%p4178_p1)
}
  0xb9   :  { %113 = dma.hbm_to_vmem [thread:$0]  %s5179_s11, 16, %s111_s28, [#allocation12]  }
  0xba   :  { %s4182_s25 = scalar_lea.hbm %s5183_s15, 16 }
  0xbb   :  { %p4183_p2 = scmp.ne.s32.totalorder %s5183_s15, %s4182_s25  ;;  %p4186_p3 = scmp.lt.u32.totalorder %s4182_s25, %s5183_s15 }
  0xbd   :  { %p4188_p4 = pnand %p4186_p3, %p4183_p2 }
  0xbf   :  { %4191 = shalt.err (!%p4188_p4)
}
  0xc0   :  { %s4192_s27 = scalar_lea.vmem %s135_s26, 16  ;;  %s4196_s2 = scalar_lea.vmem %s135_s26, 32 }
  0xc1   :  { %p4193_p5 = scmp.ne.s32.totalorder %s135_s26, %s4192_s27  ;;  %p4197_p6 = scmp.lt.s32.totalorder %s135_s26, %s135_s26 }
  0xc2   :  { %p4198_p7 = scmp.lt.s32.totalorder %s4196_s2, %s4192_s27 }
  0xc4   :  { %p4199_p8 = por %p4198_p7, %p4197_p6 }
  0xc6   :  { %p4200_p9 = pnand %p4199_p8, %p4193_p5 }
  0xc8   :  { %4203 = shalt.err (!%p4200_p9)
}
  0xc9   :  { %137 = dma.hbm_to_vmem [thread:$0]  %s5183_s15, 16, %s135_s26, [#allocation15]  }
  0xca   :  { %s4272_s3 = smov [#allocation19]   ;;  %s4204_s0 = scalar_lea.hbm %s5185_s17, 16 }
  0xcb   :  { %s154_s4 = sshll.u32 %s4272_s3, 4  ;;  %p4205_p10 = scmp.ne.s32.totalorder %s5185_s17, %s4204_s0  ;;  %s155_s4 = int_to_ptr.vmem [resolvable:$true] %s154_s4 }
  0xcc   :  { %p4208_p11 = scmp.lt.u32.totalorder %s4204_s0, %s5185_s17 }
  0xce   :  { %p4210_p12 = pnand %p4208_p11, %p4205_p10 }
  0xd0   :  { %4213 = shalt.err (!%p4210_p12)
}
  0xd1   :  { %s4214_s24 = scalar_lea.vmem %s155_s4, 16  ;;  %s4218_s15 = scalar_lea.vmem %s155_s4, 32 }
  0xd2   :  { %p4215_p13 = scmp.ne.s32.totalorder %s155_s4, %s4214_s24  ;;  %p4219_p0 = scmp.lt.s32.totalorder %s155_s4, %s155_s4 }
  0xd3   :  { %p4220_p1 = scmp.lt.s32.totalorder %s4218_s15, %s4214_s24 }
  0xd5   :  { %p4221_p2 = por %p4220_p1, %p4219_p0 }
  0xd7   :  { %p4222_p3 = pnand %p4221_p2, %p4215_p13 }
  0xd9   :  { %4225 = shalt.err (!%p4222_p3)
}
  0xda   :  { %157 = dma.hbm_to_vmem [thread:$0]  %s5185_s17, 16, %s155_s4, [#allocation18]  }
  0xdb   :  { %4248 = dma.done.wait [#allocation3], 16  }
  0xdc   :  { %4249 = vsyncadd [#allocation3], 4294967280 }
  0xdd   :  { %4250 = dma.done.wait [#allocation6], 32  }
  0xde   :  { %4251 = vsyncadd [#allocation6], 4294967264 }
  0xdf   :  { %4252 = dma.done.wait [#allocation9], 32  }
  0xe0   :  { %4253 = vsyncadd [#allocation9], 4294967264 }
  0xe1   :  { %4254 = dma.done.wait [#allocation12], 32  }
  0xe2   :  { %4255 = vsyncadd [#allocation12], 4294967264 }
  0xe3   :  { %4256 = dma.done.wait [#allocation15], 32  }
  0xe4   :  { %4257 = vsyncadd [#allocation15], 4294967264 }
  0xe5   :  { %4258 = dma.done.wait [#allocation18], 32  }
  0xe6   :  { %4259 = vsyncadd [#allocation18], 4294967264  ;;  %vm209_vm0 = vcmask 261120   ;;  %s5208_s6 = sld [smem:[#allocation28_spill]]  ;;  %s5209_s2 = sld [smem:[#allocation32_spill]]  ;;  %v4273_v15 = vmov 0.0   ;;  %v204_v44 = vlaneseq }
  0xe7   :  { %3520 = vmatprep.subr.bf16.mxu1 %v4273_v15  ;;  %3546 = vmatprep.subr.bf16.mxu0 %v4273_v15  ;;  %vm4274_vm1 = vmmov 0   ;;  %v3322_v25 = vld [vmem:[#allocation2] ss:$0 sm:$0xff]  ;;  %v3323_v29 = vld [vmem:[#allocation5] ss:$0 sm:$0xff]  ;;  %s4275_s3 = smov 96  }
  0xe8   :  { %3524 = vmatprep.mubr.msk.bf16.mxu1 %vm4274_vm1, %v4273_v15  ;;  %3548 = vmatprep.mubr.msk.bf16.mxu0 %vm4274_vm1, %v4273_v15  ;;  %v3324_v34 = vld [vmem:[#allocation7] ss:$0 sm:$0xff]  ;;  %s4276_s4 = smov 88   ;;  %vm331_vm2 = vcmask 64512   ;;  %v205_v45 = vshrl.u32 %v204_v44, 7  ;;  %v207_v46 = vand.u32 127, %v204_v44 }
  0xe9   :  { %s4277_s16 = smov 64   ;;  %s4278_s7 = smov 120   ;;  %vm396_vm4 = vcmask 1043456  }
  0xea   :  { %vm4581_vm3 = vcmp.ge.s32.totalorder %v205_v45, %v207_v46  ;;  %s4279_s0 = smov 56   ;;  %s4280_s8 = smov 112  }
  0xeb   :  { %s4281_s29 = smov 80   ;;  %s5212_s24 = sld [smem:[#allocation34_spill]] }
  0xec   :  { %v4539_v0 = vld [vmem:[%s5208_s6] sm:$0xff]  ;;  %v201_v1 = vld [vmem:[%s5208_s6 + $0x8] sm:$0xff]  ;;  %s4282_s9 = smov 72   ;;  %s4283_s25 = smov 104  }
  0xed   :  { %v210_v2 = vsel %vm209_vm0, %v4539_v0, 0.0  ;;  %v213_v3 = vsel %vm209_vm0, %v201_v1, 0.0  ;;  %v3887_v14 = vld [vmem:[%s5209_s2] sm:$0xff]   ;;  %v3888_v16 = vld [vmem:[%s5209_s2 + $0x8] sm:$0xff]   ;;  %s4284_s5 = smov 48   ;;  %s4285_s23 = smov 40  }
  0xee   :  { %211 = vadd.xlane.f32.xlu0 %v210_v2  ;;  %3521 = vmatpush3.bf16.msra.mxu1 %v3887_v14 }
  0xef   :  { %3522 = vmatprep.subr.bf16.mxu1 %v4273_v15 }
  0xf2   :  { %214 = vadd.xlane.f32.xlu0 %v213_v3  ;;  %3523 = vmatpush3.bf16.msra.mxu1 %v3888_v16 }
  0xf3   :  { %3528 = vmatprep.subr.bf16.mxu1 %v4273_v15 }
 0x17b   :  { %v212_v4 = vpop.xlane.xlu0 %211 }
 0x17c   :  { %v217_v5 = vmul.f32 0.03125, %v212_v4 }
 0x17e   :  { %v219_v6 = vsub.f32 %v4539_v0, %v217_v5 }
 0x17f   :  { %v215_v7 = vpop.xlane.xlu0 %214 }
 0x180   :  { %v218_v8 = vmul.f32 0.03125, %v215_v7  ;;  %v221_v9 = vmul.f32 %v219_v6, %v219_v6 }
 0x182   :  { %v220_v10 = vsub.f32 %v201_v1, %v218_v8  ;;  %v223_v11 = vsel %vm209_vm0, %v221_v9, 0.0 }
 0x183   :  { %224 = vadd.xlane.f32.xlu1 %v223_v11 }
 0x184   :  { %v222_v12 = vmul.f32 %v220_v10, %v220_v10 }
 0x186   :  { %v226_v13 = vsel %vm209_vm0, %v222_v12, 0.0 }
 0x187   :  { %227 = vadd.xlane.f32.xlu1 %v226_v13 }
 0x210   :  { %v225_v17 = vpop.xlane.xlu1 %224 }
 0x211   :  { %v229_v18 = vmul.f32 0.03125, %v225_v17 }
 0x213   :  { %v231_v19 = vadd.f32 1e-05, %v229_v18 }
 0x214   :  { %v228_v20 = vpop.xlane.xlu1 %227 }
 0x215   :  { %3903 = vrsqrt.f32 %v231_v19  ;;  %v230_v21 = vmul.f32 0.03125, %v228_v20 }
 0x217   :  { %v232_v22 = vadd.f32 1e-05, %v230_v21 }
 0x219   :  { %3905 = vrsqrt.f32 %v232_v22 }
 0x21f   :  { %v3904_v23 = vpop.eup %3903 }
 0x220   :  { %v235_v24 = vmul.f32 %v3904_v23, %v219_v6  ;;  %v324_v23 = vld [vmem:[%s5212_s24 + $0x4] sm:$0xf] }
 0x222   :  { %v244_v28 = vmul.f32 %v3322_v25, %v235_v24  ;;  %v4619_v24 = vsel %vm396_vm4, %v324_v23, 0 }
 0x223   :  { %v3906_v26 = vpop.eup %3905 }
 0x224   :  { %v236_v27 = vmul.f32 %v3906_v26, %v220_v10  ;;  %v253_v31 = vadd.f32 %v3323_v29, %v244_v28 }
 0x226   :  { %v245_v30 = vmul.f32 %v3322_v25, %v236_v27  ;;  %v323_v27 = vld [vmem:[%s5212_s24] sm:$0xf] }
 0x228   :  { %v254_v32 = vadd.f32 %v3323_v29, %v245_v30  ;;  %v4627_v30 = vsel %vm396_vm4, %v323_v27, 0 }
 0x22a   :  { %v255_v33 = vpack.c.bf16 %v254_v32, %v253_v31 }
 0x22c   :  { %3525 = vmatmul.mubr.msk.bf16.vlgmr.msra.gmra.mrb[0].mxu1 %vm209_vm0, %v255_v33 }
 0x22d   :  { %3530 = vmatprep.mubr.msk.bf16.mxu1 %vm4274_vm1, %v4273_v15 }
 0x2ff   :  { %v316_v35 = vpop.f32.mrb[0].mxu1 }
 0x300   :  { %v317_v36 = vadd.f32 %v3324_v34, %v316_v35  ;;  %v3526_v37 = vpop.f32.mrb[1].mxu1 }
 0x301   :  { %v319_v38 = vpop.f32.mrb[2].mxu1 }
 0x302   :  { %v4567_v39 = vpack.c.bf16 %v317_v36, %v317_v36  ;;  %v4569_v40 = vadd.f32 %v3324_v34, %v319_v38  ;;  %v3527_v41 = vpop.f32.mrb[3].mxu1 }
 0x304   :  { %329 = vrot.lane.b32.xlu0 %v4567_v39, %s4275_s3  ;;  %v4685_v23 = vpack.c.bf16 %v4569_v40, %v4569_v40 }
 0x308   :  { %443 = vrot.lane.b32.xlu0 %v4567_v39, %s4276_s4 }
 0x376   :  { %v330_v42 = vpop.permute.xlu0 %329 }
 0x377   :  { %v336_v43 = vsel %vm331_vm2, %v330_v42, 0 }
 0x378   :  { %3529 = vmatpush3.bf16.xpose.msra.mxu1 %v336_v43 }
 0x379   :  { %3534 = vmatprep.subr.bf16.mxu1 %v4273_v15 }
 0x37a   :  { %v444_v1 = vpop.permute.xlu0 %443 }
 0x37b   :  { %v449_v3 = vsel %vm331_vm2, %v444_v1, 0 }
 0x37f   :  { %3531 = vmatmul.mubr.msk.bf16.vlgmr.msra.gmra.mrb[4].mxu1 %vm331_vm2, %v4567_v39 }
 0x380   :  { %3536 = vmatprep.mubr.msk.bf16.mxu1 %vm4274_vm1, %v4273_v15 }
 0x452   :  { %v372_v48 = vpop.f32.mrb[4].mxu1 }
 0x453   :  { %v378_v49 = vsel %vm4581_vm3, %v372_v48, -1e+09  ;;  %v3532_v50 = vpop.f32.mrb[5].mxu1 }
 0x454   :  { %v375_v51 = vpop.f32.mrb[6].mxu1  ;;  %v379_v52 = vsel %vm331_vm2, %v378_v49, -inf }
 0x455   :  { %380 = vmax.xlane.f32.xlu1 %v379_v52  ;;  %v3533_v53 = vpop.f32.mrb[7].mxu1 }
 0x4e2   :  { %v381_v54 = vpop.xlane.xlu1 %380 }
 0x4e3   :  { %v382_v55 = vsub.f32 %v378_v49, %v381_v54 }
 0x4e5   :  { %v383_v56 = vmul.f32 1.442695, %v382_v55 }
 0x4e7   :  { %3907 = vpow2.f32 %v383_v56 }
 0x4f1   :  { %v3908_v57 = vpop.eup %3907 }
 0x4f2   :  { %v385_v58 = vsel %vm331_vm2, %v3908_v57, 0.0 }
 0x4f3   :  { %386 = vadd.xlane.f32.xlu1 %v385_v58 }
 0x504   :  { %391 = vrot.lane.b32.xlu1 %v4567_v39, %s4277_s16 }
 0x508   :  { %441 = vrot.lane.b32.xlu1 %v4567_v39, %s4278_s7 }
 0x580   :  { %v387_v59 = vpop.xlane.xlu1 %386 }
 0x581   :  { %3909 = vrcp.f32 %v387_v59 }
 0x584   :  { %v392_v60 = vpop.permute.xlu1 %391 }
 0x585   :  { %v398_v61 = vsel %vm396_vm4, %v392_v60, 0 }
 0x586   :  { %3535 = vmatpush3.bf16.msra.mxu1 %v398_v61 }
 0x587   :  { %3540 = vmatprep.subr.bf16.mxu1 %v4273_v15 }
 0x588   :  { %v442_v4 = vpop.permute.xlu1 %441 }
 0x58b   :  { %v3910_v62 = vpop.eup %3909 }
 0x58c   :  { %v389_v63 = vmul.f32 %v3910_v62, %v3908_v57 }
 0x58e   :  { %v390_v2 = vpack.c.bf16 %v389_v63, %v389_v63 }
 0x590   :  { %3537 = vmatmul.mubr.msk.bf16.vlgmr.msra.gmra.mrb[8].mxu1 %vm331_vm2, %v390_v2 }
 0x591   :  { %3541 = vmatpush3.bf16.xpose.msra.mxu1 %v449_v3  ;;  %3542 = vmatprep.mubr.msk.bf16.mxu1 %vm4274_vm1, %v4273_v15 }
 0x592   :  { %3552 = vmatprep.subr.bf16.mxu1 %v4273_v15 }
 0x598   :  { %3543 = vmatmul.mubr.msk.bf16.vlgmr.msra.gmra.mrb[12].mxu1 %vm331_vm2, %v442_v4 }
 0x599   :  { %3554 = vmatprep.mubr.msk.bf16.mxu1 %vm4274_vm1, %v4273_v15  ;;  %3553 = vmatpush3.bf16.msra.mxu1 %v4619_v24 }
 0x59a   :  { %3564 = vmatprep.subr.bf16.mxu1 %v4273_v15 }
 0x663   :  { %v434_v5 = vpop.f32.mrb[8].mxu1 }
 0x664   :  { %v3538_v6 = vpop.f32.mrb[9].mxu1  ;;  %v440_v31 = vpack.c.bf16 %v434_v5, %v434_v5 }
 0x665   :  { %v437_v7 = vpop.f32.mrb[10].mxu1 }
 0x666   :  { %v3539_v8 = vpop.f32.mrb[11].mxu1 }
 0x66b   :  { %v485_v9 = vpop.f32.mrb[12].mxu1 }
 0x66c   :  { %v491_v10 = vsel %vm4581_vm3, %v485_v9, -1e+09  ;;  %v3544_v11 = vpop.f32.mrb[13].mxu1  ;;  %v325_v9 = vld [vmem:[%s5212_s24 + $0x8] sm:$0xf] }
 0x66d   :  { %v488_v12 = vpop.f32.mrb[14].mxu1  ;;  %v492_v13 = vsel %vm331_vm2, %v491_v10, -inf }
 0x66e   :  { %493 = vmax.xlane.f32.xlu0 %v492_v13  ;;  %v3545_v14 = vpop.f32.mrb[15].mxu1 }
 0x684   :  { %504 = vrot.lane.b32.xlu0 %v4567_v39, %s4279_s0 }
 0x688   :  { %645 = vrot.lane.b32.xlu0 %v4567_v39, %s4280_s8 }
 0x6fb   :  { %v494_v16 = vpop.xlane.xlu0 %493 }
 0x6fc   :  { %v495_v17 = vsub.f32 %v491_v10, %v494_v16  ;;  %v4671_v10 = vsel %vm396_vm4, %v325_v9, 0 }
 0x6fe   :  { %v496_v18 = vmul.f32 1.442695, %v495_v17 }
 0x6ff   :  { %v505_v19 = vpop.permute.xlu0 %504 }
 0x700   :  { %3911 = vpow2.f32 %v496_v18  ;;  %v510_v20 = vsel %vm396_vm4, %v505_v19, 0 }
 0x701   :  { %3547 = vmatpush3.bf16.msra.mxu0 %v510_v20 }
 0x702   :  { %3558 = vmatprep.subr.bf16.mxu0 %v4273_v15 }
 0x703   :  { %v646_v43 = vpop.permute.xlu0 %645 }
 0x70a   :  { %v3912_v21 = vpop.eup %3911 }
 0x70b   :  { %v498_v22 = vsel %vm331_vm2, %v3912_v21, 0.0 }
 0x70c   :  { %499 = vadd.xlane.f32.xlu1 %v498_v22 }
 0x71d   :  { %647 = vrot.lane.b32.xlu1 %v4567_v39, %s4281_s29 }
 0x799   :  { %v500_v25 = vpop.xlane.xlu1 %499 }
 0x79a   :  { %3913 = vrcp.f32 %v500_v25 }
 0x79d   :  { %v648_v32 = vpop.permute.xlu1 %647 }
 0x79e   :  { %v653_v37 = vsel %vm331_vm2, %v648_v32, 0 }
 0x7a4   :  { %v3914_v26 = vpop.eup %3913 }
 0x7a5   :  { %v502_v28 = vmul.f32 %v3914_v26, %v3912_v21 }
 0x7a7   :  { %v503_v29 = vpack.c.bf16 %v502_v28, %v502_v28 }
 0x7a9   :  { %3549 = vmatmul.mubr.msk.bf16.vlgmr.msra.gmra.mrb[0].mxu0 %vm331_vm2, %v503_v29 }
 0x7aa   :  { %3559 = vmatpush3.bf16.msra.mxu0 %v4627_v30  ;;  %3560 = vmatprep.mubr.msk.bf16.mxu0 %vm4274_vm1, %v4273_v15 }
 0x7ab   :  { %3570 = vmatprep.subr.bf16.mxu0 %v4273_v15 }
 0x7b1   :  { %3561 = vmatmul.mubr.msk.bf16.vlgmr.msra.gmra.mrb[4].mxu0 %vm331_vm2, %v440_v31 }
 0x7b2   :  { %3572 = vmatprep.mubr.msk.bf16.mxu0 %vm4274_vm1, %v4273_v15 }
 0x87c   :  { %v546_v33 = vpop.f32.mrb[0].mxu0 }
 0x87d   :  { %v552_v34 = vpack.c.bf16 %v546_v33, %v546_v33  ;;  %v3550_v35 = vpop.f32.mrb[1].mxu0 }
 0x87e   :  { %v549_v36 = vpop.f32.mrb[2].mxu0 }
 0x87f   :  { %v3551_v38 = vpop.f32.mrb[3].mxu0  ;;  %3555 = vmatmul.mubr.msk.bf16.vlgmr.msra.gmra.mrb[16].mxu1 %vm331_vm2, %v552_v34 }
 0x880   :  { %3565 = vmatpush3.bf16.xpose.msra.mxu1 %v653_v37  ;;  %3566 = vmatprep.mubr.msk.bf16.mxu1 %vm4274_vm1, %v4273_v15 }
 0x881   :  { %3576 = vmatprep.subr.bf16.mxu1 %v4273_v15 }
 0x884   :  { %v639_v41 = vpop.f32.mrb[4].mxu0 }
 0x885   :  { %v3562_v42 = vpop.f32.mrb[5].mxu0 }
 0x886   :  { %v642_v44 = vpop.f32.mrb[6].mxu0 }
 0x887   :  { %v3563_v45 = vpop.f32.mrb[7].mxu0  ;;  %3567 = vmatmul.mubr.msk.bf16.vlgmr.msra.gmra.mrb[20].mxu1 %vm331_vm2, %v646_v43 }
 0x888   :  { %3578 = vmatprep.mubr.msk.bf16.mxu1 %vm4274_vm1, %v4273_v15  ;;  %3577 = vmatpush3.bf16.msra.mxu1 %v4671_v10 }
 0x889   :  { %3588 = vmatprep.subr.bf16.mxu1 %v4273_v15 }
 0x952   :  { %v593_v46 = vpop.f32.mrb[16].mxu1 }
 0x953   :  { %v4645_v48 = vadd.f32 %v639_v41, %v593_v46  ;;  %v3556_v49 = vpop.f32.mrb[17].mxu1 }
 0x954   :  { %v596_v50 = vpop.f32.mrb[18].mxu1 }
 0x955   :  { %v3557_v51 = vpop.f32.mrb[19].mxu1 }
 0x95a   :  { %v689_v52 = vpop.f32.mrb[20].mxu1 }
 0x95b   :  { %v695_v53 = vsel %vm4581_vm3, %v689_v52, -1e+09  ;;  %v3568_v54 = vpop.f32.mrb[21].mxu1 }
 0x95c   :  { %v692_v55 = vpop.f32.mrb[22].mxu1  ;;  %v696_v56 = vsel %vm331_vm2, %v695_v53, -inf }
 0x95d   :  { %697 = vmax.xlane.f32.xlu1 %v696_v56  ;;  %v3569_v57 = vpop.f32.mrb[23].mxu1 }
 0x96e   :  { %806 = vrot.lane.b32.xlu1 %v4567_v39, %s4282_s9 }
 0x972   :  { %804 = vrot.lane.b32.xlu1 %v4567_v39, %s4283_s25 }
 0x9ea   :  { %v698_v58 = vpop.xlane.xlu1 %697 }
 0x9eb   :  { %v699_v59 = vsub.f32 %v695_v53, %v698_v58 }
 0x9ed   :  { %v700_v60 = vmul.f32 1.442695, %v699_v59 }
 0x9ee   :  { %v807_v5 = vpop.permute.xlu1 %806 }
 0x9ef   :  { %3915 = vpow2.f32 %v700_v60  ;;  %v812_v7 = vsel %vm331_vm2, %v807_v5, 0 }
 0x9f2   :  { %v805_v8 = vpop.permute.xlu1 %804 }
 0x9f9   :  { %v3916_v61 = vpop.eup %3915 }
 0x9fa   :  { %v702_v62 = vsel %vm331_vm2, %v3916_v61, 0.0 }
 0x9fb   :  { %703 = vadd.xlane.f32.xlu0 %v702_v62 }
 0xa11   :  { %708 = vrot.lane.b32.xlu0 %v4567_v39, %s4284_s5 }
 0xa88   :  { %v704_v63 = vpop.xlane.xlu0 %703 }
 0xa89   :  { %3917 = vrcp.f32 %v704_v63 }
 0xa8c   :  { %v709_v1 = vpop.permute.xlu0 %708 }
 0xa8d   :  { %v714_v2 = vsel %vm396_vm4, %v709_v1, 0 }
 0xa8e   :  { %3571 = vmatpush3.bf16.msra.mxu0 %v714_v2 }
 0xa8f   :  { %3582 = vmatprep.subr.bf16.mxu0 %v4273_v15 }
 0xa93   :  { %v3918_v3 = vpop.eup %3917 }
 0xa94   :  { %v706_v4 = vmul.f32 %v3918_v3, %v3916_v61 }
 0xa96   :  { %v707_v6 = vpack.c.bf16 %v706_v4, %v706_v4 }
 0xa98   :  { %3573 = vmatmul.mubr.msk.bf16.vlgmr.msra.gmra.mrb[8].mxu0 %vm331_vm2, %v707_v6 }
 0xa99   :  { %3583 = vmatpush3.bf16.xpose.msra.mxu0 %v812_v7  ;;  %3584 = vmatprep.mubr.msk.bf16.mxu0 %vm4274_vm1, %v4273_v15 }
 0xa9a   :  { %3594 = vmatprep.subr.bf16.mxu0 %v4273_v15 }
 0xaa0   :  { %3585 = vmatmul.mubr.msk.bf16.vlgmr.msra.gmra.mrb[12].mxu0 %vm331_vm2, %v805_v8 }
 0xaa1   :  { %3596 = vmatprep.mubr.msk.bf16.mxu0 %vm4274_vm1, %v4273_v15 }
 0xb6b   :  { %v750_v11 = vpop.f32.mrb[8].mxu0 }
 0xb6c   :  { %v756_v12 = vpack.c.bf16 %v750_v11, %v750_v11  ;;  %v3574_v13 = vpop.f32.mrb[9].mxu0 }
 0xb6d   :  { %v753_v14 = vpop.f32.mrb[10].mxu0 }
 0xb6e   :  { %v3575_v16 = vpop.f32.mrb[11].mxu0  ;;  %3579 = vmatmul.mubr.msk.bf16.vlgmr.msra.gmra.mrb[24].mxu1 %vm331_vm2, %v756_v12 }
 0xb6f   :  { %3590 = vmatprep.mubr.msk.bf16.mxu1 %vm4274_vm1, %v4273_v15 }
 0xb73   :  { %v848_v17 = vpop.f32.mrb[12].mxu0 }
 0xb74   :  { %v854_v18 = vsel %vm4581_vm3, %v848_v17, -1e+09  ;;  %v3586_v19 = vpop.f32.mrb[13].mxu0 }
 0xb75   :  { %v851_v20 = vpop.f32.mrb[14].mxu0  ;;  %v855_v21 = vsel %vm331_vm2, %v854_v18, -inf }
 0xb76   :  { %856 = vmax.xlane.f32.xlu0 %v855_v21  ;;  %v3587_v22 = vpop.f32.mrb[15].mxu0 }
 0xb8c   :  { %867 = vrot.lane.b32.xlu0 %v4567_v39, %s4285_s23 }
 0xb90   :  { %1077 = vrot.lane.b32.xlu0 %v4685_v23, %s4276_s4 }
 0xc03   :  { %v857_v25 = vpop.xlane.xlu0 %856 }
 0xc04   :  { %v858_v26 = vsub.f32 %v854_v18, %v857_v25 }
 0xc06   :  { %v859_v27 = vmul.f32 1.442695, %v858_v26 }
 0xc07   :  { %v868_v28 = vpop.permute.xlu0 %867 }
 0xc08   :  { %3919 = vpow2.f32 %v859_v27  ;;  %v873_v29 = vsel %vm396_vm4, %v868_v28, 0 }
 0xc09   :  { %3589 = vmatpush3.bf16.msra.mxu1 %v873_v29 }
 0xc0a   :  { %3600 = vmatprep.subr.bf16.mxu1 %v4273_v15 }
 0xc0b   :  { %v1078_v44 = vpop.permute.xlu0 %1077 }
 0xc0c   :  { %v1083_v45 = vsel %vm331_vm2, %v1078_v44, 0 }
 0xc12   :  { %v3920_v31 = vpop.eup %3919 }
 0xc13   :  { %v861_v39 = vsel %vm331_vm2, %v3920_v31, 0.0 }
 0xc14   :  { %862 = vadd.xlane.f32.xlu1 %v861_v39 }
 0xc25   :  { %965 = vrot.lane.b32.xlu1 %v4685_v23, %s4275_s3 }
 0xc29   :  { %1075 = vrot.lane.b32.xlu1 %v4685_v23, %s4278_s7 }
 0xc41   :  { %v797_v40 = vpop.f32.mrb[24].mxu1 }
 0xc42   :  { %v4697_v32 = vadd.f32 %v797_v40, %v4645_v48  ;;  %v3580_v33 = vpop.f32.mrb[25].mxu1  ;;  %v326_v48 = vld [vmem:[%s5212_s24 + $0xc] sm:$0xf] }
 0xc43   :  { %v800_v34 = vpop.f32.mrb[26].mxu1  ;;  %v4719_v49 = vsel %vm396_vm4, %v326_v48, 0 }
 0xc44   :  { %v3581_v35 = vpop.f32.mrb[27].mxu1  ;;  %3595 = vmatpush3.bf16.msra.mxu0 %v4719_v49 }
 0xc45   :  { %3606 = vmatprep.subr.bf16.mxu0 %v4273_v15 }
 0xca1   :  { %v863_v36 = vpop.xlane.xlu1 %862 }
 0xca2   :  { %3921 = vrcp.f32 %v863_v36 }
 0xca5   :  { %v966_v41 = vpop.permute.xlu1 %965 }
 0xca6   :  { %v971_v43 = vsel %vm331_vm2, %v966_v41, 0 }
 0xca9   :  { %v1076_v46 = vpop.permute.xlu1 %1075 }
 0xcac   :  { %v3922_v37 = vpop.eup %3921 }
 0xcad   :  { %v865_v38 = vmul.f32 %v3922_v37, %v3920_v31 }
 0xcaf   :  { %v866_v42 = vpack.c.bf16 %v865_v38, %v865_v38 }
 0xcb1   :  { %3591 = vmatmul.mubr.msk.bf16.vlgmr.msra.gmra.mrb[28].mxu1 %vm331_vm2, %v866_v42 }
 0xcb2   :  { %3601 = vmatpush3.bf16.xpose.msra.mxu1 %v971_v43  ;;  %3602 = vmatprep.mubr.msk.bf16.mxu1 %vm4274_vm1, %v4273_v15 }
 0xcb3   :  { %3612 = vmatprep.subr.bf16.mxu1 %v4273_v15 }
 0xcb9   :  { %3603 = vmatmul.mubr.msk.bf16.vlgmr.msra.gmra.mrb[32].mxu1 %vm331_vm2, %v4685_v23 }
 0xcba   :  { %3613 = vmatpush3.bf16.xpose.msra.mxu1 %v1083_v45  ;;  %3614 = vmatprep.mubr.msk.bf16.mxu1 %vm4274_vm1, %v4273_v15 }
 0xcbb   :  { %3624 = vmatprep.subr.bf16.mxu1 %v4273_v15 }
 0xcc1   :  { %3615 = vmatmul.mubr.msk.bf16.vlgmr.msra.gmra.mrb[36].mxu1 %vm331_vm2, %v1076_v46 }
 0xcc2   :  { %3625 = vmatpush3.bf16.msra.mxu1 %v4619_v24  ;;  %3626 = vmatprep.mubr.msk.bf16.mxu1 %vm4274_vm1, %v4273_v15 }
 0xcc3   :  { %3636 = vmatprep.subr.bf16.mxu1 %v4273_v15 }
 0xd84   :  { %v909_v50 = vpop.f32.mrb[28].mxu1 }
 0xd85   :  { %v915_v51 = vpack.c.bf16 %v909_v50, %v909_v50  ;;  %v3592_v52 = vpop.f32.mrb[29].mxu1 }
 0xd86   :  { %v912_v24 = vpop.f32.mrb[30].mxu1 }
 0xd87   :  { %v3593_v53 = vpop.f32.mrb[31].mxu1  ;;  %3597 = vmatmul.mubr.msk.bf16.vlgmr.msra.gmra.mrb[16].mxu0 %vm331_vm2, %v915_v51 }
 0xd88   :  { %3608 = vmatprep.mubr.msk.bf16.mxu0 %vm4274_vm1, %v4273_v15 }
 0xd8c   :  { %v1007_v54 = vpop.f32.mrb[32].mxu1 }
 0xd8d   :  { %v1013_v55 = vsel %vm4581_vm3, %v1007_v54, -1e+09  ;;  %v3604_v56 = vpop.f32.mrb[33].mxu1 }
 0xd8e   :  { %v1010_v57 = vpop.f32.mrb[34].mxu1  ;;  %v1014_v58 = vsel %vm331_vm2, %v1013_v55, -inf }
 0xd8f   :  { %1015 = vmax.xlane.f32.xlu0 %v1014_v58  ;;  %v3605_v59 = vpop.f32.mrb[35].mxu1 }
 0xd94   :  { %v1119_v60 = vpop.f32.mrb[36].mxu1 }
 0xd95   :  { %v1125_v61 = vsel %vm4581_vm3, %v1119_v60, -1e+09  ;;  %v3616_v62 = vpop.f32.mrb[37].mxu1 }
 0xd96   :  { %v1122_v63 = vpop.f32.mrb[38].mxu1  ;;  %v1126_v1 = vsel %vm331_vm2, %v1125_v61, -inf }
 0xd97   :  { %1127 = vmax.xlane.f32.xlu1 %v1126_v1  ;;  %v3617_v2 = vpop.f32.mrb[39].mxu1 }
 0xda8   :  { %1138 = vrot.lane.b32.xlu1 %v4685_v23, %s4279_s0 }
 0xdac   :  { %1275 = vrot.lane.b32.xlu1 %v4685_v23, %s4281_s29 }
 0xdb0   :  { %1273 = vrot.lane.b32.xlu1 %v4685_v23, %s4280_s8 }
 0xe1c   :  { %v1016_v3 = vpop.xlane.xlu0 %1015 }
 0xe1d   :  { %v1017_v4 = vsub.f32 %v1013_v55, %v1016_v3 }
 0xe1f   :  { %v1018_v5 = vmul.f32 1.442695, %v1017_v4 }
 0xe21   :  { %3923 = vpow2.f32 %v1018_v5 }
 0xe24   :  { %v1128_v6 = vpop.xlane.xlu1 %1127 }
 0xe25   :  { %v1129_v7 = vsub.f32 %v1125_v61, %v1128_v6 }
 0xe27   :  { %v1130_v8 = vmul.f32 1.442695, %v1129_v7 }
 0xe28   :  { %v1139_v28 = vpop.permute.xlu1 %1138 }
 0xe29   :  { %3925 = vpow2.f32 %v1130_v8  ;;  %v1144_v31 = vsel %vm396_vm4, %v1139_v28, 0 }
 0xe2b   :  { %v3924_v9 = vpop.eup %3923 }
 0xe2c   :  { %v1020_v11 = vsel %vm331_vm2, %v3924_v9, 0.0  ;;  %v1276_v38 = vpop.permute.xlu1 %1275 }
 0xe2d   :  { %1021 = vadd.xlane.f32.xlu0 %v1020_v11  ;;  %v1281_v44 = vsel %vm331_vm2, %v1276_v38, 0 }
 0xe30   :  { %v1274_v46 = vpop.permute.xlu1 %1273 }
 0xe33   :  { %v3926_v12 = vpop.eup %3925 }
 0xe34   :  { %v1132_v13 = vsel %vm331_vm2, %v3926_v12, 0.0 }
 0xe35   :  { %1133 = vadd.xlane.f32.xlu0 %v1132_v13 }
 0xe4b   :  { %1026 = vrot.lane.b32.xlu0 %v4685_v23, %s4277_s16  ;;  %s5213_s16 = sld [smem:[#allocation29_spill]] }
 0xe5a   :  { %v956_v14 = vpop.f32.mrb[16].mxu0 }
 0xe5b   :  { %v4743_v16 = vadd.f32 %v956_v14, %v4697_v32  ;;  %v3598_v17 = vpop.f32.mrb[17].mxu0 }
 0xe5c   :  { %v959_v18 = vpop.f32.mrb[18].mxu0 }
 0xe5d   :  { %v3599_v19 = vpop.f32.mrb[19].mxu0  ;;  %v1585_v47 = vadd.f32 %v4743_v16, %v4539_v0 }
 0xeba   :  { %v1022_v20 = vpop.xlane.xlu0 %1021 }
 0xebb   :  { %3927 = vrcp.f32 %v1022_v20 }
 0xec2   :  { %v1134_v21 = vpop.xlane.xlu0 %1133 }
 0xec3   :  { %3929 = vrcp.f32 %v1134_v21 }
 0xec5   :  { %v3928_v22 = vpop.eup %3927 }
 0xec6   :  { %v1024_v25 = vmul.f32 %v3928_v22, %v3924_v9  ;;  %v1027_v26 = vpop.permute.xlu0 %1026 }
 0xec7   :  { %v1032_v27 = vsel %vm396_vm4, %v1027_v26, 0 }
 0xec8   :  { %3607 = vmatpush3.bf16.msra.mxu0 %v1032_v27  ;;  %v1025_v29 = vpack.c.bf16 %v1024_v25, %v1024_v25  ;;  %v202_v25 = vld [vmem:[%s5213_s16] sm:$0xff] }
 0xec9   :  { %3618 = vmatprep.subr.bf16.mxu0 %v4273_v15 }
 0xecb   :  { %3609 = vmatmul.mubr.msk.bf16.vlgmr.msra.gmra.mrb[20].mxu0 %vm331_vm2, %v1025_v29  ;;  %v1596_v29 = vsel %vm209_vm0, %v202_v25, 0.0 }
 0xecc   :  { %3619 = vmatpush3.bf16.msra.mxu0 %v1144_v31  ;;  %3620 = vmatprep.mubr.msk.bf16.mxu0 %vm4274_vm1, %v4273_v15  ;;  %v203_v31 = vld [vmem:[%s5213_s16 + $0x8] sm:$0xff] }
 0xecd   :  { %v3930_v39 = vpop.eup %3929  ;;  %3630 = vmatprep.subr.bf16.mxu0 %v4273_v15 }
 0xece   :  { %v1136_v40 = vmul.f32 %v3930_v39, %v3926_v12  ;;  %v3352_v39 = vld [vmem:[#allocation8] ss:$0 sm:$0xff] }
 0xed0   :  { %v1137_v32 = vpack.c.bf16 %v1136_v40, %v1136_v40  ;;  %v1599_v40 = vsel %vm209_vm0, %v203_v31, 0.0 }
 0xed3   :  { %3621 = vmatmul.mubr.msk.bf16.vlgmr.msra.gmra.mrb[24].mxu0 %vm331_vm2, %v1137_v32  ;;  %v4810_v32 = vadd.f32 %v3352_v39, %v1585_v47 }
 0xed4   :  { %3631 = vmatpush3.bf16.msra.mxu0 %v4627_v30  ;;  %3632 = vmatprep.mubr.msk.bf16.mxu0 %vm4274_vm1, %v4273_v15 }
 0xed5   :  { %3642 = vmatprep.subr.bf16.mxu0 %v4273_v15 }
 0xf9e   :  { %v1068_v33 = vpop.f32.mrb[20].mxu0 }
 0xf9f   :  { %v1074_v34 = vpack.c.bf16 %v1068_v33, %v1068_v33  ;;  %v3610_v35 = vpop.f32.mrb[21].mxu0  ;;  %v1640_v33 = vsel %vm209_vm0, %v4810_v32, 0.0 }
 0xfa0   :  { %v1071_v36 = vpop.f32.mrb[22].mxu0 }
 0xfa1   :  { %v3611_v37 = vpop.f32.mrb[23].mxu0  ;;  %3633 = vmatmul.mubr.msk.bf16.vlgmr.msra.gmra.mrb[28].mxu0 %vm331_vm2, %v1074_v34 }
 0xfa2   :  { %3644 = vmatprep.mubr.msk.bf16.mxu0 %vm4274_vm1, %v4273_v15 }
 0xfa6   :  { %v1180_v41 = vpop.f32.mrb[24].mxu0 }
 0xfa7   :  { %v1186_v42 = vpack.c.bf16 %v1180_v41, %v1180_v41  ;;  %v3622_v43 = vpop.f32.mrb[25].mxu0 }
 0xfa8   :  { %v1183_v30 = vpop.f32.mrb[26].mxu0 }
 0xfa9   :  { %v3623_v45 = vpop.f32.mrb[27].mxu0  ;;  %3627 = vmatmul.mubr.msk.bf16.vlgmr.msra.gmra.mrb[40].mxu1 %vm331_vm2, %v1186_v42 }
 0xfaa   :  { %3637 = vmatpush3.bf16.xpose.msra.mxu1 %v1281_v44  ;;  %3638 = vmatprep.mubr.msk.bf16.mxu1 %vm4274_vm1, %v4273_v15 }
 0xfab   :  { %3648 = vmatprep.subr.bf16.mxu1 %v4273_v15 }
 0xfb1   :  { %3639 = vmatmul.mubr.msk.bf16.vlgmr.msra.gmra.mrb[44].mxu1 %vm331_vm2, %v1274_v46 }
 0xfb2   :  { %3649 = vmatpush3.bf16.msra.mxu1 %v4671_v10  ;;  %3650 = vmatprep.mubr.msk.bf16.mxu1 %vm4274_vm1, %v4273_v15 }
 0xfb3   :  { %3660 = vmatprep.subr.bf16.mxu1 %v4273_v15 }
0x1074   :  { %v1267_v48 = vpop.f32.mrb[28].mxu0 }
0x1075   :  { %v3634_v50 = vpop.f32.mrb[29].mxu0 }
0x1076   :  { %v1270_v51 = vpop.f32.mrb[30].mxu0 }
0x1077   :  { %v3635_v52 = vpop.f32.mrb[31].mxu0 }
0x107c   :  { %v1224_v24 = vpop.f32.mrb[40].mxu1 }
0x107d   :  { %v4770_v53 = vadd.f32 %v1267_v48, %v1224_v24  ;;  %v3628_v54 = vpop.f32.mrb[41].mxu1 }
0x107e   :  { %v1227_v55 = vpop.f32.mrb[42].mxu1 }
0x107f   :  { %v3629_v56 = vpop.f32.mrb[43].mxu1 }
0x1084   :  { %v1317_v57 = vpop.f32.mrb[44].mxu1 }
0x1085   :  { %v1323_v58 = vsel %vm4581_vm3, %v1317_v57, -1e+09  ;;  %v3640_v10 = vpop.f32.mrb[45].mxu1 }
0x1086   :  { %v1320_v59 = vpop.f32.mrb[46].mxu1  ;;  %v1324_v60 = vsel %vm331_vm2, %v1323_v58, -inf }
0x1087   :  { %1325 = vmax.xlane.f32.xlu0 %v1324_v60  ;;  %v3641_v61 = vpop.f32.mrb[47].mxu1 }
0x109d   :  { %1336 = vrot.lane.b32.xlu0 %v4685_v23, %s4284_s5 }
0x10a1   :  { %1429 = vrot.lane.b32.xlu0 %v4685_v23, %s4283_s25 }
0x1114   :  { %v1326_v62 = vpop.xlane.xlu0 %1325 }
0x1115   :  { %v1327_v63 = vsub.f32 %v1323_v58, %v1326_v62 }
0x1117   :  { %v1328_v1 = vmul.f32 1.442695, %v1327_v63 }
0x1118   :  { %v1337_v2 = vpop.permute.xlu0 %1336 }
0x1119   :  { %3931 = vpow2.f32 %v1328_v1  ;;  %v1342_v3 = vsel %vm396_vm4, %v1337_v2, 0 }
0x111a   :  { %3643 = vmatpush3.bf16.msra.mxu0 %v1342_v3 }
0x111b   :  { %3654 = vmatprep.subr.bf16.mxu0 %v4273_v15 }
0x111c   :  { %v1430_v13 = vpop.permute.xlu0 %1429 }
0x1123   :  { %v3932_v4 = vpop.eup %3931 }
0x1124   :  { %v1330_v5 = vsel %vm331_vm2, %v3932_v4, 0.0 }
0x1125   :  { %1331 = vadd.xlane.f32.xlu1 %v1330_v5 }
0x1136   :  { %1431 = vrot.lane.b32.xlu1 %v4685_v23, %s4282_s9 }
0x11b2   :  { %v1332_v6 = vpop.xlane.xlu1 %1331 }
0x11b3   :  { %3933 = vrcp.f32 %v1332_v6 }
0x11b6   :  { %v1432_v9 = vpop.permute.xlu1 %1431 }
0x11b7   :  { %v1437_v12 = vsel %vm331_vm2, %v1432_v9, 0 }
0x11bd   :  { %v3934_v7 = vpop.eup %3933 }
0x11be   :  { %v1334_v8 = vmul.f32 %v3934_v7, %v3932_v4  ;;  %v3983_v4 = vld [vmem:[%s5208_s6 + $0x8] sm:$0xff] }
0x11c0   :  { %v1335_v11 = vpack.c.bf16 %v1334_v8, %v1334_v8 }
0x11c2   :  { %3645 = vmatmul.mubr.msk.bf16.vlgmr.msra.gmra.mrb[32].mxu0 %vm331_vm2, %v1335_v11 }
0x11c3   :  { %3655 = vmatpush3.bf16.xpose.msra.mxu0 %v1437_v12  ;;  %3656 = vmatprep.mubr.msk.bf16.mxu0 %vm4274_vm1, %v4273_v15 }
0x11c4   :  { %3666 = vmatprep.subr.bf16.mxu0 %v4273_v15 }
0x11ca   :  { %3657 = vmatmul.mubr.msk.bf16.vlgmr.msra.gmra.mrb[36].mxu0 %vm331_vm2, %v1430_v13 }
0x11cb   :  { %3667 = vmatpush3.bf16.msra.mxu0 %v4719_v49  ;;  %3668 = vmatprep.mubr.msk.bf16.mxu0 %vm4274_vm1, %v4273_v15 }
0x11cc   :  { %3680 = vmatprep.subr.bf16.mxu0 %v4273_v15 }
0x1295   :  { %v1378_v14 = vpop.f32.mrb[32].mxu0 }
0x1296   :  { %v1384_v17 = vpack.c.bf16 %v1378_v14, %v1378_v14  ;;  %v3646_v18 = vpop.f32.mrb[33].mxu0 }
0x1297   :  { %v1381_v19 = vpop.f32.mrb[34].mxu0  ;;  %v3890_v18 = vld [vmem:[%s5178_s10 + $0x8] sm:$0xff]  }
0x1298   :  { %v3647_v20 = vpop.f32.mrb[35].mxu0  ;;  %3651 = vmatmul.mubr.msk.bf16.vlgmr.msra.gmra.mrb[48].mxu1 %vm331_vm2, %v1384_v17  ;;  %v3889_v17 = vld [vmem:[%s5178_s10] sm:$0xff]  }
0x1299   :  { %3662 = vmatprep.mubr.msk.bf16.mxu1 %vm4274_vm1, %v4273_v15 }
0x129d   :  { %v1473_v21 = vpop.f32.mrb[36].mxu0 }
0x129e   :  { %v1479_v22 = vsel %vm4581_vm3, %v1473_v21, -1e+09  ;;  %v3658_v49 = vpop.f32.mrb[37].mxu0 }
0x129f   :  { %v1476_v26 = vpop.f32.mrb[38].mxu0  ;;  %v1480_v27 = vsel %vm331_vm2, %v1479_v22, -inf }
0x12a0   :  { %1481 = vmax.xlane.f32.xlu1 %v1480_v27  ;;  %v3659_v28 = vpop.f32.mrb[39].mxu0 }
0x12a4   :  { %1597 = vadd.xlane.f32.xlu1 %v1596_v29 }
0x12a8   :  { %1600 = vadd.xlane.f32.xlu1 %v1599_v40  ;;  %v3353_v40 = vld [vmem:[#allocation10] ss:$0 sm:$0xff] }
0x12ac   :  { %1641 = vadd.xlane.f32.xlu1 %v1640_v33 }
0x132d   :  { %v1482_v34 = vpop.xlane.xlu1 %1481 }
0x132e   :  { %v1483_v35 = vsub.f32 %v1479_v22, %v1482_v34 }
0x1330   :  { %v1484_v36 = vmul.f32 1.442695, %v1483_v35 }
0x1332   :  { %3935 = vpow2.f32 %v1484_v36  ;;  %v3354_v36 = vld [vmem:[#allocation11] ss:$0 sm:$0xff] }
0x133c   :  { %v3936_v37 = vpop.eup %3935 }
0x133d   :  { %v1486_v38 = vsel %vm331_vm2, %v3936_v37, 0.0 }
0x133e   :  { %1487 = vadd.xlane.f32.xlu0 %v1486_v38 }
0x1354   :  { %1492 = vrot.lane.b32.xlu0 %v4685_v23, %s4285_s23  ;;  %v1598_v23 = vpop.xlane.xlu1 %1597 }
0x1355   :  { %v1602_v59 = vmul.f32 0.03125, %v1598_v23 }
0x1357   :  { %v1604_v62 = vsub.f32 %v202_v25, %v1602_v59 }
0x1358   :  { %v1601_v51 = vpop.xlane.xlu1 %1600 }
0x1359   :  { %v1603_v52 = vmul.f32 0.03125, %v1601_v51  ;;  %v1606_v8 = vmul.f32 %v1604_v62, %v1604_v62 }
0x135b   :  { %v1605_v24 = vsub.f32 %v203_v31, %v1603_v52  ;;  %v1608_v12 = vsel %vm209_vm0, %v1606_v8, 0.0 }
0x135c   :  { %v1642_v60 = vpop.xlane.xlu1 %1641 }
0x135d   :  { %v1646_v3 = vmul.f32 0.03125, %v1642_v60 }
0x135f   :  { %v1648_v9 = vsub.f32 %v4810_v32, %v1646_v3 }
0x1361   :  { %v1650_v13 = vmul.f32 %v1648_v9, %v1648_v9 }
0x1363   :  { %v1652_v14 = vsel %vm209_vm0, %v1650_v13, 0.0 }
0x136b   :  { %v1422_v0 = vpop.f32.mrb[48].mxu1 }
0x136c   :  { %v1428_v16 = vadd.f32 %v1422_v0, %v4770_v53  ;;  %v3652_v41 = vpop.f32.mrb[49].mxu1  ;;  %v1607_v53 = vmul.f32 %v1605_v24, %v1605_v24 }
0x136d   :  { %v1425_v42 = vpop.f32.mrb[50].mxu1  ;;  %v3891_v41 = vld [vmem:[%s5180_s12] sm:$0xff]  }
0x136e   :  { %v3653_v43 = vpop.f32.mrb[51].mxu1  ;;  %v1611_v54 = vsel %vm209_vm0, %v1607_v53, 0.0  ;;  %v3892_v42 = vld [vmem:[%s5180_s12 + $0x8] sm:$0xff]  }
0x1373   :  { %1612 = vadd.xlane.f32.xlu0 %v1611_v54 }
0x13cb   :  { %v1488_v30 = vpop.xlane.xlu0 %1487 }
0x13cc   :  { %3937 = vrcp.f32 %v1488_v30 }
0x13cf   :  { %v1493_v44 = vpop.permute.xlu0 %1492 }
0x13d0   :  { %v1498_v45 = vsel %vm396_vm4, %v1493_v44, 0 }
0x13d1   :  { %3661 = vmatpush3.bf16.msra.mxu1 %v1498_v45 }
0x13d2   :  { %3672 = vmatprep.subr.bf16.mxu1 %v4273_v15 }
0x13d6   :  { %v3938_v46 = vpop.eup %3937 }
0x13d7   :  { %v1490_v48 = vmul.f32 %v3938_v46, %v3936_v37 }
0x13d9   :  { %v1491_v50 = vpack.c.bf16 %v1490_v48, %v1490_v48 }
0x13db   :  { %3663 = vmatmul.mubr.msk.bf16.vlgmr.msra.gmra.mrb[52].mxu1 %vm331_vm2, %v1491_v50 }
0x13dc   :  { %3676 = vmatprep.mubr.msk.bf16.mxu1 %vm4274_vm1, %v4273_v15  ;;  %3673 = vmatpush3.bf16.msra.mxu1 %v3889_v17 }
0x13dd   :  { %3674 = vmatprep.subr.bf16.mxu1 %v4273_v15 }
0x13e0   :  { %3675 = vmatpush3.bf16.msra.mxu1 %v3890_v18 }
0x13e1   :  { %3688 = vmatprep.subr.bf16.mxu1 %v4273_v15 }
0x1400   :  { %v1613_v19 = vpop.xlane.xlu0 %1612 }
0x1401   :  { %v1615_v20 = vmul.f32 0.03125, %v1613_v19 }
0x1403   :  { %v1617_v21 = vadd.f32 1e-05, %v1615_v20 }
0x1405   :  { %3939 = vrsqrt.f32 %v1617_v21 }
0x140f   :  { %v3940_v47 = vpop.eup %3939 }
0x14ae   :  { %v1534_v55 = vpop.f32.mrb[52].mxu1 }
0x14af   :  { %v1540_v56 = vpack.c.bf16 %v1534_v55, %v1534_v55  ;;  %v3664_v57 = vpop.f32.mrb[53].mxu1 }
0x14b0   :  { %v1537_v58 = vpop.f32.mrb[54].mxu1  ;;  %v3355_v57 = vld [vmem:[#allocation13] ss:$0 sm:$0xff] }
0x14b1   :  { %v3665_v10 = vpop.f32.mrb[55].mxu1  ;;  %3669 = vmatmul.mubr.msk.bf16.vlgmr.msra.gmra.mrb[40].mxu0 %vm331_vm2, %v1540_v56 }
0x14b2   :  { %3684 = vmatprep.mubr.msk.bf16.mxu0 %vm4274_vm1, %v4273_v15  ;;  %3681 = vmatpush3.bf16.msra.mxu0 %v3891_v41 }
0x14b3   :  { %3682 = vmatprep.subr.bf16.mxu0 %v4273_v15 }
0x14b6   :  { %3683 = vmatpush3.bf16.msra.mxu0 %v3892_v42 }
0x14b7   :  { %3694 = vmatprep.subr.bf16.mxu0 %v4273_v15 }
0x1584   :  { %v1578_v61 = vpop.f32.mrb[40].mxu0 }
0x1585   :  { %v1584_v63 = vadd.f32 %v1578_v61, %v1428_v16  ;;  %v3670_v1 = vpop.f32.mrb[41].mxu0 }
0x1586   :  { %v1581_v2 = vpop.f32.mrb[42].mxu0 }
0x1587   :  { %v1586_v5 = vadd.f32 %v3983_v4, %v1584_v63  ;;  %v3671_v6 = vpop.f32.mrb[43].mxu0  ;;  %v3359_v2 = vld [vmem:[#allocation14] ss:$0 sm:$0xff] }
0x1589   :  { %v4830_v7 = vadd.f32 %v3352_v39, %v1586_v5  ;;  %v1621_v39 = vmul.f32 %v3940_v47, %v1605_v24 }
0x158b   :  { %v1643_v11 = vsel %vm209_vm0, %v4830_v7, 0.0  ;;  %v1630_v34 = vmul.f32 %v3353_v40, %v1621_v39 }
0x158c   :  { %1644 = vadd.xlane.f32.xlu1 %v1643_v11 }
0x158d   :  { %v1639_v0 = vadd.f32 %v3354_v36, %v1630_v34 }
0x1590   :  { %1609 = vadd.xlane.f32.xlu1 %v1608_v12 }
0x1594   :  { %1653 = vadd.xlane.f32.xlu1 %v1652_v14 }
0x1619   :  { %v1645_v22 = vpop.xlane.xlu1 %1644 }
0x161a   :  { %v1647_v49 = vmul.f32 0.03125, %v1645_v22 }
0x161c   :  { %v1649_v25 = vsub.f32 %v4830_v7, %v1647_v49 }
0x161d   :  { %v1610_v26 = vpop.xlane.xlu1 %1609 }
0x161e   :  { %v1614_v27 = vmul.f32 0.03125, %v1610_v26  ;;  %v1651_v28 = vmul.f32 %v1649_v25, %v1649_v25 }
0x1620   :  { %v1616_v29 = vadd.f32 1e-05, %v1614_v27  ;;  %v1655_v31 = vsel %vm209_vm0, %v1651_v28, 0.0 }
0x1621   :  { %1656 = vadd.xlane.f32.xlu1 %v1655_v31  ;;  %v1654_v43 = vpop.xlane.xlu1 %1653 }
0x1622   :  { %3941 = vrsqrt.f32 %v1616_v29  ;;  %v1658_v30 = vmul.f32 0.03125, %v1654_v43  ;;  %v1807_v43 = vld [vmem:[%s5182_s14 + $0x4] sm:$0xf] }
0x1624   :  { %v1660_v44 = vadd.f32 1e-05, %v1658_v30  ;;  %v4906_v30 = vsel %vm396_vm4, %v1807_v43, 0 }
0x1626   :  { %3943 = vrsqrt.f32 %v1660_v44 }
0x162c   :  { %v3942_v33 = vpop.eup %3941 }
0x162d   :  { %v1620_v35 = vmul.f32 %v3942_v33, %v1604_v62 }
0x162f   :  { %v1629_v37 = vmul.f32 %v3353_v40, %v1620_v35 }
0x1630   :  { %v3944_v50 = vpop.eup %3943 }
0x1631   :  { %v1638_v38 = vadd.f32 %v3354_v36, %v1629_v37  ;;  %v1664_v23 = vmul.f32 %v3944_v50, %v1648_v9  ;;  %v1806_v50 = vld [vmem:[%s5182_s14] sm:$0xf] }
0x1633   :  { %v1670_v16 = vpack.c.bf16 %v1639_v0, %v1638_v38  ;;  %v1666_v52 = vmul.f32 %v3353_v40, %v1664_v23 }
0x1635   :  { %3677 = vmatmul.mubr.msk.bf16.vlgmr.msra.gmra.mrb[56].mxu1 %vm209_vm0, %v1670_v16  ;;  %v1668_v54 = vadd.f32 %v3354_v36, %v1666_v52  ;;  %v4916_v52 = vsel %vm396_vm4, %v1806_v50, 0 }
0x1636   :  { %3690 = vmatprep.mubr.msk.bf16.mxu1 %vm4274_vm1, %v4273_v15 }
0x16ae   :  { %v1657_v45 = vpop.xlane.xlu1 %1656 }
0x16af   :  { %v1659_v46 = vmul.f32 0.03125, %v1657_v45 }
0x16b1   :  { %v1661_v48 = vadd.f32 1e-05, %v1659_v46 }
0x16b3   :  { %3945 = vrsqrt.f32 %v1661_v48 }
0x16bd   :  { %v3946_v51 = vpop.eup %3945 }
0x16be   :  { %v1665_v24 = vmul.f32 %v3946_v51, %v1649_v25 }
0x16c0   :  { %v1667_v53 = vmul.f32 %v3353_v40, %v1665_v24 }
0x16c2   :  { %v1669_v55 = vadd.f32 %v3354_v36, %v1667_v53 }
0x16c4   :  { %v1738_v56 = vpack.c.bf16 %v1669_v55, %v1668_v54 }
0x16c6   :  { %3685 = vmatmul.mubr.msk.bf16.vlgmr.msra.gmra.mrb[44].mxu0 %vm209_vm0, %v1738_v56 }
0x16c7   :  { %3696 = vmatprep.mubr.msk.bf16.mxu0 %vm4274_vm1, %v4273_v15 }
0x1708   :  { %v1731_v58 = vpop.f32.mrb[56].mxu1 }
0x1709   :  { %v1732_v10 = vadd.f32 %v3355_v57, %v1731_v58  ;;  %v3678_v59 = vpop.f32.mrb[57].mxu1 }
0x170a   :  { %v1734_v60 = vpop.f32.mrb[58].mxu1 }
0x170b   :  { %v4861_v61 = vpack.c.bf16 %v1732_v10, %v1732_v10  ;;  %v4863_v62 = vadd.f32 %v3355_v57, %v1734_v60  ;;  %v3679_v63 = vpop.f32.mrb[59].mxu1 }
0x170d   :  { %1923 = vrot.lane.b32.xlu1 %v4861_v61, %s4278_s7  ;;  %v1816_v1 = vsel %vm331_vm2, %v4861_v61, 0 }
0x170e   :  { %3689 = vmatpush3.bf16.xpose.msra.mxu1 %v1816_v1 }
0x170f   :  { %3700 = vmatprep.subr.bf16.mxu1 %v4273_v15 }
0x177f   :  { %v1924_v6 = vpop.permute.xlu1 %1923 }
0x1780   :  { %v1929_v13 = vsel %vm331_vm2, %v1924_v6, 0 }
0x1799   :  { %v1799_v3 = vpop.f32.mrb[44].mxu0 }
0x179a   :  { %v1800_v4 = vadd.f32 %v3359_v2, %v1799_v3  ;;  %v3686_v5 = vpop.f32.mrb[45].mxu0 }
0x179b   :  { %v1802_v8 = vpop.f32.mrb[46].mxu0 }
0x179c   :  { %v4870_v9 = vpack.c.bf16 %v1800_v4, %v1800_v4  ;;  %v4872_v11 = vadd.f32 %v3359_v2, %v1802_v8  ;;  %v3687_v12 = vpop.f32.mrb[47].mxu0 }
0x179e   :  { %1921 = vrot.lane.b32.xlu1 %v4870_v9, %s4278_s7  ;;  %3691 = vmatmul.mubr.msk.bf16.vlgmr.msra.gmra.mrb[60].mxu1 %vm331_vm2, %v4870_v9  ;;  %v4970_v50 = vpack.c.bf16 %v4872_v11, %v4872_v11  ;;  %v4979_v11 = vpack.c.bf16 %v4863_v62, %v4863_v62 }
0x179f   :  { %3701 = vmatpush3.bf16.xpose.msra.mxu1 %v1929_v13  ;;  %3702 = vmatprep.mubr.msk.bf16.mxu1 %vm4274_vm1, %v4273_v15 }
0x17a0   :  { %3712 = vmatprep.subr.bf16.mxu1 %v4273_v15  ;;  %v2446_v62 = vsel %vm331_vm2, %v4979_v11, 0 }
0x1810   :  { %v1922_v14 = vpop.permute.xlu1 %1921 }
0x1811   :  { %3703 = vmatmul.mubr.msk.bf16.vlgmr.msra.gmra.mrb[64].mxu1 %vm331_vm2, %v1922_v14 }
0x1812   :  { %3714 = vmatprep.mubr.msk.bf16.mxu1 %vm4274_vm1, %v4273_v15  ;;  %3713 = vmatpush3.bf16.msra.mxu1 %v4906_v30 }
0x1813   :  { %3724 = vmatprep.subr.bf16.mxu1 %v4273_v15 }
0x1871   :  { %v1852_v17 = vpop.f32.mrb[60].mxu1 }
0x1872   :  { %v3692_v18 = vpop.f32.mrb[61].mxu1  ;;  %v1858_v19 = vsel %vm331_vm2, %v1852_v17, -inf }
0x1873   :  { %1859 = vmax.xlane.f32.xlu0 %v1858_v19  ;;  %v1855_v20 = vpop.f32.mrb[62].mxu1 }
0x1874   :  { %v3693_v21 = vpop.f32.mrb[63].mxu1 }
0x1889   :  { %1871 = vrot.lane.b32.xlu0 %v4861_v61, %s4275_s3 }
0x18e4   :  { %v1965_v22 = vpop.f32.mrb[64].mxu1 }
0x18e5   :  { %v3704_v49 = vpop.f32.mrb[65].mxu1  ;;  %v1971_v25 = vsel %vm331_vm2, %v1965_v22, -inf }
0x18e6   :  { %1972 = vmax.xlane.f32.xlu1 %v1971_v25  ;;  %v1968_v26 = vpop.f32.mrb[66].mxu1 }
0x18e7   :  { %v3705_v27 = vpop.f32.mrb[67].mxu1 }
0x18f7   :  { %2126 = vrot.lane.b32.xlu1 %v4861_v61, %s4280_s8 }
0x1900   :  { %v1860_v28 = vpop.xlane.xlu0 %1859 }
0x1901   :  { %v1861_v29 = vsub.f32 %v1852_v17, %v1860_v28 }
0x1903   :  { %v1862_v31 = vmul.f32 1.442695, %v1861_v29 }
0x1904   :  { %v1872_v47 = vpop.permute.xlu0 %1871 }
0x1905   :  { %3947 = vpow2.f32 %v1862_v31  ;;  %v1877_v39 = vsel %vm396_vm4, %v1872_v47, 0 }
0x1906   :  { %3695 = vmatpush3.bf16.msra.mxu0 %v1877_v39 }
0x1907   :  { %3706 = vmatprep.subr.bf16.mxu0 %v4273_v15 }
0x190f   :  { %v3948_v40 = vpop.eup %3947 }
0x1910   :  { %v1864_v33 = vsel %vm331_vm2, %v3948_v40, 0.0 }
0x1911   :  { %1865 = vadd.xlane.f32.xlu0 %v1864_v33 }
0x1973   :  { %v1973_v34 = vpop.xlane.xlu1 %1972 }
0x1974   :  { %v1974_v35 = vsub.f32 %v1965_v22, %v1973_v34 }
0x1976   :  { %v1975_v36 = vmul.f32 1.442695, %v1974_v35 }
0x1977   :  { %v2127_v57 = vpop.permute.xlu1 %2126 }
0x1978   :  { %3949 = vpow2.f32 %v1975_v36  ;;  %v2132_v63 = vsel %vm331_vm2, %v2127_v57, 0  ;;  %v1808_v36 = vld [vmem:[%s5182_s14 + $0x8] sm:$0xf] }
0x1982   :  { %v3950_v37 = vpop.eup %3949 }
0x1983   :  { %v1977_v38 = vsel %vm331_vm2, %v3950_v37, 0.0 }
0x1984   :  { %1978 = vadd.xlane.f32.xlu0 %v1977_v38 }
0x199a   :  { %1983 = vrot.lane.b32.xlu0 %v4861_v61, %s4276_s4 }
0x199e   :  { %v1866_v0 = vpop.xlane.xlu0 %1865  ;;  %2124 = vrot.lane.b32.xlu0 %v4870_v9, %s4280_s8 }
0x199f   :  { %3951 = vrcp.f32 %v1866_v0 }
0x19a9   :  { %v3952_v16 = vpop.eup %3951 }
0x19aa   :  { %v1868_v41 = vmul.f32 %v3952_v16, %v3948_v40 }
0x19ac   :  { %v1869_v42 = vpack.c.bf16 %v1868_v41, %v1868_v41 }
0x19ae   :  { %3697 = vmatmul.mubr.msk.bf16.vlgmr.msra.gmra.mrb[48].mxu0 %vm331_vm2, %v1869_v42 }
0x19af   :  { %3708 = vmatprep.mubr.msk.bf16.mxu0 %vm4274_vm1, %v4273_v15 }
0x1a11   :  { %v1979_v44 = vpop.xlane.xlu0 %1978 }
0x1a12   :  { %3953 = vrcp.f32 %v1979_v44 }
0x1a15   :  { %v1984_v45 = vpop.permute.xlu0 %1983 }
0x1a16   :  { %v1989_v46 = vsel %vm396_vm4, %v1984_v45, 0 }
0x1a17   :  { %3707 = vmatpush3.bf16.msra.mxu0 %v1989_v46 }
0x1a18   :  { %3718 = vmatprep.subr.bf16.mxu0 %v4273_v15 }
0x1a19   :  { %v2125_v2 = vpop.permute.xlu0 %2124 }
0x1a1c   :  { %v3954_v48 = vpop.eup %3953 }
0x1a1d   :  { %v1981_v23 = vmul.f32 %v3954_v48, %v3950_v37  ;;  %v4958_v37 = vsel %vm396_vm4, %v1808_v36, 0 }
0x1a1f   :  { %v1982_v51 = vpack.c.bf16 %v1981_v23, %v1981_v23 }
0x1a21   :  { %3709 = vmatmul.mubr.msk.bf16.vlgmr.msra.gmra.mrb[52].mxu0 %vm331_vm2, %v1982_v51 }
0x1a22   :  { %3719 = vmatpush3.bf16.msra.mxu0 %v4916_v52  ;;  %3720 = vmatprep.mubr.msk.bf16.mxu0 %vm4274_vm1, %v4273_v15 }
0x1a23   :  { %3730 = vmatprep.subr.bf16.mxu0 %v4273_v15 }
0x1a81   :  { %v1913_v24 = vpop.f32.mrb[48].mxu0 }
0x1a82   :  { %v1919_v53 = vpack.c.bf16 %v1913_v24, %v1913_v24  ;;  %v3698_v54 = vpop.f32.mrb[49].mxu0 }
0x1a83   :  { %v1916_v55 = vpop.f32.mrb[50].mxu0 }
0x1a84   :  { %v3699_v56 = vpop.f32.mrb[51].mxu0  ;;  %3721 = vmatmul.mubr.msk.bf16.vlgmr.msra.gmra.mrb[56].mxu0 %vm331_vm2, %v1919_v53 }
0x1a85   :  { %3732 = vmatprep.mubr.msk.bf16.mxu0 %vm4274_vm1, %v4273_v15 }
0x1af4   :  { %v2025_v58 = vpop.f32.mrb[52].mxu0 }
0x1af5   :  { %v2031_v10 = vpack.c.bf16 %v2025_v58, %v2025_v58  ;;  %v3710_v59 = vpop.f32.mrb[53].mxu0 }
0x1af6   :  { %v2028_v60 = vpop.f32.mrb[54].mxu0 }
0x1af7   :  { %v3711_v1 = vpop.f32.mrb[55].mxu0  ;;  %3715 = vmatmul.mubr.msk.bf16.vlgmr.msra.gmra.mrb[68].mxu1 %vm331_vm2, %v2031_v10 }
0x1af8   :  { %3725 = vmatpush3.bf16.xpose.msra.mxu1 %v2132_v63  ;;  %3726 = vmatprep.mubr.msk.bf16.mxu1 %vm4274_vm1, %v4273_v15 }
0x1af9   :  { %3736 = vmatprep.subr.bf16.mxu1 %v4273_v15 }
0x1aff   :  { %3727 = vmatmul.mubr.msk.bf16.vlgmr.msra.gmra.mrb[72].mxu1 %vm331_vm2, %v2125_v2 }
0x1b00   :  { %3738 = vmatprep.mubr.msk.bf16.mxu1 %vm4274_vm1, %v4273_v15  ;;  %3737 = vmatpush3.bf16.msra.mxu1 %v4958_v37 }
0x1b01   :  { %3748 = vmatprep.subr.bf16.mxu1 %v4273_v15 }
0x1b57   :  { %v2118_v3 = vpop.f32.mrb[56].mxu0 }
0x1b58   :  { %v3722_v4 = vpop.f32.mrb[57].mxu0 }
0x1b59   :  { %v2121_v5 = vpop.f32.mrb[58].mxu0 }
0x1b5a   :  { %v3723_v6 = vpop.f32.mrb[59].mxu0 }
0x1b5b   :  { %v1809_v6 = vld [vmem:[%s5182_s14 + $0xc] sm:$0xf] }
0x1bca   :  { %v2072_v8 = vpop.f32.mrb[68].mxu1 }
0x1bcb   :  { %v4934_v12 = vadd.f32 %v2118_v3, %v2072_v8  ;;  %v3716_v13 = vpop.f32.mrb[69].mxu1  ;;  %v5007_v8 = vsel %vm396_vm4, %v1809_v6, 0 }
0x1bcc   :  { %v2075_v14 = vpop.f32.mrb[70].mxu1 }
0x1bcd   :  { %v3717_v17 = vpop.f32.mrb[71].mxu1 }
0x1bd2   :  { %v2168_v18 = vpop.f32.mrb[72].mxu1 }
0x1bd3   :  { %v3728_v19 = vpop.f32.mrb[73].mxu1  ;;  %v2174_v20 = vsel %vm331_vm2, %v2168_v18, -inf }
0x1bd4   :  { %2175 = vmax.xlane.f32.xlu0 %v2174_v20  ;;  %v2171_v21 = vpop.f32.mrb[74].mxu1 }
0x1bd5   :  { %v3729_v22 = vpop.f32.mrb[75].mxu1 }
0x1bea   :  { %2186 = vrot.lane.b32.xlu0 %v4861_v61, %s4281_s29 }
0x1bee   :  { %2282 = vrot.lane.b32.xlu0 %v4870_v9, %s4283_s25 }
0x1c61   :  { %v2176_v49 = vpop.xlane.xlu0 %2175 }
0x1c62   :  { %v2177_v25 = vsub.f32 %v2168_v18, %v2176_v49 }
0x1c64   :  { %v2178_v26 = vmul.f32 1.442695, %v2177_v25 }
0x1c65   :  { %v2187_v27 = vpop.permute.xlu0 %2186 }
0x1c66   :  { %3955 = vpow2.f32 %v2178_v26  ;;  %v2192_v28 = vsel %vm396_vm4, %v2187_v27, 0 }
0x1c67   :  { %3731 = vmatpush3.bf16.msra.mxu0 %v2192_v28 }
0x1c68   :  { %3742 = vmatprep.subr.bf16.mxu0 %v4273_v15 }
0x1c69   :  { %v2283_v35 = vpop.permute.xlu0 %2282 }
0x1c70   :  { %v3956_v29 = vpop.eup %3955 }
0x1c71   :  { %v2180_v31 = vsel %vm331_vm2, %v3956_v29, 0.0 }
0x1c72   :  { %2181 = vadd.xlane.f32.xlu1 %v2180_v31 }
0x1c83   :  { %2284 = vrot.lane.b32.xlu1 %v4861_v61, %s4283_s25 }
0x1cff   :  { %v2182_v47 = vpop.xlane.xlu1 %2181 }
0x1d00   :  { %3957 = vrcp.f32 %v2182_v47 }
0x1d03   :  { %v2285_v40 = vpop.permute.xlu1 %2284 }
0x1d04   :  { %v2290_v34 = vsel %vm331_vm2, %v2285_v40, 0 }
0x1d0a   :  { %v3958_v9 = vpop.eup %3957 }
0x1d0b   :  { %v2184_v39 = vmul.f32 %v3958_v9, %v3956_v29 }
0x1d0d   :  { %v2185_v33 = vpack.c.bf16 %v2184_v39, %v2184_v39 }
0x1d0f   :  { %3733 = vmatmul.mubr.msk.bf16.vlgmr.msra.gmra.mrb[60].mxu0 %vm331_vm2, %v2185_v33 }
0x1d10   :  { %3743 = vmatpush3.bf16.xpose.msra.mxu0 %v2290_v34  ;;  %3744 = vmatprep.mubr.msk.bf16.mxu0 %vm4274_vm1, %v4273_v15 }
0x1d11   :  { %3754 = vmatprep.subr.bf16.mxu0 %v4273_v15 }
0x1d17   :  { %3745 = vmatmul.mubr.msk.bf16.vlgmr.msra.gmra.mrb[64].mxu0 %vm331_vm2, %v2283_v35 }
0x1d18   :  { %3756 = vmatprep.mubr.msk.bf16.mxu0 %vm4274_vm1, %v4273_v15  ;;  %3755 = vmatpush3.bf16.msra.mxu0 %v5007_v8 }
0x1d19   :  { %3766 = vmatprep.subr.bf16.mxu0 %v4273_v15 }
0x1de2   :  { %v2228_v38 = vpop.f32.mrb[60].mxu0 }
0x1de3   :  { %v2234_v0 = vpack.c.bf16 %v2228_v38, %v2228_v38  ;;  %v3734_v16 = vpop.f32.mrb[61].mxu0 }
0x1de4   :  { %v2231_v41 = vpop.f32.mrb[62].mxu0 }
0x1de5   :  { %v3735_v42 = vpop.f32.mrb[63].mxu0  ;;  %3739 = vmatmul.mubr.msk.bf16.vlgmr.msra.gmra.mrb[76].mxu1 %vm331_vm2, %v2234_v0 }
0x1de6   :  { %3750 = vmatprep.mubr.msk.bf16.mxu1 %vm4274_vm1, %v4273_v15 }
0x1dea   :  { %v2326_v43 = vpop.f32.mrb[64].mxu0 }
0x1deb   :  { %v3746_v44 = vpop.f32.mrb[65].mxu0  ;;  %v2332_v45 = vsel %vm331_vm2, %v2326_v43, -inf }
0x1dec   :  { %2333 = vmax.xlane.f32.xlu0 %v2332_v45  ;;  %v2329_v46 = vpop.f32.mrb[66].mxu0 }
0x1ded   :  { %v3747_v48 = vpop.f32.mrb[67].mxu0 }
0x1e02   :  { %2344 = vrot.lane.b32.xlu0 %v4861_v61, %s4282_s9 }
0x1e06   :  { %2551 = vrot.lane.b32.xlu0 %v4970_v50, %s4278_s7 }
0x1e79   :  { %v2334_v23 = vpop.xlane.xlu0 %2333 }
0x1e7a   :  { %v2335_v51 = vsub.f32 %v2326_v43, %v2334_v23 }
0x1e7c   :  { %v2336_v24 = vmul.f32 1.442695, %v2335_v51 }
0x1e7d   :  { %v2345_v53 = vpop.permute.xlu0 %2344 }
0x1e7e   :  { %3959 = vpow2.f32 %v2336_v24  ;;  %v2350_v54 = vsel %vm396_vm4, %v2345_v53, 0 }
0x1e7f   :  { %3749 = vmatpush3.bf16.msra.mxu1 %v2350_v54 }
0x1e80   :  { %3760 = vmatprep.subr.bf16.mxu1 %v4273_v15 }
0x1e81   :  { %v2552_v5 = vpop.permute.xlu0 %2551 }
0x1e88   :  { %v3960_v55 = vpop.eup %3959 }
0x1e89   :  { %v2338_v61 = vsel %vm331_vm2, %v3960_v55, 0.0 }
0x1e8a   :  { %2339 = vadd.xlane.f32.xlu1 %v2338_v61 }
0x1e9b   :  { %2553 = vrot.lane.b32.xlu1 %v4979_v11, %s4278_s7 }
0x1eb8   :  { %v2275_v56 = vpop.f32.mrb[76].mxu1 }
0x1eb9   :  { %v4984_v57 = vadd.f32 %v2275_v56, %v4934_v12  ;;  %v3740_v58 = vpop.f32.mrb[77].mxu1 }
0x1eba   :  { %v2278_v10 = vpop.f32.mrb[78].mxu1 }
0x1ebb   :  { %v3741_v59 = vpop.f32.mrb[79].mxu1 }
0x1f17   :  { %v2340_v60 = vpop.xlane.xlu1 %2339 }
0x1f18   :  { %3961 = vrcp.f32 %v2340_v60 }
0x1f1b   :  { %v2554_v3 = vpop.permute.xlu1 %2553 }
0x1f1c   :  { %v2559_v4 = vsel %vm331_vm2, %v2554_v3, 0 }
0x1f22   :  { %v3962_v63 = vpop.eup %3961 }
0x1f23   :  { %v2342_v1 = vmul.f32 %v3962_v63, %v3960_v55 }
0x1f25   :  { %v2343_v2 = vpack.c.bf16 %v2342_v1, %v2342_v1 }
0x1f27   :  { %3751 = vmatmul.mubr.msk.bf16.vlgmr.msra.gmra.mrb[80].mxu1 %vm331_vm2, %v2343_v2 }
0x1f28   :  { %3761 = vmatpush3.bf16.xpose.msra.mxu1 %v2446_v62  ;;  %3762 = vmatprep.mubr.msk.bf16.mxu1 %vm4274_vm1, %v4273_v15 }
0x1f29   :  { %3772 = vmatprep.subr.bf16.mxu1 %v4273_v15 }
0x1f2f   :  { %3763 = vmatmul.mubr.msk.bf16.vlgmr.msra.gmra.mrb[84].mxu1 %vm331_vm2, %v4970_v50 }
0x1f30   :  { %3773 = vmatpush3.bf16.xpose.msra.mxu1 %v2559_v4  ;;  %3774 = vmatprep.mubr.msk.bf16.mxu1 %vm4274_vm1, %v4273_v15 }
0x1f31   :  { %3784 = vmatprep.subr.bf16.mxu1 %v4273_v15 }
0x1f37   :  { %3775 = vmatmul.mubr.msk.bf16.vlgmr.msra.gmra.mrb[88].mxu1 %vm331_vm2, %v2552_v5 }
0x1f38   :  { %3785 = vmatpush3.bf16.msra.mxu1 %v4906_v30  ;;  %3786 = vmatprep.mubr.msk.bf16.mxu1 %vm4274_vm1, %v4273_v15 }
0x1f39   :  { %3796 = vmatprep.subr.bf16.mxu1 %v4273_v15 }
0x1ffa   :  { %v2386_v12 = vpop.f32.mrb[80].mxu1 }
0x1ffb   :  { %v2392_v13 = vpack.c.bf16 %v2386_v12, %v2386_v12  ;;  %v3752_v14 = vpop.f32.mrb[81].mxu1 }
0x1ffc   :  { %v2389_v30 = vpop.f32.mrb[82].mxu1 }
0x1ffd   :  { %v3753_v17 = vpop.f32.mrb[83].mxu1  ;;  %3757 = vmatmul.mubr.msk.bf16.vlgmr.msra.gmra.mrb[68].mxu0 %vm331_vm2, %v2392_v13 }
0x1ffe   :  { %3768 = vmatprep.mubr.msk.bf16.mxu0 %vm4274_vm1, %v4273_v15 }
0x2002   :  { %v2482_v18 = vpop.f32.mrb[84].mxu1 }
0x2003   :  { %v3764_v19 = vpop.f32.mrb[85].mxu1  ;;  %v2488_v20 = vsel %vm331_vm2, %v2482_v18, -inf }
0x2004   :  { %2489 = vmax.xlane.f32.xlu0 %v2488_v20  ;;  %v2485_v21 = vpop.f32.mrb[86].mxu1 }
0x2005   :  { %v3765_v22 = vpop.f32.mrb[87].mxu1 }
0x200a   :  { %v2595_v49 = vpop.f32.mrb[88].mxu1 }
0x200b   :  { %v3776_v25 = vpop.f32.mrb[89].mxu1  ;;  %v2601_v26 = vsel %vm331_vm2, %v2595_v49, -inf }
0x200c   :  { %2602 = vmax.xlane.f32.xlu1 %v2601_v26  ;;  %v2598_v27 = vpop.f32.mrb[90].mxu1 }
0x200d   :  { %v3777_v28 = vpop.f32.mrb[91].mxu1 }
0x201d   :  { %2613 = vrot.lane.b32.xlu1 %v4979_v11, %s4276_s4 }
0x2021   :  { %2750 = vrot.lane.b32.xlu1 %v4979_v11, %s4280_s8 }
0x2025   :  { %2748 = vrot.lane.b32.xlu1 %v4970_v50, %s4280_s8 }
0x2091   :  { %v2490_v29 = vpop.xlane.xlu0 %2489 }
0x2092   :  { %v2491_v31 = vsub.f32 %v2482_v18, %v2490_v29 }
0x2094   :  { %v2492_v47 = vmul.f32 1.442695, %v2491_v31 }
0x2096   :  { %3963 = vpow2.f32 %v2492_v47 }
0x2099   :  { %v2603_v9 = vpop.xlane.xlu1 %2602 }
0x209a   :  { %v2604_v39 = vsub.f32 %v2595_v49, %v2603_v9 }
0x209c   :  { %v2605_v40 = vmul.f32 1.442695, %v2604_v39 }
0x209d   :  { %v2614_v51 = vpop.permute.xlu1 %2613 }
0x209e   :  { %3965 = vpow2.f32 %v2605_v40  ;;  %v2619_v53 = vsel %vm396_vm4, %v2614_v51, 0 }
0x20a0   :  { %v3964_v33 = vpop.eup %3963 }
0x20a1   :  { %v2494_v34 = vsel %vm331_vm2, %v3964_v33, 0.0  ;;  %v2751_v60 = vpop.permute.xlu1 %2750 }
0x20a2   :  { %2495 = vadd.xlane.f32.xlu0 %v2494_v34  ;;  %v2756_v62 = vsel %vm331_vm2, %v2751_v60, 0 }
0x20a5   :  { %v2749_v4 = vpop.permute.xlu1 %2748 }
0x20a8   :  { %v3966_v35 = vpop.eup %3965 }
0x20a9   :  { %v2607_v36 = vsel %vm331_vm2, %v3966_v35, 0.0 }
0x20aa   :  { %2608 = vadd.xlane.f32.xlu0 %v2607_v36 }
0x20c0   :  { %2501 = vrot.lane.b32.xlu0 %v4979_v11, %s4275_s3 }
0x20d0   :  { %v2433_v38 = vpop.f32.mrb[68].mxu0 }
0x20d1   :  { %v5027_v0 = vadd.f32 %v2433_v38, %v4984_v57  ;;  %v3758_v16 = vpop.f32.mrb[69].mxu0 }
0x20d2   :  { %v2436_v41 = vpop.f32.mrb[70].mxu0 }
0x20d3   :  { %v3759_v42 = vpop.f32.mrb[71].mxu0 }
0x212f   :  { %v2496_v43 = vpop.xlane.xlu0 %2495 }
0x2130   :  { %3967 = vrcp.f32 %v2496_v43  ;;  %v3058_v43 = vadd.f32 %v5027_v0, %v4810_v32 }
0x2137   :  { %v2609_v44 = vpop.xlane.xlu0 %2608 }
0x2138   :  { %3969 = vrcp.f32 %v2609_v44  ;;  %v3387_v44 = vld [vmem:[#allocation16] ss:$0 sm:$0xff] }
0x213a   :  { %v3968_v45 = vpop.eup %3967 }
0x213b   :  { %v2498_v46 = vmul.f32 %v3968_v45, %v3964_v33  ;;  %v2502_v48 = vpop.permute.xlu0 %2501  ;;  %v5081_v45 = vadd.f32 %v3387_v44, %v3058_v43 }
0x213c   :  { %v2507_v23 = vsel %vm396_vm4, %v2502_v48, 0 }
0x213d   :  { %3767 = vmatpush3.bf16.msra.mxu0 %v2507_v23  ;;  %v2499_v24 = vpack.c.bf16 %v2498_v46, %v2498_v46 }
0x213e   :  { %3778 = vmatprep.subr.bf16.mxu0 %v4273_v15 }
0x2140   :  { %3769 = vmatmul.mubr.msk.bf16.vlgmr.msra.gmra.mrb[72].mxu0 %vm331_vm2, %v2499_v24  ;;  %v3069_v24 = vsel %vm209_vm0, %v5081_v45, 0.0 }
0x2141   :  { %3779 = vmatpush3.bf16.msra.mxu0 %v2619_v53  ;;  %3780 = vmatprep.mubr.msk.bf16.mxu0 %vm4274_vm1, %v4273_v15 }
0x2142   :  { %v3970_v54 = vpop.eup %3969  ;;  %3790 = vmatprep.subr.bf16.mxu0 %v4273_v15 }
0x2143   :  { %v2611_v55 = vmul.f32 %v3970_v54, %v3966_v35 }
0x2145   :  { %v2612_v61 = vpack.c.bf16 %v2611_v55, %v2611_v55 }
0x2148   :  { %3781 = vmatmul.mubr.msk.bf16.vlgmr.msra.gmra.mrb[76].mxu0 %vm331_vm2, %v2612_v61 }
0x2149   :  { %3791 = vmatpush3.bf16.msra.mxu0 %v4916_v52  ;;  %3792 = vmatprep.mubr.msk.bf16.mxu0 %vm4274_vm1, %v4273_v15 }
0x214a   :  { %3802 = vmatprep.subr.bf16.mxu0 %v4273_v15 }
0x2213   :  { %v2543_v56 = vpop.f32.mrb[72].mxu0 }
0x2214   :  { %v2549_v57 = vpack.c.bf16 %v2543_v56, %v2543_v56  ;;  %v3770_v58 = vpop.f32.mrb[73].mxu0 }
0x2215   :  { %v2546_v10 = vpop.f32.mrb[74].mxu0 }
0x2216   :  { %v3771_v59 = vpop.f32.mrb[75].mxu0  ;;  %3793 = vmatmul.mubr.msk.bf16.vlgmr.msra.gmra.mrb[80].mxu0 %vm331_vm2, %v2549_v57 }
0x2217   :  { %3804 = vmatprep.mubr.msk.bf16.mxu0 %vm4274_vm1, %v4273_v15 }
0x221b   :  { %v2655_v63 = vpop.f32.mrb[76].mxu0 }
0x221c   :  { %v2661_v1 = vpack.c.bf16 %v2655_v63, %v2655_v63  ;;  %v3782_v2 = vpop.f32.mrb[77].mxu0 }
0x221d   :  { %v2658_v52 = vpop.f32.mrb[78].mxu0 }
0x221e   :  { %v3783_v3 = vpop.f32.mrb[79].mxu0  ;;  %3787 = vmatmul.mubr.msk.bf16.vlgmr.msra.gmra.mrb[92].mxu1 %vm331_vm2, %v2661_v1 }
0x221f   :  { %3797 = vmatpush3.bf16.xpose.msra.mxu1 %v2756_v62  ;;  %3798 = vmatprep.mubr.msk.bf16.mxu1 %vm4274_vm1, %v4273_v15 }
0x2220   :  { %3808 = vmatprep.subr.bf16.mxu1 %v4273_v15 }
0x2226   :  { %3799 = vmatmul.mubr.msk.bf16.vlgmr.msra.gmra.mrb[96].mxu1 %vm331_vm2, %v2749_v4 }
0x2227   :  { %3809 = vmatpush3.bf16.msra.mxu1 %v4958_v37  ;;  %3810 = vmatprep.mubr.msk.bf16.mxu1 %vm4274_vm1, %v4273_v15 }
0x2228   :  { %3820 = vmatprep.subr.bf16.mxu1 %v4273_v15 }
0x22e9   :  { %v2742_v5 = vpop.f32.mrb[80].mxu0 }
0x22ea   :  { %v3794_v6 = vpop.f32.mrb[81].mxu0 }
0x22eb   :  { %v2745_v12 = vpop.f32.mrb[82].mxu0 }
0x22ec   :  { %v3795_v13 = vpop.f32.mrb[83].mxu0 }
0x22f1   :  { %v2699_v14 = vpop.f32.mrb[92].mxu1 }
0x22f2   :  { %v5054_v30 = vadd.f32 %v2742_v5, %v2699_v14  ;;  %v3788_v17 = vpop.f32.mrb[93].mxu1 }
0x22f3   :  { %v2702_v18 = vpop.f32.mrb[94].mxu1 }
0x22f4   :  { %v3789_v19 = vpop.f32.mrb[95].mxu1 }
0x22f9   :  { %v2792_v20 = vpop.f32.mrb[96].mxu1 }
0x22fa   :  { %v3800_v21 = vpop.f32.mrb[97].mxu1  ;;  %v2798_v22 = vsel %vm331_vm2, %v2792_v20, -inf }
0x22fb   :  { %2799 = vmax.xlane.f32.xlu0 %v2798_v22  ;;  %v2795_v37 = vpop.f32.mrb[98].mxu1 }
0x22fc   :  { %v3801_v49 = vpop.f32.mrb[99].mxu1 }
0x2311   :  { %2810 = vrot.lane.b32.xlu0 %v4979_v11, %s4281_s29 }
0x2315   :  { %2903 = vrot.lane.b32.xlu0 %v4970_v50, %s4283_s25 }
0x2388   :  { %v2800_v25 = vpop.xlane.xlu0 %2799 }
0x2389   :  { %v2801_v26 = vsub.f32 %v2792_v20, %v2800_v25 }
0x238b   :  { %v2802_v27 = vmul.f32 1.442695, %v2801_v26 }
0x238c   :  { %v2811_v28 = vpop.permute.xlu0 %2810 }
0x238d   :  { %3971 = vpow2.f32 %v2802_v27  ;;  %v2816_v29 = vsel %vm396_vm4, %v2811_v28, 0 }
0x238e   :  { %3803 = vmatpush3.bf16.msra.mxu0 %v2816_v29 }
0x238f   :  { %3814 = vmatprep.subr.bf16.mxu0 %v4273_v15 }
0x2390   :  { %v2904_v35 = vpop.permute.xlu0 %2903 }
0x2397   :  { %v3972_v31 = vpop.eup %3971 }
0x2398   :  { %v2804_v47 = vsel %vm331_vm2, %v3972_v31, 0.0 }
0x2399   :  { %2805 = vadd.xlane.f32.xlu1 %v2804_v47  ;;  %v3895_v47 = vld [vmem:[%s5188_s20] sm:$0xff]  }
0x23aa   :  { %2905 = vrot.lane.b32.xlu1 %v4979_v11, %s4283_s25 }
0x2426   :  { %v2806_v9 = vpop.xlane.xlu1 %2805 }
0x2427   :  { %3973 = vrcp.f32 %v2806_v9  ;;  %v3896_v9 = vld [vmem:[%s5188_s20 + $0x8] sm:$0xff]  }
0x242a   :  { %v2906_v40 = vpop.permute.xlu1 %2905 }
0x242b   :  { %v2911_v34 = vsel %vm331_vm2, %v2906_v40, 0  ;;  %v3899_v40 = vld [vmem:[%s5188_s20 + $0x20] sm:$0xff]  }
0x2431   :  { %v3974_v50 = vpop.eup %3973 }
0x2432   :  { %v2808_v39 = vmul.f32 %v3974_v50, %v3972_v31  ;;  %v3894_v31 = vld [vmem:[%s5186_s18 + $0x8] sm:$0xff]   ;;  %v3897_v50 = vld [vmem:[%s5188_s20 + $0x10] sm:$0xff]  }
0x2434   :  { %v2809_v33 = vpack.c.bf16 %v2808_v39, %v2808_v39  ;;  %v3898_v39 = vld [vmem:[%s5188_s20 + $0x18] sm:$0xff]  }
0x2436   :  { %3805 = vmatmul.mubr.msk.bf16.vlgmr.msra.gmra.mrb[84].mxu0 %vm331_vm2, %v2809_v33  ;;  %v3900_v33 = vld [vmem:[%s5188_s20 + $0x28] sm:$0xff]  }
0x2437   :  { %3815 = vmatpush3.bf16.xpose.msra.mxu0 %v2911_v34  ;;  %3816 = vmatprep.mubr.msk.bf16.mxu0 %vm4274_vm1, %v4273_v15 }
0x2438   :  { %3826 = vmatprep.subr.bf16.mxu0 %v4273_v15 }
0x243e   :  { %3817 = vmatmul.mubr.msk.bf16.vlgmr.msra.gmra.mrb[88].mxu0 %vm331_vm2, %v2904_v35 }
0x243f   :  { %3827 = vmatpush3.bf16.msra.mxu0 %v5007_v8  ;;  %3828 = vmatprep.mubr.msk.bf16.mxu0 %vm4274_vm1, %v4273_v15 }
0x2440   :  { %3840 = vmatprep.subr.bf16.mxu0 %v4273_v15 }
0x2509   :  { %v2852_v36 = vpop.f32.mrb[84].mxu0 }
0x250a   :  { %v2858_v38 = vpack.c.bf16 %v2852_v36, %v2852_v36  ;;  %v3806_v16 = vpop.f32.mrb[85].mxu0 }
0x250b   :  { %v2855_v41 = vpop.f32.mrb[86].mxu0 }
0x250c   :  { %v3807_v42 = vpop.f32.mrb[87].mxu0  ;;  %3811 = vmatmul.mubr.msk.bf16.vlgmr.msra.gmra.mrb[100].mxu1 %vm331_vm2, %v2858_v38 }
0x250d   :  { %3822 = vmatprep.mubr.msk.bf16.mxu1 %vm4274_vm1, %v4273_v15 }
0x2511   :  { %v2947_v8 = vpop.f32.mrb[88].mxu0 }
0x2512   :  { %v3818_v46 = vpop.f32.mrb[89].mxu0  ;;  %v2953_v48 = vsel %vm331_vm2, %v2947_v8, -inf }
0x2513   :  { %2954 = vmax.xlane.f32.xlu1 %v2953_v48  ;;  %v2950_v23 = vpop.f32.mrb[90].mxu0 }
0x2514   :  { %v3819_v51 = vpop.f32.mrb[91].mxu0  ;;  %v3389_v23 = vld [vmem:[#allocation19] ss:$0 sm:$0xff] }
0x2517   :  { %3070 = vadd.xlane.f32.xlu1 %v3069_v24 }
0x25a0   :  { %v2955_v53 = vpop.xlane.xlu1 %2954 }
0x25a1   :  { %v2956_v54 = vsub.f32 %v2947_v8, %v2955_v53 }
0x25a3   :  { %v2957_v55 = vmul.f32 1.442695, %v2956_v54 }
0x25a4   :  { %v3071_v6 = vpop.xlane.xlu1 %3070 }
0x25a5   :  { %3975 = vpow2.f32 %v2957_v55  ;;  %v3075_v12 = vmul.f32 0.03125, %v3071_v6  ;;  %v3901_v55 = vld [vmem:[%s5188_s20 + $0x30] sm:$0xff]  }
0x25a7   :  { %v3077_v18 = vsub.f32 %v5081_v45, %v3075_v12 }
0x25a9   :  { %v3079_v37 = vmul.f32 %v3077_v18, %v3077_v18 }
0x25ab   :  { %v3081_v49 = vsel %vm209_vm0, %v3079_v37, 0.0 }
0x25af   :  { %v3976_v61 = vpop.eup %3975 }
0x25b0   :  { %v2959_v32 = vsel %vm331_vm2, %v3976_v61, 0.0 }
0x25b1   :  { %2960 = vadd.xlane.f32.xlu0 %v2959_v32  ;;  %v3390_v32 = vld [vmem:[%s5187_s19] ss:$0 sm:$0xff] }
0x25c7   :  { %2965 = vrot.lane.b32.xlu0 %v4979_v11, %s4282_s9 }
0x25df   :  { %v2896_v0 = vpop.f32.mrb[100].mxu1 }
0x25e0   :  { %v2902_v56 = vadd.f32 %v2896_v0, %v5054_v30  ;;  %v3812_v57 = vpop.f32.mrb[101].mxu1 }
0x25e1   :  { %v2899_v58 = vpop.f32.mrb[102].mxu1 }
0x25e2   :  { %v3813_v10 = vpop.f32.mrb[103].mxu1 }
0x263e   :  { %v2961_v59 = vpop.xlane.xlu0 %2960 }
0x263f   :  { %3977 = vrcp.f32 %v2961_v59 }
0x2642   :  { %v2966_v60 = vpop.permute.xlu0 %2965 }
0x2643   :  { %v2971_v63 = vsel %vm396_vm4, %v2966_v60, 0 }
0x2644   :  { %3821 = vmatpush3.bf16.msra.mxu1 %v2971_v63 }
0x2645   :  { %3832 = vmatprep.subr.bf16.mxu1 %v4273_v15 }
0x2649   :  { %v3978_v1 = vpop.eup %3977 }
0x264a   :  { %v2963_v2 = vmul.f32 %v3978_v1, %v3976_v61  ;;  %v3902_v61 = vld [vmem:[%s5188_s20 + $0x38] sm:$0xff]   ;;  %s4286_s20 = smov [#allocation20]  }
0x264b   :  { %s3305_s19 = sshll.u32 %s4286_s20, 4  ;;  %s3306_s19 = int_to_ptr.vmem [resolvable:$true] %s3305_s19 }
0x264c   :  { %v2964_v52 = vpack.c.bf16 %v2963_v2, %v2963_v2  ;;  %s4226_s16 = scalar_lea.vmem %s3306_s19, 256  ;;  %p4231_p5 = scmp.lt.s32.totalorder %s3306_s19, %s3306_s19 }
0x264d   :  { %p4227_p4 = scmp.ne.s32.totalorder %s3306_s19, %s4226_s16  ;;  %p4232_p6 = scmp.lt.s32.totalorder %s4226_s16, %s4226_s16 }
0x264e   :  { %3823 = vmatmul.mubr.msk.bf16.vlgmr.msra.gmra.mrb[104].mxu1 %vm331_vm2, %v2964_v52 }
0x264f   :  { %3836 = vmatprep.mubr.msk.bf16.mxu1 %vm4274_vm1, %v4273_v15  ;;  %p4233_p7 = por %p4232_p6, %p4231_p5 }
0x2651   :  { %p4234_p8 = pnand %p4233_p7, %p4227_p4 }
0x2721   :  { %v3007_v11 = vpop.f32.mrb[104].mxu1 }
0x2722   :  { %v3013_v62 = vpack.c.bf16 %v3007_v11, %v3007_v11  ;;  %v3824_v3 = vpop.f32.mrb[105].mxu1 }
0x2723   :  { %v3010_v4 = vpop.f32.mrb[106].mxu1 }
0x2724   :  { %v3825_v5 = vpop.f32.mrb[107].mxu1  ;;  %3829 = vmatmul.mubr.msk.bf16.vlgmr.msra.gmra.mrb[92].mxu0 %vm331_vm2, %v3013_v62 }
0x2725   :  { %3856 = vmatprep.mubr.msk.bf16.mxu0 %vm4274_vm1, %v4273_v15  ;;  %3841 = vmatpush3.bf16.msra.mxu0 %v3895_v47 }
0x2726   :  { %3842 = vmatprep.subr.bf16.mxu0 %v4273_v15 }
0x2729   :  { %3843 = vmatpush3.bf16.msra.mxu0 %v3896_v9 }
0x272a   :  { %3844 = vmatprep.subr.bf16.mxu0 %v4273_v15 }
0x272d   :  { %3845 = vmatpush3.bf16.msra.mxu0 %v3897_v50 }
0x272e   :  { %3846 = vmatprep.subr.bf16.mxu0 %v4273_v15 }
0x2731   :  { %3847 = vmatpush3.bf16.msra.mxu0 %v3898_v39 }
0x2732   :  { %3848 = vmatprep.subr.bf16.mxu0 %v4273_v15 }
0x2735   :  { %3849 = vmatpush3.bf16.msra.mxu0 %v3899_v40 }
0x2736   :  { %3850 = vmatprep.subr.bf16.mxu0 %v4273_v15 }
0x2739   :  { %3851 = vmatpush3.bf16.msra.mxu0 %v3900_v33 }
0x273a   :  { %3852 = vmatprep.subr.bf16.mxu0 %v4273_v15 }
0x273d   :  { %3853 = vmatpush3.bf16.msra.mxu0 %v3901_v55 }
0x273e   :  { %3854 = vmatprep.subr.bf16.mxu0 %v4273_v15 }
0x2741   :  { %3855 = vmatpush3.bf16.msra.mxu0 %v3902_v61 }
0x27f7   :  { %v3051_v13 = vpop.f32.mrb[92].mxu0 }
0x27f8   :  { %v3057_v14 = vadd.f32 %v3051_v13, %v2902_v56  ;;  %v3830_v30 = vpop.f32.mrb[93].mxu0 }
0x27f9   :  { %v3054_v17 = vpop.f32.mrb[94].mxu0 }
0x27fa   :  { %v3059_v19 = vadd.f32 %v3057_v14, %v4830_v7  ;;  %v3831_v20 = vpop.f32.mrb[95].mxu0  ;;  %v3893_v7 = vld [vmem:[%s5186_s18] sm:$0xff]  }
0x27fb   :  { %3833 = vmatpush3.bf16.msra.mxu1 %v3893_v7 }
0x27fc   :  { %v5100_v21 = vadd.f32 %v3387_v44, %v3059_v19  ;;  %3834 = vmatprep.subr.bf16.mxu1 %v4273_v15  ;;  %v3388_v44 = vld [vmem:[#allocation17] ss:$0 sm:$0xff]  ;;  %v3394_v15 = vld [vmem:[%s5189_s21] ss:$0 sm:$0xff] }
0x27fe   :  { %v3072_v22 = vsel %vm209_vm0, %v5100_v21, 0.0 }
0x27ff   :  { %3073 = vadd.xlane.f32.xlu1 %v3072_v22  ;;  %3835 = vmatpush3.bf16.msra.mxu1 %v3894_v31 }
0x2803   :  { %3082 = vadd.xlane.f32.xlu1 %v3081_v49 }
0x288c   :  { %v3074_v25 = vpop.xlane.xlu1 %3073 }
0x288d   :  { %v3076_v26 = vmul.f32 0.03125, %v3074_v25 }
0x288f   :  { %v3078_v27 = vsub.f32 %v5100_v21, %v3076_v26 }
0x2890   :  { %v3083_v34 = vpop.xlane.xlu1 %3082 }
0x2891   :  { %v3080_v28 = vmul.f32 %v3078_v27, %v3078_v27  ;;  %v3087_v35 = vmul.f32 0.03125, %v3083_v34 }
0x2893   :  { %v3084_v29 = vsel %vm209_vm0, %v3080_v28, 0.0  ;;  %v3089_v36 = vadd.f32 1e-05, %v3087_v35 }
0x2894   :  { %3085 = vadd.xlane.f32.xlu1 %v3084_v29 }
0x2895   :  { %3979 = vrsqrt.f32 %v3089_v36 }
0x289f   :  { %v3980_v42 = vpop.eup %3979 }
0x28a0   :  { %v3093_v43 = vmul.f32 %v3980_v42, %v3077_v18 }
0x28a2   :  { %v3102_v46 = vmul.f32 %v3388_v44, %v3093_v43 }
0x28a4   :  { %v3111_v24 = vadd.f32 %v3389_v23, %v3102_v46 }
0x2921   :  { %v3086_v38 = vpop.xlane.xlu1 %3085 }
0x2922   :  { %v3088_v16 = vmul.f32 0.03125, %v3086_v38 }
0x2924   :  { %v3090_v41 = vadd.f32 1e-05, %v3088_v16 }
0x2926   :  { %3981 = vrsqrt.f32 %v3090_v41 }
0x2930   :  { %v3982_v8 = vpop.eup %3981 }
0x2931   :  { %v3094_v48 = vmul.f32 %v3982_v8, %v3078_v27 }
0x2933   :  { %v3103_v51 = vmul.f32 %v3388_v44, %v3094_v48 }
0x2935   :  { %v3112_v53 = vadd.f32 %v3389_v23, %v3103_v51 }
0x2937   :  { %v3113_v54 = vpack.c.bf16 %v3112_v53, %v3111_v24 }
0x2939   :  { %3837 = vmatmul.mubr.msk.bf16.vlgmr.msra.gmra.mrb[108].mxu1 %vm209_vm0, %v3113_v54 }
0x2a0c   :  { %v3174_v0 = vpop.f32.mrb[108].mxu1 }
0x2a0d   :  { %v3175_v56 = vadd.f32 %v3390_v32, %v3174_v0  ;;  %v3838_v57 = vpop.f32.mrb[109].mxu1 }
0x2a0e   :  { %v3177_v58 = vpop.f32.mrb[110].mxu1 }
0x2a0f   :  { %v3178_v10 = vadd.f32 %v3390_v32, %v3177_v58  ;;  %v3839_v59 = vpop.f32.mrb[111].mxu1  ;;  %v3181_v60 = vmax.f32 %v3175_v56, 0.0 }
0x2a11   :  { %v3182_v63 = vmax.f32 %v3178_v10, 0.0 }
0x2a13   :  { %v3183_v1 = vpack.c.bf16 %v3182_v63, %v3181_v60 }
0x2a15   :  { %3857 = vmatmul.mubr.bf16.vlgmr.msra.gmra.mrb[96].mxu0 %v3183_v1 }
0x2ae8   :  { %v3289_v2 = vpop.f32.mrb[96].mxu0 }
0x2ae9   :  { %v3290_v52 = vadd.f32 %v3394_v15, %v3289_v2  ;;  %v3858_v11 = vpop.f32.mrb[97].mxu0 }
0x2aea   :  { %v3292_v62 = vpop.f32.mrb[98].mxu0 }
0x2aeb   :  { %v3296_v3 = vadd.f32 %v3290_v52, %v5081_v45  ;;  %v3293_v4 = vadd.f32 %v3394_v15, %v3292_v62  ;;  %v3859_v5 = vpop.f32.mrb[99].mxu0 }
0x2aed   :  { %3298 = vst.msk [vmem:[#allocation20] sm:$0xff] %vm209_vm0, %v3296_v3  ;;  %v3297_v6 = vadd.f32 %v3293_v4, %v5100_v21 }
0x2aef   :  { %3299 = vst.msk [vmem:[#allocation20 + $0x8] sm:$0xff] %vm209_vm0, %v3297_v6 }
0x2af0   :  { %4237 = shalt.err (!%p4234_p8)
}
0x2af1   :  { %s4238_s0 = scalar_lea.hbm %s5190_s22, 256 }
0x2af2   :  { %p4239_p9 = scmp.ne.s32.totalorder %s5190_s22, %s4238_s0  ;;  %p4242_p10 = scmp.lt.u32.totalorder %s4238_s0, %s5190_s22 }
0x2af4   :  { %p4244_p11 = pnand %p4242_p10, %p4239_p9 }
0x2af6   :  { %4247 = shalt.err (!%p4244_p11)
}
0x2af7   :  { %s4287_s29 = smov 128   ;;  %s4288_s9 = smov 8  }
0x2af8   :  { %3311 = dma.vmem_to_hbm [thread:$0]  %s3306_s19, 256, %s5190_s22, [#allocation4], %s4287_s29, %s4287_s29, %s4288_s9  }
0x2af9   :  { %4260 = dma.done.wait [#allocation4], 256  }
0x2afa   :  { %4261 = vsyncadd [#allocation4], 4294967040 }
0x2afb   :  { %3315 = vsyncpa [#allocation3], 1 }
0x2afc   :  { %3316 = vsyncpa [#allocation6], 1 }
0x2afd   :  { %3317 = vsyncpa [#allocation9], 1 }
0x2afe   :  { %3318 = vsyncpa [#allocation12], 1 }
0x2aff   :  { %3319 = vsyncpa [#allocation15], 1 }
0x2b00   :  { %3320 = vsyncpa [#allocation18], 1 }
0x2b01   :  { %3321 = vsyncpa [#allocation4], 1 }

</bundles_post_ra>
